<compile_context>
chip_gen: v5e
topology: v5e:2x2
jax: 0.10.0
libtpu: 0.0.40
codegen_flags: <defaults>
</compile_context>

<pallas_src>
import functools

import jax
import jax.numpy as jnp
from jax.experimental import pallas as pl
from jax.experimental.pallas import tpu as pltpu

PATCH = 4
IN_CH = 3
EMBED_DIM = 1024      # swin-base final feature dim == ClassBlock input_dim
BOTTLENECK = 512      # linear_num
EPS = 1e-5
LANE = 128


def _round_up(x, m):
    return (x + m - 1) // m * m


# ----------------------------- Pallas kernel -------------------------------- #

def _fused_kernel(inv_n,
                  patch_ref, pe_w_ref, pe_b_ref, ln_g_ref, ln_b_ref,
                  fc_w_ref, fc_b_ref, cls_w_ref, cls_b_ref,
                  o_ref, acc_ref):
    """One (batch-tile, token-tile) step of backbone + fused ClassBlock head.

    patch_ref : (TB, TN, PPAD) bf16      pe_w_ref : (PPAD, D) bf16
    pe_b/ln_g/ln_b : (1, D) f32
    fc_w_ref  : (D, 512) bf16 (BN folded)   fc_b_ref : (1, 512) f32 (BN folded)
    cls_w_ref : (512, CPAD) bf16            cls_b_ref: (1, CPAD) f32
    o_ref     : (TB, CPAD) f32              acc_ref  : (TB, D) f32 scratch
    """
    t = pl.program_id(1)
    tb, tn, ppad = patch_ref.shape

    @pl.when(t == 0)
    def _():
        acc_ref[...] = jnp.zeros_like(acc_ref)

    # Patch-embed projection on the MXU: bf16 operands, f32 accumulation.
    p = patch_ref[...].reshape(tb * tn, ppad)                  # bf16, lane-dense K
    proj = jnp.dot(p, pe_w_ref[...], preferred_element_type=jnp.float32)
    proj = proj + pe_b_ref[...]                                # (tb*tn, D) f32

    # Final LayerNorm of forward_features (f32 elementwise — safe on v5e VPU too).
    mu = jnp.mean(proj, axis=-1, keepdims=True)
    var = jnp.mean((proj - mu) ** 2, axis=-1, keepdims=True)
    normed = (proj - mu) * jax.lax.rsqrt(var + EPS)
    normed = normed * ln_g_ref[...] + ln_b_ref[...]

    # Accumulate the token sum per batch row (mean finalized on the last tile).
    for i in range(tb):                                        # TB <= 8, unrolled
        seg = normed[i * tn:(i + 1) * tn, :]                   # (tn, D)
        acc_ref[i:i + 1, :] += jnp.sum(seg, axis=0, keepdims=True)

    @pl.when(t == pl.num_programs(1) - 1)
    def _():
        feat = acc_ref[...] * inv_n                            # (TB, D) pooled feature
        # ClassBlock: Linear(1024,512) with eval-mode BatchNorm1d folded into W/b.
        h = jnp.dot(feat.astype(jnp.bfloat16), fc_w_ref[...],
                    preferred_element_type=jnp.float32) + fc_b_ref[...]
        # TODO(synk): nn.Dropout(p=0.5) is stochastic / train-only; identity (eval) here.
        o_ref[...] = (jnp.dot(h.astype(jnp.bfloat16), cls_w_ref[...],
                              preferred_element_type=jnp.float32)
                      + cls_b_ref[...])


# ------------------------------ JAX wrapper --------------------------------- #

def _pick_batch_tile(b):
    for cand in (8, 4, 2, 1):
        if b % cand == 0:
            return cand
    return 1


def _pick_token_tile(n):
    for cand in (256, 128, 64, 32, 16):
        if cand <= n and n % cand == 0:
            return cand
    return n


def swin_for_veri_forward(x_nchw, params):
    B, C, H, W = x_nchw.shape
    nh, nw = H // PATCH, W // PATCH
    N, P = nh * nw, PATCH * PATCH * C
    D = EMBED_DIM
    PPAD = _round_up(P, LANE)
    class_num = params["cls_w"].shape[1]
    CPAD = _round_up(class_num, LANE)

    # NCHW -> NHWC -> non-overlapping 4x4 patches flattened per token,
    # lane-padded (48 -> 128) and cast to bf16 for MXU / halved DMA bytes.
    x = jnp.transpose(x_nchw, (0, 2, 3, 1))
    x = x.reshape(B, nh, PATCH, nw, PATCH, C)
    x = jnp.transpose(x, (0, 1, 3, 2, 4, 5)).reshape(B, N, P)
    x = jnp.pad(x, ((0, 0), (0, 0), (0, PPAD - P))).astype(jnp.bfloat16)

    pe_w = jnp.pad(params["pe_w"], ((0, PPAD - P), (0, 0))).astype(jnp.bfloat16)

    # Fold eval-mode BatchNorm1d (running_mean=0, running_var=1) into Linear(1024,512).
    bn_scale = params["bn_g"] * ((1.0 + EPS) ** -0.5)                # (1, 512)
    fc_w = (params["fc_w"] * bn_scale).astype(jnp.bfloat16)
    fc_b = params["fc_b"] * bn_scale + params["bn_b"]

    # Pad classifier output dim to a lane-dense width; sliced back on the host.
    cls_w = jnp.pad(params["cls_w"],
                    ((0, 0), (0, CPAD - class_num))).astype(jnp.bfloat16)
    cls_b = jnp.pad(params["cls_b"], ((0, 0), (0, CPAD - class_num)))

    TB = _pick_batch_tile(B)
    TN = _pick_token_tile(N)

    out = pl.pallas_call(
        functools.partial(_fused_kernel, 1.0 / N),
        out_shape=jax.ShapeDtypeStruct((B, CPAD), jnp.float32),
        grid=(B // TB, N // TN),
        in_specs=[
            pl.BlockSpec((TB, TN, PPAD), lambda b, t: (b, t, 0)),     # token stream
            pl.BlockSpec((PPAD, D), lambda b, t: (0, 0)),             # resident weights
            pl.BlockSpec((1, D), lambda b, t: (0, 0)),
            pl.BlockSpec((1, D), lambda b, t: (0, 0)),
            pl.BlockSpec((1, D), lambda b, t: (0, 0)),
            pl.BlockSpec((D, BOTTLENECK), lambda b, t: (0, 0)),
            pl.BlockSpec((1, BOTTLENECK), lambda b, t: (0, 0)),
            pl.BlockSpec((BOTTLENECK, CPAD), lambda b, t: (0, 0)),
            pl.BlockSpec((1, CPAD), lambda b, t: (0, 0)),
        ],
        out_specs=pl.BlockSpec((TB, CPAD), lambda b, t: (b, 0)),      # resident over t
        scratch_shapes=[pltpu.VMEM((TB, D), jnp.float32)],
        compiler_params=pltpu.CompilerParams(
            dimension_semantics=("parallel", "arbitrary"),
            vmem_limit_bytes=32 * 1024 * 1024),
    )(x, pe_w, params["pe_b"], params["ln_g"], params["ln_b"],
      fc_w, fc_b, cls_w, cls_b)

    return out[:, :class_num]


# ----------------------------- parameter init ------------------------------- #

def init_params(key, class_num):
    P = PATCH * PATCH * IN_CH
    ks = jax.random.split(key, 4)
    return {
        # synthetic backbone stand-in (patch-embed projection + final LayerNorm)
        "pe_w": jax.random.normal(ks[0], (P, EMBED_DIM), jnp.float32) * (2.0 / P) ** 0.5,
        "pe_b": jnp.zeros((1, EMBED_DIM), jnp.float32),
        "ln_g": jnp.ones((1, EMBED_DIM), jnp.float32),
        "ln_b": jnp.zeros((1, EMBED_DIM), jnp.float32),
        # ClassBlock.add_block Linear(1024,512): kaiming_normal fan_out, bias=0
        "fc_w": jax.random.normal(ks[1], (EMBED_DIM, BOTTLENECK), jnp.float32)
                * (2.0 / BOTTLENECK) ** 0.5,
        "fc_b": jnp.zeros((1, BOTTLENECK), jnp.float32),
        # BatchNorm1d(512): weight ~ N(1, 0.02), bias = 0 (eval running stats 0/1)
        "bn_g": 1.0 + 0.02 * jax.random.normal(ks[2], (1, BOTTLENECK), jnp.float32),
        "bn_b": jnp.zeros((1, BOTTLENECK), jnp.float32),
        # ClassBlock.classifier Linear(512, class_num): std=0.001, bias=0
        "cls_w": jax.random.normal(ks[3], (BOTTLENECK, class_num), jnp.float32) * 0.001,
        "cls_b": jnp.zeros((1, class_num), jnp.float32),
    }


if __name__ == "__main__":
    class_num = 8
    key = jax.random.PRNGKey(0)
    k_x, k_p = jax.random.split(key)
    x = jax.random.normal(k_x, (2, IN_CH, 16, 16), jnp.float32)   # NCHW, like PyTorch
    params = init_params(k_p, class_num)

    out = jax.jit(swin_for_veri_forward)(x, params)
    out = jax.block_until_ready(out)
    assert out.shape == (2, class_num) and out.dtype == jnp.float32
    print("KERNEL_OK")
</pallas_src>

<mosaic_0001>
module attributes {stable_mosaic.version = 11 : i64} {
  func.func @_fused_kernel(%arg0: i32, %arg1: i32, %arg2: memref<2x16x128xbf16, #tpu.memory_space<vmem>>, %arg3: memref<128x1024xbf16, #tpu.memory_space<vmem>>, %arg4: memref<1x1024xf32, #tpu.memory_space<vmem>>, %arg5: memref<1x1024xf32, #tpu.memory_space<vmem>>, %arg6: memref<1x1024xf32, #tpu.memory_space<vmem>>, %arg7: memref<1024x512xbf16, #tpu.memory_space<vmem>>, %arg8: memref<1x512xf32, #tpu.memory_space<vmem>>, %arg9: memref<512x128xbf16, #tpu.memory_space<vmem>>, %arg10: memref<1x128xf32, #tpu.memory_space<vmem>>, %arg11: memref<2x128xf32, #tpu.memory_space<vmem>>, %arg12: memref<2x1024xf32, #tpu.memory_space<vmem>>) attributes {dimension_semantics = [#tpu.dimension_semantics<parallel>, #tpu.dimension_semantics<arbitrary>], iteration_bounds = array<i64: 1, 1>, scalar_prefetch = 0 : i64, scratch_operands = 1 : i64, tpu.core_type = #tpu.core_type<tc>, window_params = [{transform_indices = @transform_0, window_bounds = array<i64: 2, 16, 128>}, {pipeline_mode = #tpu.pipeline_mode<synchronous>, transform_indices = @transform_1, window_bounds = array<i64: 128, 1024>}, {pipeline_mode = #tpu.pipeline_mode<synchronous>, transform_indices = @transform_2, window_bounds = array<i64: 1, 1024>}, {pipeline_mode = #tpu.pipeline_mode<synchronous>, transform_indices = @transform_3, window_bounds = array<i64: 1, 1024>}, {pipeline_mode = #tpu.pipeline_mode<synchronous>, transform_indices = @transform_4, window_bounds = array<i64: 1, 1024>}, {pipeline_mode = #tpu.pipeline_mode<synchronous>, transform_indices = @transform_5, window_bounds = array<i64: 1024, 512>}, {pipeline_mode = #tpu.pipeline_mode<synchronous>, transform_indices = @transform_6, window_bounds = array<i64: 1, 512>}, {pipeline_mode = #tpu.pipeline_mode<synchronous>, transform_indices = @transform_7, window_bounds = array<i64: 512, 128>}, {pipeline_mode = #tpu.pipeline_mode<synchronous>, transform_indices = @transform_8, window_bounds = array<i64: 1, 128>}, {transform_indices = @transform_9, window_bounds = array<i64: 2, 128>}]} {
    %c0_i32 = arith.constant 0 : i32
    %0 = arith.cmpi eq, %arg1, %c0_i32 : i32
    %1 = arith.extui %0 : i1 to i32
    %c0_i32_0 = arith.constant 0 : i32
    %2 = arith.cmpi ne, %1, %c0_i32_0 : i32
    scf.if %2 {
      %cst_27 = arith.constant 0.000000e+00 : f32
      %49 = vector.broadcast %cst_27 : f32 to vector<2x1024xf32>
      %c0_28 = arith.constant 0 : index
      %c0_29 = arith.constant 0 : index
      %50 = vector.load %arg12[%c0_28, %c0_29] : memref<2x1024xf32, #tpu.memory_space<vmem>>, vector<2x1024xf32>
      tpu.vector_store %arg12[%c0_28, %c0_29], %49 {strides = array<i32>} : memref<2x1024xf32, #tpu.memory_space<vmem>>, vector<2x1024xf32>,
    } else {
    }
    %c0 = arith.constant 0 : index
    %c0_1 = arith.constant 0 : index
    %c0_2 = arith.constant 0 : index
    %3 = vector.load %arg2[%c0, %c0_1, %c0_2] : memref<2x16x128xbf16, #tpu.memory_space<vmem>>, vector<2x16x128xbf16>
    %4 = vector.shape_cast %3 : vector<2x16x128xbf16> to vector<32x128xbf16>
    %c0_3 = arith.constant 0 : index
    %c0_4 = arith.constant 0 : index
    %5 = vector.load %arg3[%c0_3, %c0_4] : memref<128x1024xbf16, #tpu.memory_space<vmem>>, vector<128x1024xbf16>
    %cst = arith.constant dense<0.000000e+00> : vector<32x1024xf32>
    %6 = tpu.matmul %4, %5, %cst {dimension_numbers = #tpu.dot_dimension_numbers<[1], [0], [0], [1], [0, 0, 1, 1], [], []>} : vector<32x128xbf16>, vector<128x1024xbf16>, vector<32x1024xf32> -> vector<32x1024xf32>
    %c0_5 = arith.constant 0 : index
    %c0_6 = arith.constant 0 : index
    %7 = vector.load %arg4[%c0_5, %c0_6] : memref<1x1024xf32, #tpu.memory_space<vmem>>, vector<1x1024xf32>
    %8 = vector.broadcast %7 : vector<1x1024xf32> to vector<32x1024xf32>
    %9 = arith.addf %6, %8 : vector<32x1024xf32>
    %cst_7 = arith.constant dense<0.000000e+00> : vector<32xf32>
    %10 = vector.multi_reduction <add>, %9, %cst_7 [1] : vector<32x1024xf32> to vector<32xf32>
    %11 = vector.shape_cast %10 : vector<32xf32> to vector<32x1xf32>
    %cst_8 = arith.constant 1.024000e+03 : f32
    %12 = vector.broadcast %cst_8 : f32 to vector<32x1xf32>
    %13 = arith.divf %11, %12 : vector<32x1xf32>
    %14 = vector.broadcast %13 : vector<32x1xf32> to vector<32x1024xf32>
    %15 = arith.subf %9, %14 : vector<32x1024xf32>
    %16 = arith.mulf %15, %15 : vector<32x1024xf32>
    %cst_9 = arith.constant dense<0.000000e+00> : vector<32xf32>
    %17 = vector.multi_reduction <add>, %16, %cst_9 [1] : vector<32x1024xf32> to vector<32xf32>
    %18 = vector.shape_cast %17 : vector<32xf32> to vector<32x1xf32>
    %cst_10 = arith.constant 1.024000e+03 : f32
    %19 = vector.broadcast %cst_10 : f32 to vector<32x1xf32>
    %20 = arith.divf %18, %19 : vector<32x1xf32>
    %21 = vector.broadcast %13 : vector<32x1xf32> to vector<32x1024xf32>
    %22 = arith.subf %9, %21 : vector<32x1024xf32>
    %cst_11 = arith.constant 9.99999974E-6 : f32
    %23 = vector.broadcast %cst_11 : f32 to vector<32x1xf32>
    %24 = arith.addf %20, %23 : vector<32x1xf32>
    %25 = math.rsqrt %24 : vector<32x1xf32>
    %26 = vector.broadcast %25 : vector<32x1xf32> to vector<32x1024xf32>
    %27 = arith.mulf %22, %26 : vector<32x1024xf32>
    %c0_12 = arith.constant 0 : index
    %c0_13 = arith.constant 0 : index
    %28 = vector.load %arg5[%c0_12, %c0_13] : memref<1x1024xf32, #tpu.memory_space<vmem>>, vector<1x1024xf32>
    %29 = vector.broadcast %28 : vector<1x1024xf32> to vector<32x1024xf32>
    %30 = arith.mulf %27, %29 : vector<32x1024xf32>
    %c0_14 = arith.constant 0 : index
    %c0_15 = arith.constant 0 : index
    %31 = vector.load %arg6[%c0_14, %c0_15] : memref<1x1024xf32, #tpu.memory_space<vmem>>, vector<1x1024xf32>
    %32 = vector.broadcast %31 : vector<1x1024xf32> to vector<32x1024xf32>
    %33 = arith.addf %30, %32 : vector<32x1024xf32>
    %34 = vector.extract_strided_slice %33 {offsets = [0, 0], sizes = [16, 1024], strides = [1, 1]} : vector<32x1024xf32> to vector<16x1024xf32>
    %c0_16 = arith.constant 0 : index
    %c0_17 = arith.constant 0 : index
    %35 = vector.load %arg12[%c0_16, %c0_17] : memref<2x1024xf32, #tpu.memory_space<vmem>>, vector<1x1024xf32>
    %cst_18 = arith.constant dense<0.000000e+00> : vector<1024xf32>
    %36 = vector.multi_reduction <add>, %34, %cst_18 [0] : vector<16x1024xf32> to vector<1024xf32>
    %37 = vector.shape_cast %36 : vector<1024xf32> to vector<1x1024xf32>
    %38 = arith.addf %35, %37 : vector<1x1024xf32>
    %c0_19 = arith.constant 0 : index
    %c0_20 = arith.constant 0 : index
    %39 = vector.load %arg12[%c0_19, %c0_20] : memref<2x1024xf32, #tpu.memory_space<vmem>>, vector<1x1024xf32>
    tpu.vector_store %arg12[%c0_19, %c0_20], %38 {strides = array<i32>} : memref<2x1024xf32, #tpu.memory_space<vmem>>, vector<1x1024xf32>,
    %40 = vector.extract_strided_slice %33 {offsets = [16, 0], sizes = [16, 1024], strides = [1, 1]} : vector<32x1024xf32> to vector<16x1024xf32>
    %c1 = arith.constant 1 : index
    %c0_21 = arith.constant 0 : index
    %41 = vector.load %arg12[%c1, %c0_21] : memref<2x1024xf32, #tpu.memory_space<vmem>>, vector<1x1024xf32>
    %cst_22 = arith.constant dense<0.000000e+00> : vector<1024xf32>
    %42 = vector.multi_reduction <add>, %40, %cst_22 [0] : vector<16x1024xf32> to vector<1024xf32>
    %43 = vector.shape_cast %42 : vector<1024xf32> to vector<1x1024xf32>
    %44 = arith.addf %41, %43 : vector<1x1024xf32>
    %c1_23 = arith.constant 1 : index
    %c0_24 = arith.constant 0 : index
    %45 = vector.load %arg12[%c1_23, %c0_24] : memref<2x1024xf32, #tpu.memory_space<vmem>>, vector<1x1024xf32>
    tpu.vector_store %arg12[%c1_23, %c0_24], %44 {strides = array<i32>} : memref<2x1024xf32, #tpu.memory_space<vmem>>, vector<1x1024xf32>,
    %c0_i32_25 = arith.constant 0 : i32
    %46 = arith.cmpi eq, %arg1, %c0_i32_25 : i32
    %47 = arith.extui %46 : i1 to i32
    %c0_i32_26 = arith.constant 0 : i32
    %48 = arith.cmpi ne, %47, %c0_i32_26 : i32
    scf.if %48 {
      %c0_27 = arith.constant 0 : index
      %c0_28 = arith.constant 0 : index
      %49 = vector.load %arg12[%c0_27, %c0_28] : memref<2x1024xf32, #tpu.memory_space<vmem>>, vector<2x1024xf32>
      %cst_29 = arith.constant 6.250000e-02 : f32
      %50 = vector.broadcast %cst_29 : f32 to vector<2x1024xf32>
      %51 = arith.mulf %49, %50 : vector<2x1024xf32>
      %52 = arith.truncf %51 : vector<2x1024xf32> to vector<2x1024xbf16>
      %c0_30 = arith.constant 0 : index
      %c0_31 = arith.constant 0 : index
      %53 = vector.load %arg7[%c0_30, %c0_31] : memref<1024x512xbf16, #tpu.memory_space<vmem>>, vector<1024x512xbf16>
      %cst_32 = arith.constant dense<0.000000e+00> : vector<2x512xf32>
      %54 = tpu.matmul %52, %53, %cst_32 {dimension_numbers = #tpu.dot_dimension_numbers<[1], [0], [0], [1], [0, 0, 1, 1], [], []>} : vector<2x1024xbf16>, vector<1024x512xbf16>, vector<2x512xf32> -> vector<2x512xf32>
      %c0_33 = arith.constant 0 : index
      %c0_34 = arith.constant 0 : index
      %55 = vector.load %arg8[%c0_33, %c0_34] : memref<1x512xf32, #tpu.memory_space<vmem>>, vector<1x512xf32>
      %56 = vector.broadcast %55 : vector<1x512xf32> to vector<2x512xf32>
      %57 = arith.addf %54, %56 : vector<2x512xf32>
      %58 = arith.truncf %57 : vector<2x512xf32> to vector<2x512xbf16>
      %c0_35 = arith.constant 0 : index
      %c0_36 = arith.constant 0 : index
      %59 = vector.load %arg9[%c0_35, %c0_36] : memref<512x128xbf16, #tpu.memory_space<vmem>>, vector<512x128xbf16>
      %cst_37 = arith.constant dense<0.000000e+00> : vector<2x128xf32>
      %60 = tpu.matmul %58, %59, %cst_37 {dimension_numbers = #tpu.dot_dimension_numbers<[1], [0], [0], [1], [0, 0, 1, 1], [], []>} : vector<2x512xbf16>, vector<512x128xbf16>, vector<2x128xf32> -> vector<2x128xf32>
      %c0_38 = arith.constant 0 : index
      %c0_39 = arith.constant 0 : index
      %61 = vector.load %arg10[%c0_38, %c0_39] : memref<1x128xf32, #tpu.memory_space<vmem>>, vector<1x128xf32>
      %62 = vector.broadcast %61 : vector<1x128xf32> to vector<2x128xf32>
      %63 = arith.addf %60, %62 : vector<2x128xf32>
      %c0_40 = arith.constant 0 : index
      %c0_41 = arith.constant 0 : index
      %64 = vector.load %arg11[%c0_40, %c0_41] : memref<2x128xf32, #tpu.memory_space<vmem>>, vector<2x128xf32>
      tpu.vector_store %arg11[%c0_40, %c0_41], %63 {strides = array<i32>} : memref<2x128xf32, #tpu.memory_space<vmem>>, vector<2x128xf32>,
    } else {
    }
    return
  }
  func.func @transform_0(%arg0: i32, %arg1: i32) -> (i32, i32, i32) {
    %c0_i32 = arith.constant 0 : i32
    %c0_i32_0 = arith.constant 0 : i32
    return %arg0, %arg1, %c0_i32 : i32, i32, i32
  }
  func.func @transform_1(%arg0: i32, %arg1: i32) -> (i32, i32) {
    %c0_i32 = arith.constant 0 : i32
    %c0_i32_0 = arith.constant 0 : i32
    %c0_i32_1 = arith.constant 0 : i32
    return %c0_i32, %c0_i32_0 : i32, i32
  }
  func.func @transform_2(%arg0: i32, %arg1: i32) -> (i32, i32) {
    %c0_i32 = arith.constant 0 : i32
    %c0_i32_0 = arith.constant 0 : i32
    %c0_i32_1 = arith.constant 0 : i32
    return %c0_i32, %c0_i32_0 : i32, i32
  }
  func.func @transform_3(%arg0: i32, %arg1: i32) -> (i32, i32) {
    %c0_i32 = arith.constant 0 : i32
    %c0_i32_0 = arith.constant 0 : i32
    %c0_i32_1 = arith.constant 0 : i32
    return %c0_i32, %c0_i32_0 : i32, i32
  }
  func.func @transform_4(%arg0: i32, %arg1: i32) -> (i32, i32) {
    %c0_i32 = arith.constant 0 : i32
    %c0_i32_0 = arith.constant 0 : i32
    %c0_i32_1 = arith.constant 0 : i32
    return %c0_i32, %c0_i32_0 : i32, i32
  }
  func.func @transform_5(%arg0: i32, %arg1: i32) -> (i32, i32) {
    %c0_i32 = arith.constant 0 : i32
    %c0_i32_0 = arith.constant 0 : i32
    %c0_i32_1 = arith.constant 0 : i32
    return %c0_i32, %c0_i32_0 : i32, i32
  }
  func.func @transform_6(%arg0: i32, %arg1: i32) -> (i32, i32) {
    %c0_i32 = arith.constant 0 : i32
    %c0_i32_0 = arith.constant 0 : i32
    %c0_i32_1 = arith.constant 0 : i32
    return %c0_i32, %c0_i32_0 : i32, i32
  }
  func.func @transform_7(%arg0: i32, %arg1: i32) -> (i32, i32) {
    %c0_i32 = arith.constant 0 : i32
    %c0_i32_0 = arith.constant 0 : i32
    %c0_i32_1 = arith.constant 0 : i32
    return %c0_i32, %c0_i32_0 : i32, i32
  }
  func.func @transform_8(%arg0: i32, %arg1: i32) -> (i32, i32) {
    %c0_i32 = arith.constant 0 : i32
    %c0_i32_0 = arith.constant 0 : i32
    %c0_i32_1 = arith.constant 0 : i32
    return %c0_i32, %c0_i32_0 : i32, i32
  }
  func.func @transform_9(%arg0: i32, %arg1: i32) -> (i32, i32) {
    %c0_i32 = arith.constant 0 : i32
    %c0_i32_0 = arith.constant 0 : i32
    return %arg0, %c0_i32 : i32, i32
  }
}

</mosaic_0001>

<bundles_post_ra>
// kernel: swin_for_veri_forward.1
= control target key start
LH: loop header
LB: loop body
LE: loop exit
PB: predicated region body
PF: predicated region fallthrough
CT: control target
= control target key end

     0   :  { %s8114_s0 = inlined_call_operand.vmem [shape: bf16[2,16,128], index: 0, kind: input, shape index: {}]   ;;  %s8115_s1 = inlined_call_operand.vmem [shape: bf16[128,1024], index: 1, kind: input, shape index: {}]   ;;  %s8116_s2 = inlined_call_operand.vmem [shape: f32[1,1024], index: 2, kind: input, shape index: {}]   ;;  %s8117_s3 = inlined_call_operand.vmem [shape: f32[1,1024], index: 3, kind: input, shape index: {}]   ;;  %s8118_s4 = inlined_call_operand.vmem [shape: f32[1,1024], index: 4, kind: input, shape index: {}]   ;;  %s8119_s5 = inlined_call_operand.vmem [shape: bf16[1024,512], index: 5, kind: input, shape index: {}]   ;;  %s8120_s6 = inlined_call_operand.vmem [shape: f32[1,512], index: 6, kind: input, shape index: {}]   ;;  %s8121_s7 = inlined_call_operand.vmem [shape: bf16[512,128], index: 7, kind: input, shape index: {}]   ;;  %s8122_s8 = inlined_call_operand.vmem [shape: f32[1,128], index: 8, kind: input, shape index: {}]   ;;  %s8123_s9 = inlined_call_operand.hbm [shape: f32[2,128], index: 9, kind: output, shape index: {}]  }
   0x1   :  { %v3673_v0 = vld [vmem:[%s8115_s1 + $0x1c0] sm:$0xf]  ;;  %v4913_v2 = vld [vmem:[%s8115_s1 + $0x1c4] sm:$0xf]  ;;  %v3681_v5 = vld [vmem:[%s8115_s1 + $0x1c8] sm:$0xf] }
   0x2   :  { %v4917_v1 = vld [vmem:[%s8115_s1 + $0x1dc] sm:$0xf0]  ;;  %v3675_v4 = vld [vmem:[%s8115_s1 + $0x1e0] sm:$0xf0]  ;;  %v4918_v6 = vld [vmem:[%s8115_s1 + $0x1e4] sm:$0xf0] }
   0x3   :  { %v3674_v3 = vor.u32 %v4917_v1, %v3673_v0  ;;  %v3678_v7 = vor.u32 %v4913_v2, %v3675_v4  ;;  %v3682_v8 = vor.u32 %v4918_v6, %v3681_v5  ;;  %v4914_v9 = vld [vmem:[%s8115_s1 + $0x1cc] sm:$0xf]  ;;  %v3641_v11 = vld [vmem:[%s8115_s1 + $0x180] sm:$0xf]  ;;  %v4905_v14 = vld [vmem:[%s8115_s1 + $0x184] sm:$0xf] }
   0x4   :  { %v3683_v10 = vld [vmem:[%s8115_s1 + $0x1e8] sm:$0xf0]  ;;  %v4909_v13 = vld [vmem:[%s8115_s1 + $0x19c] sm:$0xf0]  ;;  %v3643_v15 = vld [vmem:[%s8115_s1 + $0x1a0] sm:$0xf0] }
   0x5   :  { %457 = vmatpush.bf16.msra.mxu0 %v3674_v3  ;;  %v3686_v12 = vor.u32 %v4914_v9, %v3683_v10  ;;  %476 = vmatpush.bf16.msra.mxu1 %v3678_v7  ;;  %v3642_v16 = vor.u32 %v4909_v13, %v3641_v11  ;;  %v3646_v17 = vor.u32 %v4905_v14, %v3643_v15  ;;  %v3649_v18 = vld [vmem:[%s8115_s1 + $0x188] sm:$0xf]  ;;  %v4906_v20 = vld [vmem:[%s8115_s1 + $0x18c] sm:$0xf]  ;;  %v3609_v23 = vld [vmem:[%s8115_s1 + $0x140] sm:$0xf] }
   0x6   :  { %495 = vmatpush.bf16.msra.mxu2 %v3682_v8  ;;  %v4910_v19 = vld [vmem:[%s8115_s1 + $0x1a4] sm:$0xf0]  ;;  %v3651_v22 = vld [vmem:[%s8115_s1 + $0x1a8] sm:$0xf0]  ;;  %v4901_v24 = vld [vmem:[%s8115_s1 + $0x15c] sm:$0xf0] }
   0x7   :  { %514 = vmatpush.bf16.msra.mxu3 %v3686_v12  ;;  %v3650_v21 = vor.u32 %v4910_v19, %v3649_v18  ;;  %v3654_v25 = vor.u32 %v4906_v20, %v3651_v22  ;;  %v4897_v26 = vld [vmem:[%s8115_s1 + $0x144] sm:$0xf]  ;;  %v3617_v28 = vld [vmem:[%s8115_s1 + $0x148] sm:$0xf]  ;;  %v3610_v29 = vor.u32 %v4901_v24, %v3609_v23  ;;  %v4898_v31 = vld [vmem:[%s8115_s1 + $0x14c] sm:$0xf] }
   0x8   :  { %v3611_v27 = vld [vmem:[%s8115_s1 + $0x160] sm:$0xf0]  ;;  %v4902_v30 = vld [vmem:[%s8115_s1 + $0x164] sm:$0xf0]  ;;  %v3619_v32 = vld [vmem:[%s8115_s1 + $0x168] sm:$0xf0] }
   0x9   :  { %458 = vmatpush.bf16.msra.mxu0 %v3642_v16  ;;  %477 = vmatpush.bf16.msra.mxu1 %v3646_v17  ;;  %v3614_v33 = vor.u32 %v4897_v26, %v3611_v27  ;;  %v3618_v34 = vor.u32 %v4902_v30, %v3617_v28  ;;  %v3577_v35 = vld [vmem:[%s8115_s1 + $0x100] sm:$0xf]  ;;  %v4889_v37 = vld [vmem:[%s8115_s1 + $0x104] sm:$0xf]  ;;  %v3622_v38 = vor.u32 %v4898_v31, %v3619_v32  ;;  %v3585_v40 = vld [vmem:[%s8115_s1 + $0x108] sm:$0xf] }
   0xa   :  { %496 = vmatpush.bf16.msra.mxu2 %v3650_v21  ;;  %v4893_v36 = vld [vmem:[%s8115_s1 + $0x11c] sm:$0xf0]  ;;  %v3579_v39 = vld [vmem:[%s8115_s1 + $0x120] sm:$0xf0]  ;;  %v4894_v41 = vld [vmem:[%s8115_s1 + $0x124] sm:$0xf0] }
   0xb   :  { %515 = vmatpush.bf16.msra.mxu3 %v3654_v25  ;;  %v4890_v42 = vld [vmem:[%s8115_s1 + $0x10c] sm:$0xf]  ;;  %v3578_v44 = vor.u32 %v4893_v36, %v3577_v35  ;;  %v3582_v45 = vor.u32 %v4889_v37, %v3579_v39  ;;  %v3586_v46 = vor.u32 %v4894_v41, %v3585_v40  ;;  %v3545_v47 = vld [vmem:[%s8115_s1 + $0xc0] sm:$0xf]  ;;  %v4881_v49 = vld [vmem:[%s8115_s1 + $0xc4] sm:$0xf] }
   0xc   :  { %v3587_v43 = vld [vmem:[%s8115_s1 + $0x128] sm:$0xf0]  ;;  %v4885_v48 = vld [vmem:[%s8115_s1 + $0xdc] sm:$0xf0]  ;;  %v3547_v51 = vld [vmem:[%s8115_s1 + $0xe0] sm:$0xf0] }
   0xd   :  { %459 = vmatpush.bf16.msra.mxu0 %v3610_v29  ;;  %478 = vmatpush.bf16.msra.mxu1 %v3614_v33  ;;  %v3590_v50 = vor.u32 %v4890_v42, %v3587_v43  ;;  %v3553_v52 = vld [vmem:[%s8115_s1 + $0xc8] sm:$0xf]  ;;  %v4882_v54 = vld [vmem:[%s8115_s1 + $0xcc] sm:$0xf]  ;;  %v3546_v56 = vor.u32 %v4885_v48, %v3545_v47  ;;  %v3550_v57 = vor.u32 %v4881_v49, %v3547_v51  ;;  %v3513_v59 = vld [vmem:[%s8115_s1 + $0x80] sm:$0xf] }
   0xe   :  { %497 = vmatpush.bf16.msra.mxu2 %v3618_v34  ;;  %v4886_v53 = vld [vmem:[%s8115_s1 + $0xe4] sm:$0xf0]  ;;  %v3555_v55 = vld [vmem:[%s8115_s1 + $0xe8] sm:$0xf0]  ;;  %v4877_v60 = vld [vmem:[%s8115_s1 + $0x9c] sm:$0xf0] }
   0xf   :  { %516 = vmatpush.bf16.msra.mxu3 %v3622_v38  ;;  %v3554_v58 = vor.u32 %v4886_v53, %v3553_v52  ;;  %v4873_v61 = vld [vmem:[%s8115_s1 + $0x84] sm:$0xf]  ;;  %v3558_v62 = vor.u32 %v4882_v54, %v3555_v55  ;;  %v3521_v0 = vld [vmem:[%s8115_s1 + $0x88] sm:$0xf]  ;;  %v4874_v2 = vld [vmem:[%s8115_s1 + $0x8c] sm:$0xf]  ;;  %v3514_v4 = vor.u32 %v4877_v60, %v3513_v59 }
  0x10   :  { %v3515_v63 = vld [vmem:[%s8115_s1 + $0xa0] sm:$0xf0]  ;;  %v4878_v1 = vld [vmem:[%s8115_s1 + $0xa4] sm:$0xf0]  ;;  %v3523_v3 = vld [vmem:[%s8115_s1 + $0xa8] sm:$0xf0] }
  0x11   :  { %460 = vmatpush.bf16.msra.mxu0 %v3578_v44  ;;  %479 = vmatpush.bf16.msra.mxu1 %v3582_v45  ;;  %v3518_v5 = vor.u32 %v4873_v61, %v3515_v63  ;;  %v3522_v6 = vor.u32 %v4878_v1, %v3521_v0  ;;  %v3481_v7 = vld [vmem:[%s8115_s1 + $0x40] sm:$0xf]  ;;  %v4865_v9 = vld [vmem:[%s8115_s1 + $0x44] sm:$0xf]  ;;  %v3526_v10 = vor.u32 %v4874_v2, %v3523_v3  ;;  %v3489_v12 = vld [vmem:[%s8115_s1 + $0x48] sm:$0xf] }
  0x12   :  { %498 = vmatpush.bf16.msra.mxu2 %v3586_v46  ;;  %v4869_v8 = vld [vmem:[%s8115_s1 + $0x5c] sm:$0xf0]  ;;  %v3483_v11 = vld [vmem:[%s8115_s1 + $0x60] sm:$0xf0]  ;;  %v4870_v13 = vld [vmem:[%s8115_s1 + $0x64] sm:$0xf0] }
  0x13   :  { %517 = vmatpush.bf16.msra.mxu3 %v3590_v50  ;;  %v4866_v14 = vld [vmem:[%s8115_s1 + $0x4c] sm:$0xf]  ;;  %v3482_v16 = vor.u32 %v4869_v8, %v3481_v7  ;;  %v3449_v17 = vld [vmem:[%s8115_s1] sm:$0xf]  ;;  %v3486_v18 = vor.u32 %v4865_v9, %v3483_v11  ;;  %v3490_v19 = vor.u32 %v4870_v13, %v3489_v12  ;;  %v4857_v21 = vld [vmem:[%s8115_s1 + $0x4] sm:$0xf] }
  0x14   :  { %v3491_v15 = vld [vmem:[%s8115_s1 + $0x68] sm:$0xf0]  ;;  %v4861_v20 = vld [vmem:[%s8115_s1 + $0x1c] sm:$0xf0]  ;;  %v3451_v22 = vld [vmem:[%s8115_s1 + $0x20] sm:$0xf0] }
  0x15   :  { %461 = vmatpush.bf16.msra.mxu0 %v3546_v56  ;;  %480 = vmatpush.bf16.msra.mxu1 %v3550_v57  ;;  %v3494_v23 = vor.u32 %v4866_v14, %v3491_v15  ;;  %v3457_v24 = vld [vmem:[%s8115_s1 + $0x8] sm:$0xf]  ;;  %v4858_v26 = vld [vmem:[%s8115_s1 + $0xc] sm:$0xf]  ;;  %v3689_v28 = vld [vmem:[%s8115_s1 + $0x1d0] sm:$0xf]  ;;  %v3450_v30 = vor.u32 %v4861_v20, %v3449_v17  ;;  %v3454_v33 = vor.u32 %v4857_v21, %v3451_v22 }
  0x16   :  { %499 = vmatpush.bf16.msra.mxu2 %v3554_v58  ;;  %v4862_v25 = vld [vmem:[%s8115_s1 + $0x24] sm:$0xf0]  ;;  %v3459_v27 = vld [vmem:[%s8115_s1 + $0x28] sm:$0xf0]  ;;  %v4919_v29 = vld [vmem:[%s8115_s1 + $0x1ec] sm:$0xf0] }
  0x17   :  { %518 = vmatpush.bf16.msra.mxu3 %v3558_v62  ;;  %v4915_v31 = vld [vmem:[%s8115_s1 + $0x1d4] sm:$0xf]  ;;  %v3458_v34 = vor.u32 %v4862_v25, %v3457_v24  ;;  %v5509_v35 = vld [vmem:[%s8114_s0] sm:$0xff]  ;;  %v3462_v36 = vor.u32 %v4858_v26, %v3459_v27  ;;  %v3690_v37 = vor.u32 %v4919_v29, %v3689_v28  ;;  %v3697_v38 = vld [vmem:[%s8115_s1 + $0x1d8] sm:$0xf] }
  0x18   :  { %v3691_v32 = vld [vmem:[%s8115_s1 + $0x1f0] sm:$0xf0]  ;;  %v4920_v39 = vld [vmem:[%s8115_s1 + $0x1f4] sm:$0xf0]  ;;  %v4916_v40 = vld [vmem:[%s8115_s1 + $0x1dc] sm:$0xf] }
  0x19   :  { %462 = vmatpush.bf16.msra.mxu0 %v3514_v4  ;;  %481 = vmatpush.bf16.msra.mxu1 %v3518_v5  ;;  %v3694_v41 = vor.u32 %v4915_v31, %v3691_v32  ;;  %v3699_v42 = vld [vmem:[%s8115_s1 + $0x1f8] sm:$0xf0]  ;;  %v3657_v43 = vld [vmem:[%s8115_s1 + $0x190] sm:$0xf]  ;;  %v4907_v45 = vld [vmem:[%s8115_s1 + $0x194] sm:$0xf]  ;;  %v3698_v47 = vor.u32 %v4920_v39, %v3697_v38 }
  0x1a   :  { %500 = vmatpush.bf16.msra.mxu2 %v3522_v6  ;;  %v4911_v44 = vld [vmem:[%s8115_s1 + $0x1ac] sm:$0xf0]  ;;  %v3659_v46 = vld [vmem:[%s8115_s1 + $0x1b0] sm:$0xf0]  ;;  %v3702_v48 = vor.u32 %v4916_v40, %v3699_v42  ;;  %v3665_v50 = vld [vmem:[%s8115_s1 + $0x198] sm:$0xf] }
  0x1b   :  { %519 = vmatpush.bf16.msra.mxu3 %v3526_v10  ;;  %v3658_v49 = vor.u32 %v4911_v44, %v3657_v43  ;;  %v4912_v51 = vld [vmem:[%s8115_s1 + $0x1b4] sm:$0xf0]  ;;  %v4908_v52 = vld [vmem:[%s8115_s1 + $0x19c] sm:$0xf]  ;;  %v3662_v53 = vor.u32 %v4907_v45, %v3659_v46  ;;  %v3625_v55 = vld [vmem:[%s8115_s1 + $0x150] sm:$0xf] }
  0x1c   :  { %v3667_v54 = vld [vmem:[%s8115_s1 + $0x1b8] sm:$0xf0]  ;;  %v4903_v56 = vld [vmem:[%s8115_s1 + $0x16c] sm:$0xf0]  ;;  %v4899_v57 = vld [vmem:[%s8115_s1 + $0x154] sm:$0xf]  ;;  %v3666_v59 = vor.u32 %v4912_v51, %v3665_v50 }
  0x1d   :  { %463 = vmatpush.bf16.msra.mxu0 %v3482_v16  ;;  %482 = vmatpush.bf16.msra.mxu1 %v3486_v18  ;;  %v3627_v58 = vld [vmem:[%s8115_s1 + $0x170] sm:$0xf0]  ;;  %v3670_v60 = vor.u32 %v4908_v52, %v3667_v54  ;;  %v3626_v61 = vor.u32 %v4903_v56, %v3625_v55  ;;  %v3633_v62 = vld [vmem:[%s8115_s1 + $0x158] sm:$0xf]  ;;  %v4900_v0 = vld [vmem:[%s8115_s1 + $0x15c] sm:$0xf] }
  0x1e   :  { %501 = vmatpush.bf16.msra.mxu2 %v3490_v19  ;;  %v4904_v63 = vld [vmem:[%s8115_s1 + $0x174] sm:$0xf0]  ;;  %v3630_v1 = vor.u32 %v4899_v57, %v3627_v58  ;;  %v3635_v2 = vld [vmem:[%s8115_s1 + $0x178] sm:$0xf0]  ;;  %v3593_v3 = vld [vmem:[%s8115_s1 + $0x110] sm:$0xf] }
  0x1f   :  { %520 = vmatpush.bf16.msra.mxu3 %v3494_v23  ;;  %v4895_v4 = vld [vmem:[%s8115_s1 + $0x12c] sm:$0xf0]  ;;  %v4891_v5 = vld [vmem:[%s8115_s1 + $0x114] sm:$0xf]  ;;  %v3634_v7 = vor.u32 %v4904_v63, %v3633_v62  ;;  %v3601_v8 = vld [vmem:[%s8115_s1 + $0x118] sm:$0xf]  ;;  %v3638_v9 = vor.u32 %v4900_v0, %v3635_v2 }
  0x20   :  { %v3595_v6 = vld [vmem:[%s8115_s1 + $0x130] sm:$0xf0]  ;;  %v3594_v10 = vor.u32 %v4895_v4, %v3593_v3  ;;  %v4896_v11 = vld [vmem:[%s8115_s1 + $0x134] sm:$0xf0]  ;;  %v4892_v12 = vld [vmem:[%s8115_s1 + $0x11c] sm:$0xf] }
  0x21   :  { %464 = vmatpush.bf16.msra.mxu0 %v3450_v30  ;;  %483 = vmatpush.bf16.msra.mxu1 %v3454_v33  ;;  %v3603_v13 = vld [vmem:[%s8115_s1 + $0x138] sm:$0xf0]  ;;  %v3598_v14 = vor.u32 %v4891_v5, %v3595_v6  ;;  %v3561_v15 = vld [vmem:[%s8115_s1 + $0xd0] sm:$0xf]  ;;  %v4883_v17 = vld [vmem:[%s8115_s1 + $0xd4] sm:$0xf] }
  0x22   :  { %502 = vmatpush.bf16.msra.mxu2 %v3458_v34  ;;  %v4887_v16 = vld [vmem:[%s8115_s1 + $0xec] sm:$0xf0]  ;;  %v3563_v18 = vld [vmem:[%s8115_s1 + $0xf0] sm:$0xf0] }
  0x23   :  { %521 = vmatpush.bf16.msra.mxu3 %v3462_v36 }
  0x24   :  { %465 = vmatmul.bf16.vlgmr.msra.gmra.mxu0 %v5509_v35  ;;  %484 = vmatmul.bf16.vlgmr.msra.gmra.mxu1 %v5509_v35 }
  0x25   :  { %533 = vmatpush.bf16.msrb.mxu0 %v3690_v37  ;;  %552 = vmatpush.bf16.msrb.mxu1 %v3694_v41 }
  0x26   :  { %503 = vmatmul.bf16.vlgmr.msra.gmra.mxu2 %v5509_v35  ;;  %522 = vmatmul.bf16.vlgmr.msra.gmra.mxu3 %v5509_v35 }
  0x27   :  { %571 = vmatpush.bf16.msrb.mxu2 %v3698_v47  ;;  %590 = vmatpush.bf16.msrb.mxu3 %v3702_v48 }
  0x29   :  { %534 = vmatpush.bf16.msrb.mxu0 %v3658_v49  ;;  %553 = vmatpush.bf16.msrb.mxu1 %v3662_v53 }
  0x2b   :  { %572 = vmatpush.bf16.msrb.mxu2 %v3666_v59  ;;  %591 = vmatpush.bf16.msrb.mxu3 %v3670_v60 }
  0x2d   :  { %535 = vmatpush.bf16.msrb.mxu0 %v3626_v61  ;;  %554 = vmatpush.bf16.msrb.mxu1 %v3630_v1 }
  0x2e   :  { %14 = vsyncpa [#allocation4], 0  ;;  %v3602_v19 = vor.u32 %v4896_v11, %v3601_v8  ;;  %v5614_v20 = vld [vmem:[%s8114_s0 + $0x8] sm:$0xff]  ;;  %v3606_v21 = vor.u32 %v4892_v12, %v3603_v13  ;;  %v3562_v22 = vor.u32 %v4887_v16, %v3561_v15  ;;  %v3569_v23 = vld [vmem:[%s8115_s1 + $0xd8] sm:$0xf]  ;;  %v3566_v26 = vor.u32 %v4883_v17, %v3563_v18  ;;  %s5251_s26 = smov [#allocation3]  }
  0x2f   :  { %573 = vmatpush.bf16.msrb.mxu2 %v3634_v7  ;;  %592 = vmatpush.bf16.msrb.mxu3 %v3638_v9  ;;  %v4888_v24 = vld [vmem:[%s8115_s1 + $0xf4] sm:$0xf0]  ;;  %v4884_v25 = vld [vmem:[%s8115_s1 + $0xdc] sm:$0xf]  ;;  %v3529_v28 = vld [vmem:[%s8115_s1 + $0x90] sm:$0xf] }
  0x30   :  { %v3571_v27 = vld [vmem:[%s8115_s1 + $0xf8] sm:$0xf0]  ;;  %v4879_v29 = vld [vmem:[%s8115_s1 + $0xac] sm:$0xf0]  ;;  %v4875_v30 = vld [vmem:[%s8115_s1 + $0x94] sm:$0xf]  ;;  %v3570_v32 = vor.u32 %v4888_v24, %v3569_v23 }
  0x31   :  { %536 = vmatpush.bf16.msrb.mxu0 %v3594_v10  ;;  %555 = vmatpush.bf16.msrb.mxu1 %v3598_v14  ;;  %v3531_v31 = vld [vmem:[%s8115_s1 + $0xb0] sm:$0xf0]  ;;  %v3574_v33 = vor.u32 %v4884_v25, %v3571_v27  ;;  %v3530_v34 = vor.u32 %v4879_v29, %v3529_v28  ;;  %v3537_v36 = vld [vmem:[%s8115_s1 + $0x98] sm:$0xf]  ;;  %v4876_v38 = vld [vmem:[%s8115_s1 + $0x9c] sm:$0xf] }
  0x32   :  { %v4880_v37 = vld [vmem:[%s8115_s1 + $0xb4] sm:$0xf0]  ;;  %v3534_v39 = vor.u32 %v4875_v30, %v3531_v31  ;;  %v3539_v40 = vld [vmem:[%s8115_s1 + $0xb8] sm:$0xf0]  ;;  %v3497_v41 = vld [vmem:[%s8115_s1 + $0x50] sm:$0xf] }
  0x33   :  { %574 = vmatpush.bf16.msrb.mxu2 %v3602_v19  ;;  %593 = vmatpush.bf16.msrb.mxu3 %v3606_v21  ;;  %v4871_v42 = vld [vmem:[%s8115_s1 + $0x6c] sm:$0xf0]  ;;  %v4867_v43 = vld [vmem:[%s8115_s1 + $0x54] sm:$0xf]  ;;  %v3538_v45 = vor.u32 %v4880_v37, %v3537_v36  ;;  %v3542_v46 = vor.u32 %v4876_v38, %v3539_v40  ;;  %v3505_v48 = vld [vmem:[%s8115_s1 + $0x58] sm:$0xf] }
  0x34   :  { %470 = vmatmul.bf16.gmra.mxu0 %v5614_v20  ;;  %489 = vmatmul.bf16.gmra.mxu1 %v5614_v20  ;;  %v3499_v44 = vld [vmem:[%s8115_s1 + $0x70] sm:$0xf0]  ;;  %v3498_v47 = vor.u32 %v4871_v42, %v3497_v41  ;;  %v4872_v49 = vld [vmem:[%s8115_s1 + $0x74] sm:$0xf0]  ;;  %v4868_v50 = vld [vmem:[%s8115_s1 + $0x5c] sm:$0xf] }
  0x35   :  { %537 = vmatpush.bf16.msrb.mxu0 %v3562_v22  ;;  %556 = vmatpush.bf16.msrb.mxu1 %v3566_v26  ;;  %v3502_v51 = vor.u32 %v4867_v43, %v3499_v44  ;;  %v3507_v52 = vld [vmem:[%s8115_s1 + $0x78] sm:$0xf0]  ;;  %v3465_v53 = vld [vmem:[%s8115_s1 + $0x10] sm:$0xf]  ;;  %v4859_v55 = vld [vmem:[%s8115_s1 + $0x14] sm:$0xf]  ;;  %v3506_v57 = vor.u32 %v4872_v49, %v3505_v48 }
  0x36   :  { %508 = vmatmul.bf16.gmra.mxu2 %v5614_v20  ;;  %527 = vmatmul.bf16.gmra.mxu3 %v5614_v20  ;;  %v4863_v54 = vld [vmem:[%s8115_s1 + $0x2c] sm:$0xf0]  ;;  %v3467_v56 = vld [vmem:[%s8115_s1 + $0x30] sm:$0xf0]  ;;  %v3510_v58 = vor.u32 %v4868_v50, %v3507_v52  ;;  %v3473_v60 = vld [vmem:[%s8115_s1 + $0x18] sm:$0xf] }
  0x37   :  { %575 = vmatpush.bf16.msrb.mxu2 %v3570_v32  ;;  %594 = vmatpush.bf16.msrb.mxu3 %v3574_v33  ;;  %v3466_v59 = vor.u32 %v4863_v54, %v3465_v53  ;;  %v4864_v61 = vld [vmem:[%s8115_s1 + $0x34] sm:$0xf0]  ;;  %v3470_v62 = vor.u32 %v4859_v55, %v3467_v56  ;;  %v4860_v63 = vld [vmem:[%s8115_s1 + $0x1c] sm:$0xf]  ;;  %vm1008_vm8 = vcmask 1040384   ;;  %vm1010_vm9 = vcmask 1042434  }
  0x38   :  { %v3475_v0 = vld [vmem:[%s8115_s1 + $0x38] sm:$0xf0]  ;;  %v3474_v1 = vor.u32 %v4864_v61, %v3473_v60  ;;  %vm1012_vm10 = vcmask 1041408   ;;  %vm1014_vm11 = vcmask 1044484   ;;  %vm1016_vm12 = vcmask 1046534   ;;  %s3428_s27 = sshll.u32 %s5251_s26, 4  ;;  %s3429_s27 = int_to_ptr.vmem [resolvable:$true] %s3428_s27 }
  0x39   :  { %538 = vmatpush.bf16.msrb.mxu0 %v3530_v34  ;;  %557 = vmatpush.bf16.msrb.mxu1 %v3534_v39  ;;  %v3478_v2 = vor.u32 %v4860_v63, %v3475_v0  ;;  %vm1018_vm14 = vcmask 1045508   ;;  %vm1020_vm15 = vcmask 1043456   ;;  %s3430_s0 = sshll.u32 %s8123_s9, 4  ;;  %s3431_s0 = int_to_ptr.hbm [resolvable:$true] %s3430_s0 }
  0x3b   :  { %576 = vmatpush.bf16.msrb.mxu2 %v3538_v45  ;;  %595 = vmatpush.bf16.msrb.mxu3 %v3542_v46 }
  0x3d   :  { %539 = vmatpush.bf16.msrb.mxu0 %v3498_v47  ;;  %558 = vmatpush.bf16.msrb.mxu1 %v3502_v51 }
  0x3f   :  { %577 = vmatpush.bf16.msrb.mxu2 %v3506_v57  ;;  %596 = vmatpush.bf16.msrb.mxu3 %v3510_v58 }
  0x41   :  { %540 = vmatpush.bf16.msrb.mxu0 %v3466_v59  ;;  %559 = vmatpush.bf16.msrb.mxu1 %v3470_v62 }
  0x43   :  { %578 = vmatpush.bf16.msrb.mxu2 %v3474_v1  ;;  %597 = vmatpush.bf16.msrb.mxu3 %v3478_v2 }
  0x44   :  { %541 = vmatmul.bf16.vlgmr.msrb.gmra.mxu0 %v5509_v35  ;;  %560 = vmatmul.bf16.vlgmr.msrb.gmra.mxu1 %v5509_v35 }
  0x46   :  { %579 = vmatmul.bf16.vlgmr.msrb.gmra.mxu2 %v5509_v35  ;;  %598 = vmatmul.bf16.vlgmr.msrb.gmra.mxu3 %v5509_v35  ;;  %v107_v35 = vld [vmem:[%s8116_s2] sm:$0xff] }
  0x47   :  { %v109_v13 = vperm.slane %v107_v35, 0  ;;  %v110_v14 = vperm.slane %v107_v35, 1  ;;  %v111_v15 = vperm.slane %v107_v35, 2  ;;  %v112_v23 = vperm.slane %v107_v35, 3 }
  0x48   :  { %v5723_v25 = vperm.slane %v107_v35, 4  ;;  %v5732_v33 = vperm.slane %v107_v35, 5  ;;  %v115_v42 = vperm.slane %v107_v35, 6  ;;  %v116_v43 = vperm.slane %v107_v35, 7 }
  0x54   :  { %546 = vmatmul.bf16.gmra.mxu0 %v5614_v20  ;;  %565 = vmatmul.bf16.gmra.mxu1 %v5614_v20 }
  0x56   :  { %584 = vmatmul.bf16.gmra.mxu2 %v5614_v20  ;;  %603 = vmatmul.bf16.gmra.mxu3 %v5614_v20 }
  0xa1   :  { %v466_v3 = vpop.f32.mrf.mxu0  ;;  %v485_v4 = vpop.f32.mrf.mxu1 }
  0xa2   :  { %v5715_v17 = vadd.f32 %v466_v3, %v109_v13  ;;  %v5717_v18 = vadd.f32 %v485_v4, %v110_v14 }
  0xa4   :  { %v609_v24 = vadd.f32 %v5717_v18, %v5715_v17 }
  0xa9   :  { %v504_v5 = vpop.f32.mrf.mxu2  ;;  %v523_v6 = vpop.f32.mrf.mxu3 }
  0xaa   :  { %v468_v7 = vpop.f32.mrf.mxu0  ;;  %v487_v8 = vpop.f32.mrf.mxu1  ;;  %v5719_v22 = vadd.f32 %v504_v5, %v111_v15  ;;  %v5726_v27 = vadd.f32 %v523_v6, %v112_v23 }
  0xab   :  { %v5728_v29 = vadd.f32 %v468_v7, %v109_v13  ;;  %v5730_v30 = vadd.f32 %v487_v8, %v110_v14 }
  0xac   :  { %v610_v26 = vadd.f32 %v609_v24, %v5719_v22 }
  0xad   :  { %v618_v39 = vadd.f32 %v5730_v30, %v5728_v29 }
  0xae   :  { %v611_v37 = vadd.f32 %v610_v26, %v5726_v27 }
  0xb1   :  { %v506_v9 = vpop.f32.mrf.mxu2  ;;  %v525_v10 = vpop.f32.mrf.mxu3 }
  0xb2   :  { %v471_v11 = vpop.f32.mrf.mxu0  ;;  %v490_v12 = vpop.f32.mrf.mxu1  ;;  %v5738_v38 = vadd.f32 %v506_v9, %v111_v15  ;;  %v5747_v45 = vadd.f32 %v525_v10, %v112_v23 }
  0xb3   :  { %v5749_v47 = vadd.f32 %v471_v11, %v109_v13  ;;  %v5751_v48 = vadd.f32 %v490_v12, %v110_v14 }
  0xb4   :  { %v619_v44 = vadd.f32 %v618_v39, %v5738_v38 }
  0xb5   :  { %v627_v59 = vadd.f32 %v5751_v48, %v5749_v47 }
  0xb6   :  { %v620_v56 = vadd.f32 %v619_v44, %v5747_v45 }
  0xb9   :  { %v509_v16 = vpop.f32.mrf.mxu2  ;;  %v528_v19 = vpop.f32.mrf.mxu3 }
  0xba   :  { %v473_v20 = vpop.f32.mrf.mxu0  ;;  %v492_v21 = vpop.f32.mrf.mxu1  ;;  %v5762_v57 = vadd.f32 %v509_v16, %v111_v15  ;;  %v5770_v63 = vadd.f32 %v528_v19, %v112_v23 }
  0xbb   :  { %v5775_v2 = vadd.f32 %v473_v20, %v109_v13  ;;  %v5777_v3 = vadd.f32 %v492_v21, %v110_v14 }
  0xbc   :  { %v628_v62 = vadd.f32 %v627_v59, %v5762_v57  ;;  %v5249_v59 = vmov 1024.0  }
  0xbd   :  { %v636_v13 = vadd.f32 %v5777_v3, %v5775_v2  ;;  %5213 = vrcp.f32 %v5249_v59 }
  0xbe   :  { %v629_v10 = vadd.f32 %v628_v62, %v5770_v63 }
  0xc1   :  { %v511_v28 = vpop.f32.mrf.mxu2  ;;  %v530_v31 = vpop.f32.mrf.mxu3 }
  0xc2   :  { %v542_v32 = vpop.f32.mrf.mxu0  ;;  %v561_v36 = vpop.f32.mrf.mxu1  ;;  %v5786_v11 = vadd.f32 %v511_v28, %v111_v15  ;;  %v5799_v15 = vadd.f32 %v530_v31, %v112_v23 }
  0xc3   :  { %v5735_v34 = vadd.f32 %v542_v32, %v5723_v25  ;;  %v5744_v41 = vadd.f32 %v561_v36, %v5732_v33 }
  0xc4   :  { %v637_v20 = vadd.f32 %v636_v13, %v5786_v11 }
  0xc5   :  { %v612_v40 = vadd.f32 %v611_v37, %v5735_v34 }
  0xc6   :  { %v638_v39 = vadd.f32 %v637_v20, %v5799_v15 }
  0xc7   :  { %v613_v49 = vadd.f32 %v612_v40, %v5744_v41 }
  0xc9   :  { %v580_v46 = vpop.f32.mrf.mxu2  ;;  %v599_v51 = vpop.f32.mrf.mxu3 }
  0xca   :  { %v5754_v50 = vadd.f32 %v580_v46, %v115_v42  ;;  %v544_v52 = vpop.f32.mrf.mxu0  ;;  %v5756_v53 = vadd.f32 %v599_v51, %v116_v43  ;;  %v563_v55 = vpop.f32.mrf.mxu1 }
  0xcb   :  { %v5759_v54 = vadd.f32 %v544_v52, %v5723_v25  ;;  %v5773_v0 = vadd.f32 %v563_v55, %v5732_v33 }
  0xcc   :  { %v614_v58 = vadd.f32 %v613_v49, %v5754_v50 }
  0xcd   :  { %v621_v60 = vadd.f32 %v620_v56, %v5759_v54 }
  0xce   :  { %v615_v61 = vadd.f32 %v614_v58, %v5756_v53 }
  0xcf   :  { %v622_v4 = vadd.f32 %v621_v60, %v5773_v0  ;;  %v5214_v60 = vpop.eup %5213 }
  0xd0   :  { %616 = vadd.xlane.f32.xlu0 %v615_v61  ;;  %v646_v61 = vmul.f32 1024.0, %v5214_v60  ;;  %vm650_vm0 = vweird.f32 %v5214_v60 }
  0xd1   :  { %v582_v1 = vpop.f32.mrf.mxu2  ;;  %v601_v6 = vpop.f32.mrf.mxu3 }
  0xd2   :  { %v5780_v5 = vadd.f32 %v582_v1, %v115_v42  ;;  %v547_v7 = vpop.f32.mrf.mxu0  ;;  %v566_v9 = vpop.f32.mrf.mxu1  ;;  %v5789_v12 = vadd.f32 %v601_v6, %v116_v43 }
  0xd3   :  { %v5783_v8 = vadd.f32 %v547_v7, %v5723_v25  ;;  %v5795_v16 = vadd.f32 %v566_v9, %v5732_v33 }
  0xd4   :  { %v623_v35 = vadd.f32 %v622_v4, %v5780_v5 }
  0xd5   :  { %v630_v14 = vadd.f32 %v629_v10, %v5783_v8 }
  0xd6   :  { %v624_v19 = vadd.f32 %v623_v35, %v5789_v12 }
  0xd7   :  { %v631_v24 = vadd.f32 %v630_v14, %v5795_v16 }
  0xd8   :  { %625 = vadd.xlane.f32.xlu0 %v624_v19 }
  0xd9   :  { %v585_v21 = vpop.f32.mrf.mxu2  ;;  %v604_v28 = vpop.f32.mrf.mxu3 }
  0xda   :  { %v5802_v26 = vadd.f32 %v585_v21, %v115_v42  ;;  %v549_v32 = vpop.f32.mrf.mxu0  ;;  %v5804_v36 = vadd.f32 %v604_v28, %v116_v43  ;;  %v568_v44 = vpop.f32.mrf.mxu1 }
  0xdb   :  { %v5807_v37 = vadd.f32 %v549_v32, %v5723_v25  ;;  %v5814_v31 = vadd.f32 %v568_v44, %v5732_v33  ;;  %v647_v33 = vsub.f32 1.0, %v646_v61 }
  0xdc   :  { %v632_v40 = vadd.f32 %v631_v24, %v5802_v26 }
  0xdd   :  { %v639_v46 = vadd.f32 %v638_v39, %v5807_v37  ;;  %v648_v62 = vmul.f32 %v5214_v60, %v647_v33 }
  0xde   :  { %v633_v23 = vadd.f32 %v632_v40, %v5804_v36 }
  0xdf   :  { %v640_v51 = vadd.f32 %v639_v46, %v5814_v31  ;;  %v649_v1 = vadd.f32 %v5214_v60, %v648_v62 }
  0xe0   :  { %634 = vadd.xlane.f32.xlu1 %v633_v23 }
  0xe1   :  { %v587_v49 = vpop.f32.mrf.mxu2  ;;  %v606_v25 = vpop.f32.mrf.mxu3  ;;  %v5823_v4 = vsel %vm650_vm0, %v5214_v60, %v649_v1 }
  0xe2   :  { %v5817_v52 = vadd.f32 %v587_v49, %v115_v42  ;;  %v5820_v56 = vadd.f32 %v606_v25, %v116_v43 }
  0xe4   :  { %v641_v55 = vadd.f32 %v640_v51, %v5817_v52 }
  0xe6   :  { %v642_v58 = vadd.f32 %v641_v55, %v5820_v56 }
  0xe8   :  { %643 = vadd.xlane.f32.xlu1 %v642_v58 }
 0x143   :  { %v617_v42 = vpop.xlane.xlu0 %616 }
 0x144   :  { %v652_v6 = vmul.f32 %v5823_v4, %v617_v42 }
 0x146   :  { %v5827_v7 = vsub.f32 %v5715_v17, %v652_v6  ;;  %v5830_v43 = vsub.f32 %v5717_v18, %v652_v6  ;;  %v5833_v9 = vsub.f32 %v5719_v22, %v652_v6  ;;  %v5836_v10 = vsub.f32 %v5726_v27, %v652_v6 }
 0x147   :  { %v5843_v14 = vsub.f32 %v5735_v34, %v652_v6  ;;  %v5848_v22 = vsub.f32 %v5744_v41, %v652_v6  ;;  %v5854_v24 = vsub.f32 %v5754_v50, %v652_v6  ;;  %v5868_v40 = vsub.f32 %v5756_v53, %v652_v6 }
 0x148   :  { %v688_v35 = vmul.f32 %v5827_v7, %v5827_v7  ;;  %v689_v13 = vmul.f32 %v5830_v43, %v5830_v43  ;;  %v690_v17 = vmul.f32 %v5833_v9, %v5833_v9  ;;  %v691_v20 = vmul.f32 %v5836_v10, %v5836_v10 }
 0x149   :  { %v692_v34 = vmul.f32 %v5843_v14, %v5843_v14  ;;  %v693_v50 = vmul.f32 %v5848_v22, %v5848_v22 }
 0x14a   :  { %v720_v18 = vadd.f32 %v689_v13, %v688_v35 }
 0x14b   :  { %v626_v19 = vpop.xlane.xlu0 %625 }
 0x14c   :  { %v653_v27 = vmul.f32 %v5823_v4, %v626_v19  ;;  %v721_v21 = vadd.f32 %v720_v18, %v690_v17 }
 0x14e   :  { %v722_v28 = vadd.f32 %v721_v21, %v691_v20  ;;  %v5859_v32 = vsub.f32 %v5728_v29, %v653_v27  ;;  %v5862_v39 = vsub.f32 %v5730_v30, %v653_v27  ;;  %v5865_v41 = vsub.f32 %v5738_v38, %v653_v27 }
 0x14f   :  { %v5873_v46 = vsub.f32 %v5747_v45, %v653_v27  ;;  %v5880_v23 = vsub.f32 %v5759_v54, %v653_v27  ;;  %v694_v38 = vmul.f32 %v5854_v24, %v5854_v24  ;;  %v695_v45 = vmul.f32 %v5868_v40, %v5868_v40 }
 0x150   :  { %v723_v44 = vadd.f32 %v722_v28, %v692_v34  ;;  %v696_v29 = vmul.f32 %v5859_v32, %v5859_v32  ;;  %v697_v30 = vmul.f32 %v5862_v39, %v5862_v39  ;;  %v698_v49 = vmul.f32 %v5865_v41, %v5865_v41 }
 0x151   :  { %v5889_v55 = vsub.f32 %v5773_v0, %v653_v27  ;;  %v699_v54 = vmul.f32 %v5873_v46, %v5873_v46  ;;  %v5895_v61 = vsub.f32 %v5780_v5, %v653_v27  ;;  %v700_v33 = vmul.f32 %v5880_v23, %v5880_v23 }
 0x152   :  { %v724_v53 = vadd.f32 %v723_v44, %v693_v50  ;;  %v729_v51 = vadd.f32 %v697_v30, %v696_v29  ;;  %v5909_v35 = vsub.f32 %v5789_v12, %v653_v27 }
 0x153   :  { %v635_v25 = vpop.xlane.xlu1 %634  ;;  %v701_v5 = vmul.f32 %v5889_v55, %v5889_v55 }
 0x154   :  { %v654_v58 = vmul.f32 %v5823_v4, %v635_v25  ;;  %v725_v59 = vadd.f32 %v724_v53, %v694_v38  ;;  %v730_v60 = vadd.f32 %v729_v51, %v698_v49 }
 0x156   :  { %v726_v62 = vadd.f32 %v725_v59, %v695_v45  ;;  %v731_v1 = vadd.f32 %v730_v60, %v699_v54  ;;  %v5900_v42 = vsub.f32 %v5749_v47, %v654_v58  ;;  %v5903_v0 = vsub.f32 %v5751_v48, %v654_v58 }
 0x157   :  { %v5906_v6 = vsub.f32 %v5762_v57, %v654_v58  ;;  %v5916_v47 = vsub.f32 %v5770_v63, %v654_v58  ;;  %v702_v57 = vmul.f32 %v5895_v61, %v5895_v61  ;;  %v5923_v12 = vsub.f32 %v5783_v8, %v654_v58 }
 0x158   :  { %727 = vadd.xlane.f32.xlu2 %v726_v62  ;;  %v732_v13 = vadd.f32 %v731_v1, %v700_v33  ;;  %v704_v17 = vmul.f32 %v5900_v42, %v5900_v42  ;;  %v705_v48 = vmul.f32 %v5903_v0, %v5903_v0  ;;  %v703_v63 = vmul.f32 %v5909_v35, %v5909_v35 }
 0x159   :  { %v706_v27 = vmul.f32 %v5906_v6, %v5906_v6  ;;  %v5931_v28 = vsub.f32 %v5795_v16, %v654_v58  ;;  %v707_v50 = vmul.f32 %v5916_v47, %v5916_v47  ;;  %v5945_v53 = vsub.f32 %v5802_v26, %v654_v58 }
 0x15a   :  { %v733_v18 = vadd.f32 %v732_v13, %v701_v5  ;;  %v738_v20 = vadd.f32 %v705_v48, %v704_v17  ;;  %v708_v16 = vmul.f32 %v5923_v12, %v5923_v12 }
 0x15b   :  { %v644_v19 = vpop.xlane.xlu1 %643  ;;  %v709_v26 = vmul.f32 %v5931_v28, %v5931_v28  ;;  %v710_v54 = vmul.f32 %v5945_v53, %v5945_v53 }
 0x15c   :  { %v655_v21 = vmul.f32 %v5823_v4, %v644_v19  ;;  %v734_v34 = vadd.f32 %v733_v18, %v702_v57  ;;  %v739_v44 = vadd.f32 %v738_v20, %v706_v27 }
 0x15e   :  { %v735_v29 = vadd.f32 %v734_v34, %v703_v63  ;;  %v5936_v8 = vsub.f32 %v5775_v2, %v655_v21  ;;  %v5939_v30 = vsub.f32 %v5777_v3, %v655_v21  ;;  %v5942_v38 = vsub.f32 %v5786_v11, %v655_v21 }
 0x15f   :  { %v740_v49 = vadd.f32 %v739_v44, %v707_v50  ;;  %v5950_v51 = vsub.f32 %v5799_v15, %v655_v21  ;;  %v5957_v11 = vsub.f32 %v5804_v36, %v654_v58  ;;  %v5962_v45 = vsub.f32 %v5807_v37, %v655_v21 }
 0x160   :  { %8135 = vst [vmem:[#allocation6_spill] sm:$0xff] %v5936_v8  ;;  %736 = vadd.xlane.f32.xlu2 %v735_v29  ;;  %v712_v2 = vmul.f32 %v5936_v8, %v5936_v8  ;;  %v713_v3 = vmul.f32 %v5939_v30, %v5939_v30  ;;  %v714_v15 = vmul.f32 %v5942_v38, %v5942_v38  ;;  %v5250_v63 = vmov 0.0  }
 0x161   :  { %8136 = vst [vmem:[#allocation7_spill] sm:$0xff] %v5939_v30  ;;  %v741_v25 = vadd.f32 %v740_v49, %v708_v16  ;;  %v5969_v33 = vsub.f32 %v5814_v31, %v655_v21  ;;  %v715_v36 = vmul.f32 %v5950_v51, %v5950_v51  ;;  %v711_v62 = vmul.f32 %v5957_v11, %v5957_v11 }
 0x162   :  { %8137 = vst [vmem:[#allocation8_spill] sm:$0xff] %v5942_v38  ;;  %v747_v59 = vadd.f32 %v713_v3, %v712_v2  ;;  %v5976_v1 = vsub.f32 %v5817_v52, %v655_v21  ;;  %v716_v5 = vmul.f32 %v5962_v45, %v5962_v45  ;;  %v5981_v48 = vsub.f32 %v5820_v56, %v655_v21 }
 0x163   :  { %8138 = vst [vmem:[#allocation9_spill] sm:$0xff] %v5950_v51  ;;  %v742_v60 = vadd.f32 %v741_v25, %v709_v26  ;;  %v717_v31 = vmul.f32 %v5969_v33, %v5969_v33  ;;  %v836_v26 = vld [vmem:[%s8117_s3] sm:$0xff] }
 0x164   :  { %8139 = vst [vmem:[#allocation10_spill] sm:$0xff] %v5962_v45  ;;  %v748_v58 = vadd.f32 %v747_v59, %v714_v15  ;;  %v718_v18 = vmul.f32 %v5976_v1, %v5976_v1  ;;  %v719_v52 = vmul.f32 %v5981_v48, %v5981_v48 }
 0x165   :  { %8140 = vst [vmem:[#allocation11_spill] sm:$0xff] %v5969_v33  ;;  %v743_v37 = vadd.f32 %v742_v60, %v710_v54  ;;  %v6000_v60 = vperm.slane %v836_v26, 0  ;;  %v5047_v33 = vld [vmem:[%s8119_s5 + $0x3ec] sm:$0xf0] }
 0x166   :  { %8141 = vst [vmem:[#allocation12_spill] sm:$0xff] %v5976_v1  ;;  %v749_v13 = vadd.f32 %v748_v58, %v715_v36 }
 0x167   :  { %v744_v17 = vadd.f32 %v743_v37, %v711_v62  ;;  %8142 = vst [vmem:[#allocation13_spill] sm:$0xff] %v5981_v48  ;;  %v6004_v62 = vperm.slane %v836_v26, 1  ;;  %v6006_v37 = vperm.slane %v836_v26, 2 }
 0x168   :  { %v750_v57 = vadd.f32 %v749_v13, %v716_v5  ;;  %37 = vst [vmem:[#allocation2] sm:$0xff] %v5250_v63  ;;  %v6008_v5 = vperm.slane %v836_v26, 3 }
 0x169   :  { %745 = vadd.xlane.f32.xlu0 %v744_v17  ;;  %38 = vst [vmem:[#allocation2 + $0x8] sm:$0xff] %v5250_v63  ;;  %v6012_v17 = vperm.slane %v836_v26, 4 }
 0x16a   :  { %v751_v19 = vadd.f32 %v750_v57, %v717_v31  ;;  %v6014_v31 = vperm.slane %v836_v26, 5  ;;  %v886_v57 = vld [vmem:[%s8118_s4] sm:$0xff] }
 0x16b   :  { %v6059_v48 = vperm.slane %v886_v57, 7 }
 0x16c   :  { %v752_v27 = vadd.f32 %v751_v19, %v718_v18  ;;  %v6020_v19 = vperm.slane %v836_v26, 6 }
 0x16e   :  { %v753_v20 = vadd.f32 %v752_v27, %v719_v52  ;;  %v6022_v52 = vperm.slane %v836_v26, 7 }
 0x170   :  { %754 = vadd.xlane.f32.xlu1 %v753_v20 }
 0x1cb   :  { %v728_v56 = vpop.xlane.xlu2 %727 }
 0x1cc   :  { %v756_v21 = vmul.f32 %v728_v56, %v5823_v4 }
 0x1ce   :  { %v760_v34 = vadd.f32 1e-05, %v756_v21 }
 0x1d0   :  { %5215 = vrsqrt.f32 %v760_v34  ;;  %vm770_vm2 = vweird.f32 %v760_v34 }
 0x1d3   :  { %v737_v50 = vpop.xlane.xlu2 %736 }
 0x1d4   :  { %v757_v44 = vmul.f32 %v737_v50, %v5823_v4  ;;  %v6030_v50 = vperm.slane %v886_v57, 0 }
 0x1d6   :  { %v5216_v29 = vpop.eup %5215  ;;  %v5991_v16 = vadd.f32 1e-05, %v757_v44  ;;  %v6032_v44 = vperm.slane %v886_v57, 1 }
 0x1d7   :  { %v765_v49 = vmul.f32 %v5216_v29, %v760_v34  ;;  %vm771_vm1 = vweird.f32 %v5216_v29 }
 0x1d8   :  { %5217 = vrsqrt.f32 %v5991_v16  ;;  %vm772_vm3 = vmor %vm770_vm2, %vm771_vm1  ;;  %vm780_vm4 = vweird.f32 %v5991_v16 }
 0x1d9   :  { %v766_v2 = vmul.f32 %v5216_v29, %v765_v49 }
 0x1db   :  { %v767_v3 = vmul.f32 0.5, %v766_v2  ;;  %v6036_v2 = vperm.slane %v886_v57, 2 }
 0x1dc   :  { %v746_v25 = vpop.xlane.xlu0 %745 }
 0x1dd   :  { %v768_v15 = vsub.f32 1.5, %v767_v3  ;;  %v758_v59 = vmul.f32 %v746_v25, %v5823_v4 }
 0x1de   :  { %v5998_v54 = vpop.eup %5217 }
 0x1df   :  { %v769_v36 = vmul.f32 %v5216_v29, %v768_v15  ;;  %v6002_v58 = vadd.f32 1e-05, %v758_v59  ;;  %v775_v13 = vmul.f32 %v5998_v54, %v5991_v16  ;;  %vm781_vm5 = vweird.f32 %v5998_v54 }
 0x1e0   :  { %vm782_vm6 = vmor %vm780_vm4, %vm781_vm5 }
 0x1e1   :  { %v773_v18 = vsel %vm772_vm3, %v5216_v29, %v769_v36  ;;  %5219 = vrsqrt.f32 %v6002_v58  ;;  %v776_v49 = vmul.f32 %v5998_v54, %v775_v13  ;;  %vm790_vm13 = vweird.f32 %v6002_v58 }
 0x1e2   :  { %v804_v27 = vmul.f32 %v773_v18, %v5827_v7  ;;  %v805_v20 = vmul.f32 %v773_v18, %v5830_v43  ;;  %v806_v63 = vmul.f32 %v773_v18, %v5833_v9  ;;  %v807_v56 = vmul.f32 %v773_v18, %v5836_v10 }
 0x1e3   :  { %v808_v21 = vmul.f32 %v773_v18, %v5843_v14  ;;  %v809_v34 = vmul.f32 %v773_v18, %v5848_v22  ;;  %v810_v29 = vmul.f32 %v773_v18, %v5854_v24  ;;  %v6038_v7 = vperm.slane %v886_v57, 3  ;;  %v755_v10 = vpop.xlane.xlu1 %754 }
 0x1e4   :  { %v6040_v43 = vperm.slane %v886_v57, 4  ;;  %v811_v9 = vmul.f32 %v773_v18, %v5868_v40  ;;  %v6043_v14 = vperm.slane %v886_v57, 5  ;;  %v6045_v22 = vperm.slane %v886_v57, 6 }
 0x1e5   :  { %v854_v3 = vmul.f32 %v6000_v60, %v804_v27  ;;  %v855_v26 = vmul.f32 %v6004_v62, %v805_v20  ;;  %v856_v25 = vmul.f32 %v6006_v37, %v806_v63  ;;  %v857_v15 = vmul.f32 %v6008_v5, %v807_v56 }
 0x1e6   :  { %8143 = vst [vmem:[#allocation14_spill] sm:$0xff] %v6045_v22  ;;  %v858_v59 = vmul.f32 %v6012_v17, %v808_v21  ;;  %v859_v36 = vmul.f32 %v6014_v31, %v809_v34  ;;  %v860_v40 = vmul.f32 %v6020_v19, %v810_v29  ;;  %v777_v13 = vmul.f32 0.5, %v776_v49  ;;  %v3817_v29 = vld [vmem:[%s8119_s5 + $0xe0] sm:$0xf] }
 0x1e7   :  { %v6049_v24 = vpop.eup %5219  ;;  %v759_v27 = vmul.f32 %v755_v10, %v5823_v4  ;;  %v861_v20 = vmul.f32 %v6022_v52, %v811_v9  ;;  %v904_v63 = vadd.f32 %v6030_v50, %v854_v3  ;;  %v905_v4 = vadd.f32 %v6032_v44, %v855_v26  ;;  %v4951_v10 = vld [vmem:[%s8119_s5 + $0xec] sm:$0xf0]  ;;  %v3945_v3 = vld [vmem:[%s8119_s5 + $0x1e0] sm:$0xf] }
 0x1e8   :  { %v785_v18 = vmul.f32 %v6049_v24, %v6002_v58  ;;  %v778_v56 = vsub.f32 1.5, %v777_v13  ;;  %v906_v57 = vadd.f32 %v6036_v2, %v856_v25  ;;  %v907_v49 = vadd.f32 %v6038_v7, %v857_v15  ;;  %v4983_v13 = vld [vmem:[%s8119_s5 + $0x1ec] sm:$0xf0] }
 0x1e9   :  { %v6066_v34 = vadd.f32 1e-05, %v759_v27  ;;  %v908_v9 = vadd.f32 %v6040_v43, %v858_v59  ;;  %v909_v26 = vadd.f32 %v6043_v14, %v859_v36  ;;  %v910_v25 = vadd.f32 %v6045_v22, %v860_v40  ;;  %v4073_v59 = vld [vmem:[%s8119_s5 + $0x2e0] sm:$0xf]  ;;  %v5015_v27 = vld [vmem:[%s8119_s5 + $0x2ec] sm:$0xf0] }
 0x1ea   :  { %v786_v21 = vmul.f32 %v6049_v24, %v785_v18  ;;  %v779_v15 = vmul.f32 %v5998_v54, %v778_v56  ;;  %v911_v1 = vadd.f32 %v6059_v48, %v861_v20  ;;  %v3818_v36 = vor.u32 %v4951_v10, %v3817_v29 }
 0x1eb   :  { %v3946_v40 = vor.u32 %v4983_v13, %v3945_v3  ;;  %v4074_v56 = vor.u32 %v5015_v27, %v4073_v59  ;;  %5221 = vrsqrt.f32 %v6066_v34  ;;  %vm791_vm7 = vweird.f32 %v6049_v24 }
 0x1ec   :  { %v6087_v18 = vmul.f32 0.5, %v786_v21  ;;  %v4201_v21 = vld [vmem:[%s8119_s5 + $0x3e0] sm:$0xf]  ;;  %v783_v45 = vsel %vm782_vm6, %v5998_v54, %v779_v15  ;;  %2690 = vmatpush.bf16.msra.mxu0 %v3818_v36  ;;  %vm792_vm0 = vmor %vm790_vm13, %vm791_vm7  ;;  %vm800_vm1 = vweird.f32 %v6066_v34 }
 0x1ed   :  { %v4202_v51 = vor.u32 %v5047_v33, %v4201_v21  ;;  %v812_v16 = vmul.f32 %v783_v45, %v5859_v32  ;;  %v813_v29 = vmul.f32 %v783_v45, %v5862_v39  ;;  %v814_v10 = vmul.f32 %v783_v45, %v5865_v41  ;;  %2703 = vmatpush.bf16.msra.mxu1 %v3946_v40 }
 0x1ee   :  { %v815_v3 = vmul.f32 %v783_v45, %v5873_v46  ;;  %v816_v13 = vmul.f32 %v783_v45, %v5880_v23  ;;  %v817_v59 = vmul.f32 %v783_v45, %v5889_v55  ;;  %v818_v54 = vmul.f32 %v783_v45, %v5895_v61  ;;  %2716 = vmatpush.bf16.msra.mxu2 %v4074_v56 }
 0x1ef   :  { %v819_v15 = vmul.f32 %v783_v45, %v5909_v35  ;;  %v862_v33 = vmul.f32 %v6000_v60, %v812_v16  ;;  %v863_v32 = vmul.f32 %v6004_v62, %v813_v29  ;;  %v864_v39 = vmul.f32 %v6006_v37, %v814_v10  ;;  %2729 = vmatpush.bf16.msra.mxu3 %v4202_v51 }
 0x1f0   :  { %v865_v41 = vmul.f32 %v6008_v5, %v815_v3  ;;  %v866_v46 = vmul.f32 %v6012_v17, %v816_v13  ;;  %v867_v23 = vmul.f32 %v6014_v31, %v817_v59  ;;  %v868_v55 = vmul.f32 %v6020_v19, %v818_v54 }
 0x1f1   :  { %v869_v61 = vmul.f32 %v6022_v52, %v819_v15  ;;  %v912_v35 = vadd.f32 %v6030_v50, %v862_v33  ;;  %v913_v45 = vadd.f32 %v6032_v44, %v863_v32  ;;  %v914_v27 = vadd.f32 %v6036_v2, %v864_v39  ;;  %v6129_v40 = vpop.eup %5221 }
 0x1f2   :  { %v915_v36 = vadd.f32 %v6038_v7, %v865_v41  ;;  %v916_v56 = vadd.f32 %v6040_v43, %v866_v46  ;;  %v917_v21 = vadd.f32 %v6043_v14, %v867_v23  ;;  %v918_v16 = vadd.f32 %v6045_v22, %v868_v55 }
 0x1f3   :  { %v919_v29 = vadd.f32 %v6059_v48, %v869_v61  ;;  %v937_v10 = vadd.f32 %v912_v35, %v904_v63  ;;  %v944_v51 = vadd.f32 %v913_v45, %v905_v4  ;;  %v951_v3 = vadd.f32 %v914_v27, %v906_v57 }
 0x1f4   :  { %v958_v13 = vadd.f32 %v915_v36, %v907_v49  ;;  %v965_v59 = vadd.f32 %v916_v56, %v908_v9  ;;  %v972_v54 = vadd.f32 %v917_v21, %v909_v26  ;;  %v979_v15 = vadd.f32 %v918_v16, %v910_v25 }
 0x1f5   :  { %v986_v33 = vadd.f32 %v919_v29, %v911_v1  ;;  %v938_v32 = vrot.slane %v937_v10, 4  ;;  %v945_v39 = vrot.slane %v944_v51, 4  ;;  %v952_v41 = vrot.slane %v951_v3, 4 }
 0x1f6   :  { %v959_v20 = vrot.slane %v958_v13, 4  ;;  %v966_v38 = vrot.slane %v965_v59, 4  ;;  %v973_v46 = vrot.slane %v972_v54, 4  ;;  %v980_v30 = vrot.slane %v979_v15, 4 }
 0x1f7   :  { %v987_v23 = vrot.slane %v986_v33, 4  ;;  %v939_v8 = vadd.f32 %v938_v32, %v937_v10  ;;  %v946_v55 = vadd.f32 %v945_v39, %v944_v51  ;;  %v953_v22 = vadd.f32 %v952_v41, %v951_v3 }
 0x1f8   :  { %v960_v61 = vadd.f32 %v959_v20, %v958_v13  ;;  %v967_v63 = vadd.f32 %v966_v38, %v965_v59  ;;  %v974_v4 = vadd.f32 %v973_v46, %v972_v54  ;;  %v981_v57 = vadd.f32 %v980_v30, %v979_v15 }
 0x1f9   :  { %v988_v1 = vadd.f32 %v987_v23, %v986_v33  ;;  %v940_v49 = vrot.slane %v939_v8, 2  ;;  %v947_v9 = vrot.slane %v946_v55, 2  ;;  %v954_v26 = vrot.slane %v953_v22, 2 }
 0x1fa   :  { %v961_v25 = vrot.slane %v960_v61, 2  ;;  %v968_v35 = vrot.slane %v967_v63, 2  ;;  %v975_v20 = vrot.slane %v974_v4, 2  ;;  %v982_v45 = vrot.slane %v981_v57, 2 }
 0x1fb   :  { %v989_v27 = vrot.slane %v988_v1, 2  ;;  %v941_v36 = vadd.f32 %v940_v49, %v939_v8  ;;  %v948_v38 = vadd.f32 %v947_v9, %v946_v55  ;;  %v955_v56 = vadd.f32 %v954_v26, %v953_v22 }
 0x1fc   :  { %v962_v30 = vadd.f32 %v961_v25, %v960_v61  ;;  %v969_v21 = vadd.f32 %v968_v35, %v967_v63  ;;  %v976_v16 = vadd.f32 %v975_v20, %v974_v4  ;;  %v983_v29 = vadd.f32 %v982_v45, %v981_v57 }
 0x1fd   :  { %v990_v10 = vadd.f32 %v989_v27, %v988_v1  ;;  %v942_v51 = vrot.slane %v941_v36, 1  ;;  %v949_v3 = vrot.slane %v948_v38, 1  ;;  %v956_v13 = vrot.slane %v955_v56, 1 }
 0x1fe   :  { %v963_v59 = vrot.slane %v962_v30, 1  ;;  %v970_v54 = vrot.slane %v969_v21, 1  ;;  %v977_v15 = vrot.slane %v976_v16, 1  ;;  %v984_v33 = vrot.slane %v983_v29, 1 }
 0x1ff   :  { %v991_v32 = vrot.slane %v990_v10, 1  ;;  %v943_v39 = vadd.f32 %v942_v51, %v941_v36  ;;  %v950_v41 = vadd.f32 %v949_v3, %v948_v38  ;;  %v957_v46 = vadd.f32 %v956_v13, %v955_v56  ;;  %v936_v36 = vld [vmem:[#allocation2] ss:$2 sm:$0xff] }
 0x200   :  { %v964_v23 = vadd.f32 %v963_v59, %v962_v30  ;;  %v971_v8 = vadd.f32 %v970_v54, %v969_v21  ;;  %v978_v55 = vadd.f32 %v977_v15, %v976_v16  ;;  %v985_v22 = vadd.f32 %v984_v33, %v983_v29  ;;  %v6202_v33 = vld [vmem:[%s8119_s5 + $0x3cc] sm:$0xf0] }
 0x201   :  { %v992_v61 = vadd.f32 %v991_v32, %v990_v10  ;;  %v1001_v63 = vrot.slane %v950_v41, 7  ;;  %v1002_v4 = vrot.slane %v957_v46, 6  ;;  %v8144_v1 = vsub.f32 1.5, %v6087_v18 }
 0x202   :  { %v1003_v57 = vrot.slane %v964_v23, 5  ;;  %v1004_v9 = vrot.slane %v971_v8, 4  ;;  %v1005_v26 = vrot.slane %v978_v55, 3  ;;  %v1006_v25 = vrot.slane %v985_v22, 2  ;;  %v6211_v23 = vld [vmem:[%s8119_s5 + $0xa0] sm:$0xf] }
 0x203   :  { %v789_v49 = vmul.f32 %v6049_v24, %v8144_v1  ;;  %v1007_v35 = vrot.slane %v992_v61, 1  ;;  %v1009_v20 = vsel %vm1008_vm8, %v943_v39, %v1001_v63  ;;  %v795_v18 = vmul.f32 %v6129_v40, %v6066_v34  ;;  %v6216_v8 = vld [vmem:[%s8119_s5 + $0xac] sm:$0xf0]  ;;  %v6221_v55 = vld [vmem:[%s8119_s5 + $0x1a0] sm:$0xf] }
 0x204   :  { %v1011_v45 = vsel %vm1010_vm9, %v1002_v4, %v1003_v57  ;;  %v1015_v56 = vsel %vm1014_vm11, %v1004_v9, %v1005_v26  ;;  %v6226_v22 = vld [vmem:[%s8119_s5 + $0x1ac] sm:$0xf0]  ;;  %v6231_v61 = vld [vmem:[%s8119_s5 + $0x2a0] sm:$0xf]  ;;  %vm801_vm2 = vweird.f32 %v6129_v40 }
 0x205   :  { %v793_v27 = vsel %vm792_vm0, %v6049_v24, %v789_v49  ;;  %v1013_v38 = vsel %vm1012_vm10, %v1009_v20, %v1011_v45  ;;  %v1017_v30 = vsel %vm1016_vm12, %v1006_v25, %v1007_v35  ;;  %v6236_v63 = vld [vmem:[%s8119_s5 + $0x2ac] sm:$0xf0]  ;;  %v6247_v49 = vld [vmem:[%s8119_s5 + $0x3a0] sm:$0xf]  ;;  %vm802_vm3 = vmor %vm800_vm1, %vm801_vm2 }
 0x206   :  { %v820_v21 = vmul.f32 %v793_v27, %v5900_v42  ;;  %v1019_v58 = vsel %vm1018_vm14, %v1015_v56, %v1017_v30  ;;  %v821_v16 = vmul.f32 %v793_v27, %v5903_v0  ;;  %v822_v29 = vmul.f32 %v793_v27, %v5906_v6  ;;  %v6167_v0 = vld [vmem:[%s8119_s5 + $0xc0] sm:$0xf]  ;;  %v6172_v6 = vld [vmem:[%s8119_s5 + $0xcc] sm:$0xf0] }
 0x207   :  { %v823_v24 = vmul.f32 %v793_v27, %v5916_v47  ;;  %v1021_v10 = vsel %vm1020_vm15, %v1013_v38, %v1019_v58  ;;  %v824_v51 = vmul.f32 %v793_v27, %v5923_v12  ;;  %v825_v3 = vmul.f32 %v793_v27, %v5931_v28  ;;  %v6177_v47 = vld [vmem:[%s8119_s5 + $0x1c0] sm:$0xf]  ;;  %v6182_v12 = vld [vmem:[%s8119_s5 + $0x1cc] sm:$0xf0] }
 0x208   :  { %v826_v13 = vmul.f32 %v793_v27, %v5945_v53  ;;  %v1023_v59 = vadd.f32 %v1021_v10, %v936_v36  ;;  %v827_v54 = vmul.f32 %v793_v27, %v5957_v11  ;;  %v870_v42 = vmul.f32 %v6000_v60, %v820_v21  ;;  %v6187_v28 = vld [vmem:[%s8119_s5 + $0x2c0] sm:$0xf]  ;;  %v6192_v53 = vld [vmem:[%s8119_s5 + $0x2cc] sm:$0xf0] }
 0x209   :  { %v871_v15 = vmul.f32 %v6004_v62, %v821_v16  ;;  %v6197_v11 = vld [vmem:[%s8119_s5 + $0x3c0] sm:$0xf]  ;;  %v872_v32 = vmul.f32 %v6006_v37, %v822_v29  ;;  %v873_v39 = vmul.f32 %v6008_v5, %v823_v24  ;;  %v874_v41 = vmul.f32 %v6012_v17, %v824_v51  ;;  %v6252_v9 = vld [vmem:[%s8119_s5 + $0x3ac] sm:$0xf0] }
 0x20a   :  { %v875_v46 = vmul.f32 %v6014_v31, %v825_v3  ;;  %1024 = vst [vmem:[#allocation2] ss:$2 sm:$0xff] %v1023_v59  ;;  %v876_v4 = vmul.f32 %v6020_v19, %v826_v13  ;;  %v877_v57 = vmul.f32 %v6022_v52, %v827_v54  ;;  %v6241_v1 = vadd.f32 %v6030_v50, %v870_v42  ;;  %v6257_v26 = vld [vmem:[%s8119_s5 + $0x80] sm:$0xf]  ;;  %v6262_v25 = vld [vmem:[%s8119_s5 + $0x8c] sm:$0xf0] }
 0x20b   :  { %v6267_v35 = vld [vmem:[%s8119_s5 + $0x180] sm:$0xf]  ;;  %v6272_v20 = vld [vmem:[%s8119_s5 + $0x18c] sm:$0xf0]  ;;  %v6275_v45 = vadd.f32 %v6032_v44, %v871_v15  ;;  %v6278_v27 = vadd.f32 %v6036_v2, %v872_v32  ;;  %v6281_v36 = vadd.f32 %v6038_v7, %v873_v39  ;;  %v6284_v38 = vadd.f32 %v6040_v43, %v874_v41 }
 0x20c   :  { %v6289_v56 = vld [vmem:[%s8119_s5 + $0x280] sm:$0xf]  ;;  %v6294_v30 = vld [vmem:[%s8119_s5 + $0x28c] sm:$0xf0]  ;;  %v6317_v24 = vadd.f32 %v6043_v14, %v875_v46  ;;  %v6323_v3 = vadd.f32 %v6059_v48, %v877_v57  ;;  %v796_v13 = vmul.f32 %v6129_v40, %v795_v18  ;;  %v3802_v46 = vor.u32 %v6172_v6, %v6167_v0 }
 0x20d   :  { %8145 = vst [vmem:[#allocation15_spill] sm:$0xff] %v6281_v36  ;;  %v6299_v21 = vld [vmem:[%s8119_s5 + $0x380] sm:$0xf]  ;;  %v6304_v58 = vld [vmem:[%s8119_s5 + $0x38c] sm:$0xf0]  ;;  %v4058_v57 = vor.u32 %v6192_v53, %v6187_v28  ;;  %v3786_v53 = vor.u32 %v6216_v8, %v6211_v23  ;;  %v4170_v23 = vor.u32 %v6252_v9, %v6247_v49  ;;  %v3770_v8 = vor.u32 %v6262_v25, %v6257_v26 }
 0x20e   :  { %8146 = vst [vmem:[#allocation16_spill] sm:$0xff] %v6284_v38  ;;  %v6309_v16 = vld [vmem:[%s8119_s5 + $0x60] sm:$0xf]  ;;  %v6314_v29 = vld [vmem:[%s8119_s5 + $0x6c] sm:$0xf0]  ;;  %v797_v28 = vmul.f32 0.5, %v796_v13  ;;  %2691 = vmatpush.bf16.msra.mxu0 %v3802_v46  ;;  %v4026_v9 = vor.u32 %v6294_v30, %v6289_v56  ;;  %v4154_v26 = vor.u32 %v6304_v58, %v6299_v21 }
 0x20f   :  { %8147 = vst [vmem:[#allocation17_spill] sm:$0xff] %v6317_v24  ;;  %v8148_v10 = vld [vmem:[#allocation14_spill] sm:$0xff]  ;;  %v6334_v54 = vld [vmem:[%s8119_s5 + $0x16c] sm:$0xf0]  ;;  %2717 = vmatpush.bf16.msra.mxu2 %v4058_v57  ;;  %v3754_v25 = vor.u32 %v6314_v29, %v6309_v16  ;;  %v8157_v30 = vld [vmem:[#allocation11_spill] sm:$0xff] }
 0x210   :  { %v6320_v51 = vadd.f32 %v8148_v10, %v876_v4  ;;  %8150 = vst [vmem:[#allocation18_spill] sm:$0xff] %v6323_v3  ;;  %v6329_v59 = vld [vmem:[%s8119_s5 + $0x160] sm:$0xf]  ;;  %v6344_v15 = vld [vmem:[%s8119_s5 + $0x26c] sm:$0xf0]  ;;  %v3930_v4 = vor.u32 %v6182_v12, %v6177_v47  ;;  %v4186_v3 = vor.u32 %v6202_v33, %v6197_v11  ;;  %v3914_v11 = vor.u32 %v6226_v22, %v6221_v55 }
 0x211   :  { %v6339_v42 = vld [vmem:[%s8119_s5 + $0x260] sm:$0xf]  ;;  %v6354_v32 = vld [vmem:[%s8119_s5 + $0x36c] sm:$0xf0]  ;;  %v4042_v33 = vor.u32 %v6236_v63, %v6231_v61  ;;  %v3898_v55 = vor.u32 %v6272_v20, %v6267_v35  ;;  %v798_v49 = vsub.f32 1.5, %v797_v28 }
 0x212   :  { %8149 = vst [vmem:[#allocation14_spill] sm:$0xff] %v6320_v51  ;;  %v6349_v18 = vld [vmem:[%s8119_s5 + $0x360] sm:$0xf]  ;;  %v6364_v41 = vld [vmem:[%s8119_s5 + $0x4c] sm:$0xf0]  ;;  %2704 = vmatpush.bf16.msra.mxu1 %v3930_v4  ;;  %2730 = vmatpush.bf16.msra.mxu3 %v4186_v3  ;;  %v3882_v3 = vor.u32 %v6334_v54, %v6329_v59  ;;  %v4010_v56 = vor.u32 %v6344_v15, %v6339_v42 }
 0x213   :  { %v6359_v39 = vld [vmem:[%s8119_s5 + $0x40] sm:$0xf]  ;;  %v6382_v24 = vld [vmem:[%s8119_s5 + $0x14c] sm:$0xf0]  ;;  %v799_v13 = vmul.f32 %v6129_v40, %v798_v49  ;;  %2692 = vmatpush.bf16.msra.mxu0 %v3786_v53  ;;  %2718 = vmatpush.bf16.msra.mxu2 %v4042_v33 }
 0x214   :  { %v6377_v51 = vld [vmem:[%s8119_s5 + $0x140] sm:$0xf]  ;;  %v6392_v6 = vld [vmem:[%s8119_s5 + $0x24c] sm:$0xf0] }
 0x215   :  { %v6387_v0 = vld [vmem:[%s8119_s5 + $0x240] sm:$0xf]  ;;  %v6402_v12 = vld [vmem:[%s8119_s5 + $0x34c] sm:$0xf0]  ;;  %v803_v57 = vsel %vm802_vm3, %v6129_v40, %v799_v13 }
 0x216   :  { %v6397_v47 = vld [vmem:[%s8119_s5 + $0x340] sm:$0xf]  ;;  %v6418_v36 = vld [vmem:[%s8119_s5 + $0x2c] sm:$0xf0]  ;;  %2705 = vmatpush.bf16.msra.mxu1 %v3914_v11  ;;  %2731 = vmatpush.bf16.msra.mxu3 %v4170_v23  ;;  %v833_v40 = vmul.f32 %v803_v57, %v8157_v30 }
 0x217   :  { %v6413_v38 = vld [vmem:[%s8119_s5 + $0x20] sm:$0xf]  ;;  %v6435_v61 = vld [vmem:[%s8119_s5 + $0x12c] sm:$0xf0]  ;;  %2693 = vmatpush.bf16.msra.mxu0 %v3770_v8  ;;  %2719 = vmatpush.bf16.msra.mxu2 %v4026_v9 }
 0x218   :  { %v6430_v22 = vld [vmem:[%s8119_s5 + $0x120] sm:$0xf]  ;;  %v6451_v35 = vld [vmem:[%s8119_s5 + $0x22c] sm:$0xf0] }
 0x219   :  { %v6440_v63 = vld [vmem:[%s8119_s5 + $0x220] sm:$0xf]  ;;  %v6469_v58 = vld [vmem:[%s8119_s5 + $0x32c] sm:$0xf0] }
 0x21a   :  { %8151 = vst [vmem:[#allocation19_spill] sm:$0xff] %v6440_v63  ;;  %v6456_v20 = vld [vmem:[%s8119_s5 + $0x320] sm:$0xf]  ;;  %v6479_v29 = vld [vmem:[%s8119_s5 + $0xc] sm:$0xf0]  ;;  %2706 = vmatpush.bf16.msra.mxu1 %v3898_v55  ;;  %2732 = vmatpush.bf16.msra.mxu3 %v4154_v26 }
 0x21b   :  { %v6474_v16 = vld [vmem:[%s8119_s5] sm:$0xf]  ;;  %v8154_v42 = vld [vmem:[#allocation8_spill] sm:$0xff]  ;;  %v8155_v46 = vld [vmem:[#allocation9_spill] sm:$0xff]  ;;  %2694 = vmatpush.bf16.msra.mxu0 %v3754_v25  ;;  %2720 = vmatpush.bf16.msra.mxu2 %v4010_v56  ;;  %v8165_v25 = vor.u32 %v6354_v32, %v6349_v18 }
 0x21c   :  { %v8152_v53 = vld [vmem:[#allocation6_spill] sm:$0xff]  ;;  %v8153_v49 = vld [vmem:[#allocation7_spill] sm:$0xff]  ;;  %v830_v54 = vmul.f32 %v803_v57, %v8154_v42  ;;  %v831_v59 = vmul.f32 %v803_v57, %v8155_v46  ;;  %v8158_v33 = vld [vmem:[#allocation12_spill] sm:$0xff]  ;;  %v883_v46 = vmul.f32 %v6014_v31, %v833_v40 }
 0x21d   :  { %v828_v11 = vmul.f32 %v803_v57, %v8152_v53  ;;  %v829_v15 = vmul.f32 %v803_v57, %v8153_v49  ;;  %v8156_v21 = vld [vmem:[#allocation10_spill] sm:$0xff]  ;;  %v834_v23 = vmul.f32 %v803_v57, %v8158_v33  ;;  %v8159_v13 = vld [vmem:[#allocation13_spill] sm:$0xff]  ;;  %v8160_v8 = vld [vmem:[#allocation15_spill] sm:$0xff] }
 0x21e   :  { %v832_v4 = vmul.f32 %v803_v57, %v8156_v21  ;;  %v835_v63 = vmul.f32 %v803_v57, %v8159_v13  ;;  %v880_v53 = vmul.f32 %v6006_v37, %v830_v54  ;;  %v881_v49 = vmul.f32 %v6008_v5, %v831_v59  ;;  %v8163_v9 = vld [vmem:[#allocation14_spill] sm:$0xff]  ;;  %2707 = vmatpush.bf16.msra.mxu1 %v3882_v3 }
 0x21f   :  { %v878_v28 = vmul.f32 %v6000_v60, %v828_v11  ;;  %v879_v34 = vmul.f32 %v6004_v62, %v829_v15  ;;  %v884_v21 = vmul.f32 %v6020_v19, %v834_v23  ;;  %v8164_v59 = vld [vmem:[#allocation18_spill] sm:$0xff]  ;;  %2733 = vmatpush.bf16.msra.mxu3 %v8165_v25  ;;  %v8166_v3 = vor.u32 %v6364_v41, %v6359_v39 }
 0x220   :  { %v882_v42 = vmul.f32 %v6012_v17, %v832_v4  ;;  %v885_v30 = vmul.f32 %v6022_v52, %v835_v63  ;;  %v930_v62 = vadd.f32 %v6036_v2, %v880_v53  ;;  %v931_v37 = vadd.f32 %v6038_v7, %v881_v49  ;;  %v8161_v7 = vld [vmem:[#allocation16_spill] sm:$0xff]  ;;  %v8162_v63 = vld [vmem:[#allocation17_spill] sm:$0xff] }
 0x221   :  { %v928_v57 = vadd.f32 %v6030_v50, %v878_v28  ;;  %v929_v60 = vadd.f32 %v6032_v44, %v879_v34  ;;  %v933_v17 = vadd.f32 %v6043_v14, %v883_v46  ;;  %v934_v31 = vadd.f32 %v8148_v10, %v884_v21  ;;  %2695 = vmatpush.bf16.msra.mxu0 %v8166_v3 }
 0x222   :  { %v932_v5 = vadd.f32 %v6040_v43, %v882_v42  ;;  %v935_v19 = vadd.f32 %v6059_v48, %v885_v30  ;;  %v1041_v44 = vadd.f32 %v930_v62, %v6278_v27  ;;  %v1048_v2 = vadd.f32 %v931_v37, %v8160_v8 }
 0x223   :  { %v1027_v52 = vadd.f32 %v928_v57, %v6241_v1  ;;  %v1034_v50 = vadd.f32 %v929_v60, %v6275_v45  ;;  %v1062_v43 = vadd.f32 %v933_v17, %v8162_v63  ;;  %v1069_v14 = vadd.f32 %v934_v31, %v8163_v9  ;;  %v4089_v63 = vld [vmem:[%s8119_s5 + $0x300] sm:$0xf] }
 0x224   :  { %v1055_v55 = vadd.f32 %v932_v5, %v8161_v7  ;;  %v1076_v10 = vadd.f32 %v935_v19, %v8164_v59  ;;  %v1042_v54 = vrot.slane %v1041_v44, 4  ;;  %v1049_v1 = vrot.slane %v1048_v2, 4 }
 0x225   :  { %v1028_v48 = vrot.slane %v1027_v52, 4  ;;  %v1035_v26 = vrot.slane %v1034_v50, 4  ;;  %v1063_v15 = vrot.slane %v1062_v43, 4  ;;  %v1070_v27 = vrot.slane %v1069_v14, 4 }
 0x226   :  { %v1056_v45 = vrot.slane %v1055_v55, 4  ;;  %v1077_v4 = vrot.slane %v1076_v10, 4  ;;  %v1043_v11 = vadd.f32 %v1042_v54, %v1041_v44  ;;  %v1050_v40 = vadd.f32 %v1049_v1, %v1048_v2  ;;  %v8172_v44 = vld [vmem:[#allocation19_spill] sm:$0xff] }
 0x227   :  { %v1029_v28 = vadd.f32 %v1028_v48, %v1027_v52  ;;  %v1036_v34 = vadd.f32 %v1035_v26, %v1034_v50  ;;  %v1064_v23 = vadd.f32 %v1063_v15, %v1062_v43  ;;  %v1071_v13 = vadd.f32 %v1070_v27, %v1069_v14  ;;  %v5079_v48 = vld [vmem:[%s8119_s5 + $0x4ec] sm:$0xf0]  ;;  %v4585_v15 = vld [vmem:[%s8119_s5 + $0x6e0] sm:$0xf] }
 0x228   :  { %v1057_v33 = vadd.f32 %v1056_v45, %v1055_v55  ;;  %v1078_v56 = vadd.f32 %v1077_v4, %v1076_v10  ;;  %v8167_v53 = vor.u32 %v6382_v24, %v6377_v51  ;;  %v1044_v18 = vrot.slane %v1043_v11, 2  ;;  %v3961_v55 = vld [vmem:[%s8119_s5 + $0x200] sm:$0xf]  ;;  %v5143_v27 = vld [vmem:[%s8119_s5 + $0x6ec] sm:$0xf0] }
 0x229   :  { %v1030_v49 = vrot.slane %v1029_v28, 2  ;;  %v1037_v42 = vrot.slane %v1036_v34, 2  ;;  %v1051_v32 = vrot.slane %v1050_v40, 2  ;;  %v8168_v46 = vor.u32 %v6392_v6, %v6387_v0  ;;  %v4329_v10 = vld [vmem:[%s8119_s5 + $0x4e0] sm:$0xf] }
 0x22a   :  { %2708 = vmatpush.bf16.msra.mxu1 %v8167_v53  ;;  %v1058_v21 = vrot.slane %v1057_v33, 2  ;;  %v1065_v30 = vrot.slane %v1064_v23, 2  ;;  %v1072_v39 = vrot.slane %v1071_v13, 2  ;;  %v1079_v41 = vrot.slane %v1078_v56, 2 }
 0x22b   :  { %2721 = vmatpush.bf16.msra.mxu2 %v8168_v46  ;;  %v8169_v57 = vor.u32 %v6402_v12, %v6397_v47  ;;  %v1031_v60 = vadd.f32 %v1030_v49, %v1029_v28  ;;  %v1038_v62 = vadd.f32 %v1037_v42, %v1036_v34  ;;  %v1045_v24 = vadd.f32 %v1044_v18, %v1043_v11  ;;  %v3833_v47 = vld [vmem:[%s8119_s5 + $0x100] sm:$0xf]  ;;  %v5075_v46 = vld [vmem:[%s8119_s5 + $0x4cc] sm:$0xf0] }
 0x22c   :  { %v1052_v51 = vadd.f32 %v1051_v32, %v1050_v40  ;;  %v8170_v37 = vor.u32 %v6418_v36, %v6413_v38  ;;  %v1059_v5 = vadd.f32 %v1058_v21, %v1057_v33  ;;  %v1066_v17 = vadd.f32 %v1065_v30, %v1064_v23  ;;  %v4955_v38 = vld [vmem:[%s8119_s5 + $0x10c] sm:$0xf0]  ;;  %v4713_v11 = vld [vmem:[%s8119_s5 + $0x7e0] sm:$0xf] }
 0x22d   :  { %2734 = vmatpush.bf16.msra.mxu3 %v8169_v57  ;;  %v1073_v0 = vadd.f32 %v1072_v39, %v1071_v13  ;;  %v1080_v6 = vadd.f32 %v1079_v41, %v1078_v56  ;;  %v8171_v31 = vor.u32 %v6435_v61, %v6430_v22  ;;  %v1032_v12 = vrot.slane %v1031_v60, 1  ;;  %v1026_v40 = vld [vmem:[#allocation2 + $0x1] ss:$2 sm:$0xff]  ;;  %v4313_v32 = vld [vmem:[%s8119_s5 + $0x4c0] sm:$0xf] }
 0x22e   :  { %2696 = vmatpush.bf16.msra.mxu0 %v8170_v37  ;;  %v1039_v19 = vrot.slane %v1038_v62, 1  ;;  %v1046_v52 = vrot.slane %v1045_v24, 1  ;;  %v1053_v50 = vrot.slane %v1052_v51, 1  ;;  %v8173_v36 = vor.u32 %v6451_v35, %v8172_v44  ;;  %v4987_v35 = vld [vmem:[%s8119_s5 + $0x20c] sm:$0xf0] }
 0x22f   :  { %2709 = vmatpush.bf16.msra.mxu1 %v8171_v31  ;;  %v1060_v8 = vrot.slane %v1059_v5, 1  ;;  %v1067_v2 = vrot.slane %v1066_v17, 1  ;;  %v1074_v22 = vrot.slane %v1073_v0, 1  ;;  %v1081_v61 = vrot.slane %v1080_v6, 1  ;;  %v5175_v56 = vld [vmem:[%s8119_s5 + $0x7ec] sm:$0xf0] }
 0x230   :  { %2722 = vmatpush.bf16.msra.mxu2 %v8173_v36  ;;  %v8174_v7 = vor.u32 %v6469_v58, %v6456_v20  ;;  %v1033_v43 = vadd.f32 %v1032_v12, %v1031_v60  ;;  %v1040_v9 = vadd.f32 %v1039_v19, %v1038_v62  ;;  %v1047_v14 = vadd.f32 %v1046_v52, %v1045_v24  ;;  %v5019_v58 = vld [vmem:[%s8119_s5 + $0x30c] sm:$0xf0]  ;;  %v4441_v21 = vld [vmem:[%s8119_s5 + $0x5c0] sm:$0xf] }
 0x231   :  { %v1054_v59 = vadd.f32 %v1053_v50, %v1052_v51  ;;  %v8175_v20 = vor.u32 %v6479_v29, %v6474_v16  ;;  %v1061_v26 = vadd.f32 %v1060_v8, %v1059_v5  ;;  %v1068_v54 = vadd.f32 %v1067_v2, %v1066_v17  ;;  %v4457_v16 = vld [vmem:[%s8119_s5 + $0x5e0] sm:$0xf]  ;;  %v5111_v29 = vld [vmem:[%s8119_s5 + $0x5ec] sm:$0xf0] }
 0x232   :  { %2735 = vmatpush.bf16.msra.mxu3 %v8174_v7  ;;  %v1075_v1 = vadd.f32 %v1074_v22, %v1073_v0  ;;  %v1082_v45 = vadd.f32 %v1081_v61, %v1080_v6  ;;  %v1091_v4 = vrot.slane %v1040_v9, 7  ;;  %v1092_v25 = vrot.slane %v1047_v14, 6  ;;  %v5107_v60 = vld [vmem:[%s8119_s5 + $0x5cc] sm:$0xf0]  ;;  %v4569_v62 = vld [vmem:[%s8119_s5 + $0x6c0] sm:$0xf] }
 0x233   :  { %2697 = vmatpush.bf16.msra.mxu0 %v8175_v20  ;;  %v1093_v28 = vrot.slane %v1054_v59, 5  ;;  %v3834_v34 = vor.u32 %v4955_v38, %v3833_v47  ;;  %v1094_v3 = vrot.slane %v1061_v26, 4  ;;  %v1095_v33 = vrot.slane %v1068_v54, 3  ;;  %v5139_v24 = vld [vmem:[%s8119_s5 + $0x6cc] sm:$0xf0] }
 0x234   :  { %v1096_v23 = vrot.slane %v1075_v1, 2  ;;  %v1097_v13 = vrot.slane %v1082_v45, 1  ;;  %v1098_v53 = vsel %vm1008_vm8, %v1033_v43, %v1091_v4  ;;  %v3962_v42 = vor.u32 %v4987_v35, %v3961_v55  ;;  %v4697_v17 = vld [vmem:[%s8119_s5 + $0x7c0] sm:$0xf]  ;;  %v5171_v0 = vld [vmem:[%s8119_s5 + $0x7cc] sm:$0xf0] }
 0x235   :  { %v1099_v49 = vsel %vm1010_vm9, %v1092_v25, %v1093_v28  ;;  %2710 = vmatpush.bf16.msra.mxu1 %v3834_v34  ;;  %v4090_v18 = vor.u32 %v5019_v58, %v4089_v63  ;;  %v1101_v39 = vsel %vm1014_vm11, %v1094_v3, %v1095_v33  ;;  %v4330_v57 = vor.u32 %v5079_v48, %v4329_v10  ;;  %v4297_v50 = vld [vmem:[%s8119_s5 + $0x4a0] sm:$0xf]  ;;  %v5071_v44 = vld [vmem:[%s8119_s5 + $0x4ac] sm:$0xf0] }
 0x236   :  { %v1100_v30 = vsel %vm1012_vm10, %v1098_v53, %v1099_v49  ;;  %v1102_v41 = vsel %vm1016_vm12, %v1096_v23, %v1097_v13  ;;  %2723 = vmatpush.bf16.msra.mxu2 %v3962_v42  ;;  %v4458_v37 = vor.u32 %v5111_v29, %v4457_v16  ;;  %v4586_v5 = vor.u32 %v5143_v27, %v4585_v15  ;;  %v4425_v36 = vld [vmem:[%s8119_s5 + $0x5a0] sm:$0xf]  ;;  %v5103_v8 = vld [vmem:[%s8119_s5 + $0x5ac] sm:$0xf0] }
 0x237   :  { %v1103_v51 = vsel %vm1018_vm14, %v1101_v39, %v1102_v41  ;;  %2736 = vmatpush.bf16.msra.mxu3 %v4090_v18  ;;  %2742 = vmatpush.bf16.msrb.mxu0 %v4330_v57  ;;  %v4714_v31 = vor.u32 %v5175_v56, %v4713_v11  ;;  %v4314_v47 = vor.u32 %v5075_v46, %v4313_v32  ;;  %v4553_v2 = vld [vmem:[%s8119_s5 + $0x6a0] sm:$0xf]  ;;  %v5135_v22 = vld [vmem:[%s8119_s5 + $0x6ac] sm:$0xf0] }
 0x238   :  { %v1104_v6 = vsel %vm1020_vm15, %v1100_v30, %v1103_v51  ;;  %v4442_v19 = vor.u32 %v5107_v60, %v4441_v21  ;;  %v4570_v52 = vor.u32 %v5139_v24, %v4569_v62  ;;  %v4698_v38 = vor.u32 %v5171_v0, %v4697_v17  ;;  %v4681_v61 = vld [vmem:[%s8119_s5 + $0x7a0] sm:$0xf]  ;;  %v5167_v7 = vld [vmem:[%s8119_s5 + $0x7ac] sm:$0xf0] }
 0x239   :  { %v1106_v12 = vadd.f32 %v1104_v6, %v1026_v40  ;;  %2755 = vmatpush.bf16.msrb.mxu1 %v4458_v37  ;;  %v4298_v55 = vor.u32 %v5071_v44, %v4297_v50  ;;  %v4426_v35 = vor.u32 %v5103_v8, %v4425_v36  ;;  %v4554_v63 = vor.u32 %v5135_v22, %v4553_v2  ;;  %v4281_v43 = vld [vmem:[%s8119_s5 + $0x480] sm:$0xf]  ;;  %v5067_v9 = vld [vmem:[%s8119_s5 + $0x48c] sm:$0xf0] }
 0x23a   :  { %2768 = vmatpush.bf16.msrb.mxu2 %v4586_v5  ;;  %v4409_v14 = vld [vmem:[%s8119_s5 + $0x580] sm:$0xf]  ;;  %v4682_v59 = vor.u32 %v5167_v7, %v4681_v61  ;;  %v5099_v20 = vld [vmem:[%s8119_s5 + $0x58c] sm:$0xf0]  ;;  %v4282_v54 = vor.u32 %v5067_v9, %v4281_v43 }
 0x23b   :  { %2781 = vmatpush.bf16.msrb.mxu3 %v4714_v31  ;;  %1107 = vst [vmem:[#allocation2 + $0x1] ss:$2 sm:$0xff] %v1106_v12  ;;  %2743 = vmatpush.bf16.msrb.mxu0 %v4314_v47  ;;  %v4537_v58 = vld [vmem:[%s8119_s5 + $0x680] sm:$0xf]  ;;  %v5131_v10 = vld [vmem:[%s8119_s5 + $0x68c] sm:$0xf0]  ;;  %v4410_v45 = vor.u32 %v5099_v20, %v4409_v14 }
 0x23c   :  { %v4665_v48 = vld [vmem:[%s8119_s5 + $0x780] sm:$0xf]  ;;  %v5163_v26 = vld [vmem:[%s8119_s5 + $0x78c] sm:$0xf0]  ;;  %v4538_v16 = vor.u32 %v5131_v10, %v4537_v58  ;;  %v4949_v58 = vld [vmem:[%s8119_s5 + $0xe4] sm:$0xf] }
 0x23d   :  { %2756 = vmatpush.bf16.msrb.mxu1 %v4442_v19  ;;  %v4265_v1 = vld [vmem:[%s8119_s5 + $0x460] sm:$0xf]  ;;  %v5063_v29 = vld [vmem:[%s8119_s5 + $0x46c] sm:$0xf0]  ;;  %v4666_v4 = vor.u32 %v5163_v26, %v4665_v48  ;;  %v3819_v10 = vld [vmem:[%s8119_s5 + $0xf0] sm:$0xf0] }
 0x23e   :  { %2769 = vmatpush.bf16.msrb.mxu2 %v4570_v52  ;;  %v4393_v15 = vld [vmem:[%s8119_s5 + $0x560] sm:$0xf]  ;;  %v5095_v27 = vld [vmem:[%s8119_s5 + $0x56c] sm:$0xf0]  ;;  %v4266_v23 = vor.u32 %v5063_v29, %v4265_v1  ;;  %v4981_v48 = vld [vmem:[%s8119_s5 + $0x1e4] sm:$0xf] }
 0x23f   :  { %2782 = vmatpush.bf16.msrb.mxu3 %v4698_v38  ;;  %2744 = vmatpush.bf16.msrb.mxu0 %v4298_v55  ;;  %v4521_v25 = vld [vmem:[%s8119_s5 + $0x660] sm:$0xf]  ;;  %v5127_v28 = vld [vmem:[%s8119_s5 + $0x66c] sm:$0xf0]  ;;  %v4394_v49 = vor.u32 %v5095_v27, %v4393_v15  ;;  %v5013_v1 = vld [vmem:[%s8119_s5 + $0x2e4] sm:$0xf] }
 0x240   :  { %v4649_v11 = vld [vmem:[%s8119_s5 + $0x760] sm:$0xf]  ;;  %v5159_v40 = vld [vmem:[%s8119_s5 + $0x76c] sm:$0xf0]  ;;  %v4522_v42 = vor.u32 %v5127_v28, %v4521_v25  ;;  %v5045_v15 = vld [vmem:[%s8119_s5 + $0x3e4] sm:$0xf]  ;;  %v3822_v25 = vor.u32 %v4949_v58, %v3819_v10 }
 0x241   :  { %2757 = vmatpush.bf16.msrb.mxu1 %v4426_v35  ;;  %v4249_v13 = vld [vmem:[%s8119_s5 + $0x440] sm:$0xf]  ;;  %v5059_v56 = vld [vmem:[%s8119_s5 + $0x44c] sm:$0xf0]  ;;  %v4650_v46 = vor.u32 %v5159_v40, %v4649_v11  ;;  %v4203_v27 = vld [vmem:[%s8119_s5 + $0x3f0] sm:$0xf0] }
 0x242   :  { %2770 = vmatpush.bf16.msrb.mxu2 %v4554_v63  ;;  %v1111_v34 = vld [vmem:[#allocation2] sm:$0xff]  ;;  %v1112_v33 = vld [vmem:[#allocation2 + $0x8] sm:$0xff]  ;;  %v4377_v18 = vld [vmem:[%s8119_s5 + $0x540] sm:$0xf]  ;;  %v4250_v57 = vor.u32 %v5059_v56, %v4249_v13 }
 0x243   :  { %2783 = vmatpush.bf16.msrb.mxu3 %v4682_v59  ;;  %v1113_v3 = vmul.f32 0.0625, %v1111_v34  ;;  %2745 = vmatpush.bf16.msrb.mxu0 %v4282_v54  ;;  %v1114_v53 = vmul.f32 0.0625, %v1112_v33  ;;  %v5091_v32 = vld [vmem:[%s8119_s5 + $0x54c] sm:$0xf0]  ;;  %v4505_v21 = vld [vmem:[%s8119_s5 + $0x640] sm:$0xf]  ;;  %v4206_v33 = vor.u32 %v5045_v15, %v4203_v27 }
 0x244   :  { %v5123_v30 = vld [vmem:[%s8119_s5 + $0x64c] sm:$0xf0]  ;;  %v4633_v39 = vld [vmem:[%s8119_s5 + $0x740] sm:$0xf]  ;;  %v4378_v62 = vor.u32 %v5091_v32, %v4377_v18  ;;  %v3947_v54 = vld [vmem:[%s8119_s5 + $0x1f0] sm:$0xf0] }
 0x245   :  { %2758 = vmatpush.bf16.msrb.mxu1 %v4410_v45  ;;  %1117 = vst [vmem:[#allocation1] ss:$4 sm:$0xff] %v1113_v3  ;;  %v5155_v41 = vld [vmem:[%s8119_s5 + $0x74c] sm:$0xf0]  ;;  %v4233_v60 = vld [vmem:[%s8119_s5 + $0x420] sm:$0xf]  ;;  %v4506_v24 = vor.u32 %v5123_v30, %v4505_v21  ;;  %v3950_v28 = vor.u32 %v4981_v48, %v3947_v54 }
 0x246   :  { %2771 = vmatpush.bf16.msrb.mxu2 %v4538_v16  ;;  %1119 = vst [vmem:[#allocation1 + $0x20] ss:$4 sm:$0xff] %v1114_v53  ;;  %v5055_v51 = vld [vmem:[%s8119_s5 + $0x42c] sm:$0xf0]  ;;  %v4361_v37 = vld [vmem:[%s8119_s5 + $0x520] sm:$0xf]  ;;  %v4634_v17 = vor.u32 %v5155_v41, %v4633_v39 }
 0x247   :  { %2784 = vmatpush.bf16.msrb.mxu3 %v4666_v4  ;;  %2746 = vmatpush.bf16.msrb.mxu0 %v4266_v23  ;;  %v5087_v5 = vld [vmem:[%s8119_s5 + $0x52c] sm:$0xf0]  ;;  %v4489_v0 = vld [vmem:[%s8119_s5 + $0x620] sm:$0xf]  ;;  %v4234_v52 = vor.u32 %v5055_v51, %v4233_v60  ;;  %v4075_v45 = vld [vmem:[%s8119_s5 + $0x2f0] sm:$0xf0] }
 0x248   :  { %v5119_v6 = vld [vmem:[%s8119_s5 + $0x62c] sm:$0xf0]  ;;  %v4617_v31 = vld [vmem:[%s8119_s5 + $0x720] sm:$0xf]  ;;  %v4362_v50 = vor.u32 %v5087_v5, %v4361_v37  ;;  %v4078_v34 = vor.u32 %v5013_v1, %v4075_v45  ;;  %v4945_v11 = vld [vmem:[%s8119_s5 + $0xc4] sm:$0xf] }
 0x249   :  { %2759 = vmatpush.bf16.msrb.mxu1 %v4394_v49  ;;  %v5151_v47 = vld [vmem:[%s8119_s5 + $0x72c] sm:$0xf0]  ;;  %v4217_v12 = vld [vmem:[%s8119_s5 + $0x400] sm:$0xf]  ;;  %v4490_v22 = vor.u32 %v5119_v6, %v4489_v0  ;;  %v3803_v40 = vld [vmem:[%s8119_s5 + $0xd0] sm:$0xf0] }
 0x24a   :  { %2772 = vmatpush.bf16.msrb.mxu2 %v4522_v42  ;;  %v5051_v19 = vld [vmem:[%s8119_s5 + $0x40c] sm:$0xf0]  ;;  %v4345_v44 = vld [vmem:[%s8119_s5 + $0x500] sm:$0xf]  ;;  %v4618_v63 = vor.u32 %v5151_v47, %v4617_v31  ;;  %v4977_v3 = vld [vmem:[%s8119_s5 + $0x1c4] sm:$0xf]  ;;  %v3806_v42 = vor.u32 %v4945_v11, %v3803_v40 }
 0x24b   :  { %2785 = vmatpush.bf16.msrb.mxu3 %v4650_v46  ;;  %2747 = vmatpush.bf16.msrb.mxu0 %v4250_v57  ;;  %v5083_v36 = vld [vmem:[%s8119_s5 + $0x50c] sm:$0xf0]  ;;  %v4473_v38 = vld [vmem:[%s8119_s5 + $0x600] sm:$0xf]  ;;  %v4218_v26 = vor.u32 %v5051_v19, %v4217_v12  ;;  %v3931_v23 = vld [vmem:[%s8119_s5 + $0x1d0] sm:$0xf0] }
 0x24c   :  { %v1120_v8 = vld.sshfl [vmem:[#allocation1] sm:$0xff pattern:$0x73625140]  ;;  %v1121_v2 = vld.sshfl [vmem:[#allocation1 + $0x8] sm:$0xff pattern:$0x73625140]  ;;  %v4346_v16 = vor.u32 %v5083_v36, %v4345_v44  ;;  %v3934_v32 = vor.u32 %v4977_v3, %v3931_v23 }
 0x24d   :  { %2760 = vmatpush.bf16.msrb.mxu1 %v4378_v62  ;;  %v6773_v61 = vpack.c.bf16 %v1120_v8, %v1120_v8  ;;  %v6775_v7 = vpack.c.bf16 %v1121_v2, %v1121_v2  ;;  %v1122_v55 = vld.sshfl [vmem:[#allocation1 + $0x10] sm:$0xff pattern:$0x73625140]  ;;  %v1123_v35 = vld.sshfl [vmem:[#allocation1 + $0x18] sm:$0xff pattern:$0x73625140] }
 0x24e   :  { %2773 = vmatpush.bf16.msrb.mxu2 %v4506_v24  ;;  %v5115_v43 = vld [vmem:[%s8119_s5 + $0x60c] sm:$0xf0]  ;;  %v4601_v9 = vld [vmem:[%s8119_s5 + $0x700] sm:$0xf]  ;;  %v6786_v59 = vpack.c.bf16 %v1122_v55, %v1122_v55  ;;  %v6790_v20 = vpack.c.bf16 %v1123_v35, %v1123_v35  ;;  %v5009_v13 = vld [vmem:[%s8119_s5 + $0x2c4] sm:$0xf] }
 0x24f   :  { %2786 = vmatpush.bf16.msrb.mxu3 %v4634_v17  ;;  %v5147_v14 = vld [vmem:[%s8119_s5 + $0x70c] sm:$0xf0]  ;;  %2698 = vmatmul.bf16.vlgmr.msra.gmra.mxu0 %v6773_v61  ;;  %v4474_v29 = vor.u32 %v5115_v43, %v4473_v38  ;;  %v4059_v56 = vld [vmem:[%s8119_s5 + $0x2d0] sm:$0xf0]  ;;  %v5041_v53 = vld [vmem:[%s8119_s5 + $0x3c4] sm:$0xf] }
 0x250   :  { %2711 = vmatmul.bf16.vlgmr.msra.gmra.mxu1 %v6775_v7  ;;  %2748 = vmatpush.bf16.msrb.mxu0 %v4234_v52  ;;  %v4602_v4 = vor.u32 %v5147_v14, %v4601_v9  ;;  %v4187_v49 = vld [vmem:[%s8119_s5 + $0x3d0] sm:$0xf0]  ;;  %v4941_v18 = vld [vmem:[%s8119_s5 + $0xa4] sm:$0xf]  ;;  %v4062_v46 = vor.u32 %v5009_v13, %v4059_v56 }
 0x251   :  { %2724 = vmatmul.bf16.vlgmr.msra.gmra.mxu2 %v6786_v59  ;;  %2761 = vmatpush.bf16.msrb.mxu1 %v4362_v50  ;;  %v3787_v21 = vld [vmem:[%s8119_s5 + $0xb0] sm:$0xf0]  ;;  %v4973_v30 = vld [vmem:[%s8119_s5 + $0x1a4] sm:$0xf]  ;;  %v4190_v41 = vor.u32 %v5041_v53, %v4187_v49 }
 0x252   :  { %2774 = vmatpush.bf16.msrb.mxu2 %v4490_v22  ;;  %2737 = vmatmul.bf16.vlgmr.msra.gmra.mxu3 %v6790_v20  ;;  %v3915_v39 = vld [vmem:[%s8119_s5 + $0x1b0] sm:$0xf0]  ;;  %v5005_v57 = vld [vmem:[%s8119_s5 + $0x2a4] sm:$0xf]  ;;  %v3790_v5 = vor.u32 %v4941_v18, %v3787_v21 }
 0x253   :  { %2787 = vmatpush.bf16.msrb.mxu3 %v4618_v63  ;;  %v4043_v60 = vld [vmem:[%s8119_s5 + $0x2b0] sm:$0xf0]  ;;  %v5037_v62 = vld [vmem:[%s8119_s5 + $0x3a4] sm:$0xf]  ;;  %v3918_v31 = vor.u32 %v4973_v30, %v3915_v39 }
 0x254   :  { %2749 = vmatpush.bf16.msrb.mxu0 %v4218_v26  ;;  %v4171_v24 = vld [vmem:[%s8119_s5 + $0x3b0] sm:$0xf0]  ;;  %v4937_v51 = vld [vmem:[%s8119_s5 + $0x84] sm:$0xf]  ;;  %v4046_v47 = vor.u32 %v5005_v57, %v4043_v60 }
 0x255   :  { %2762 = vmatpush.bf16.msrb.mxu1 %v4346_v16  ;;  %v3771_v37 = vld [vmem:[%s8119_s5 + $0x90] sm:$0xf0]  ;;  %v4969_v17 = vld [vmem:[%s8119_s5 + $0x184] sm:$0xf]  ;;  %v4174_v52 = vor.u32 %v5037_v62, %v4171_v24 }
 0x256   :  { %2775 = vmatpush.bf16.msrb.mxu2 %v4474_v29  ;;  %v3899_v0 = vld [vmem:[%s8119_s5 + $0x190] sm:$0xf0]  ;;  %v5001_v6 = vld [vmem:[%s8119_s5 + $0x284] sm:$0xf]  ;;  %v3774_v8 = vor.u32 %v4937_v51, %v3771_v37 }
 0x257   :  { %2788 = vmatpush.bf16.msrb.mxu3 %v4602_v4  ;;  %v4027_v12 = vld [vmem:[%s8119_s5 + $0x290] sm:$0xf0]  ;;  %v1124_v19 = vld.sshfl [vmem:[#allocation1 + $0x20] sm:$0xff pattern:$0x73625140]  ;;  %v3902_v2 = vor.u32 %v4969_v17, %v3899_v0 }
 0x258   :  { %2794 = vmatpush.bf16.msra.mxu0 %v3822_v25  ;;  %v1125_v50 = vld.sshfl [vmem:[#allocation1 + $0x28] sm:$0xff pattern:$0x73625140]  ;;  %v1126_v44 = vld.sshfl [vmem:[#allocation1 + $0x30] sm:$0xff pattern:$0x73625140]  ;;  %v6890_v22 = vpack.c.bf16 %v1124_v19, %v1124_v19  ;;  %v4030_v63 = vor.u32 %v5001_v6, %v4027_v12 }
 0x259   :  { %2807 = vmatpush.bf16.msra.mxu1 %v3950_v28  ;;  %v5033_v36 = vld [vmem:[%s8119_s5 + $0x384] sm:$0xf]  ;;  %v4155_v38 = vld [vmem:[%s8119_s5 + $0x390] sm:$0xf0]  ;;  %v6898_v43 = vpack.c.bf16 %v1125_v50, %v1125_v50  ;;  %v6900_v9 = vpack.c.bf16 %v1126_v44, %v1126_v44 }
 0x25a   :  { %2820 = vmatpush.bf16.msra.mxu2 %v4078_v34  ;;  %v4933_v55 = vld [vmem:[%s8119_s5 + $0x64] sm:$0xf]  ;;  %v3755_v35 = vld [vmem:[%s8119_s5 + $0x70] sm:$0xf0]  ;;  %v4158_v48 = vor.u32 %v5033_v36, %v4155_v38 }
 0x25b   :  { %2833 = vmatpush.bf16.msra.mxu3 %v4206_v33  ;;  %v4965_v14 = vld [vmem:[%s8119_s5 + $0x164] sm:$0xf]  ;;  %v3883_v58 = vld [vmem:[%s8119_s5 + $0x170] sm:$0xf0]  ;;  %v3758_v16 = vor.u32 %v4933_v55, %v3755_v35 }
 0x25c   :  { %2795 = vmatpush.bf16.msra.mxu0 %v3806_v42  ;;  %v4997_v10 = vld [vmem:[%s8119_s5 + $0x264] sm:$0xf]  ;;  %v1127_v26 = vld.sshfl [vmem:[#allocation1 + $0x38] sm:$0xff pattern:$0x73625140]  ;;  %v3886_v15 = vor.u32 %v4965_v14, %v3883_v58 }
 0x25d   :  { %2808 = vmatpush.bf16.msra.mxu1 %v3934_v32  ;;  %v4011_v54 = vld [vmem:[%s8119_s5 + $0x270] sm:$0xf0]  ;;  %v5029_v1 = vld [vmem:[%s8119_s5 + $0x364] sm:$0xf]  ;;  %v6923_v29 = vpack.c.bf16 %v1127_v26, %v1127_v26 }
 0x25e   :  { %2821 = vmatpush.bf16.msra.mxu2 %v4062_v46  ;;  %v4139_v45 = vld [vmem:[%s8119_s5 + $0x370] sm:$0xf0]  ;;  %v4014_v27 = vor.u32 %v4997_v10, %v4011_v54  ;;  %v4929_v4 = vld [vmem:[%s8119_s5 + $0x44] sm:$0xf] }
 0x25f   :  { %2834 = vmatpush.bf16.msra.mxu3 %v4190_v41  ;;  %2750 = vmatmul.bf16.vlgmr.msrb.gmra.mxu0 %v6890_v22  ;;  %v3739_v25 = vld [vmem:[%s8119_s5 + $0x50] sm:$0xf0]  ;;  %v4961_v28 = vld [vmem:[%s8119_s5 + $0x144] sm:$0xf]  ;;  %v4142_v34 = vor.u32 %v5029_v1, %v4139_v45 }
 0x260   :  { %2796 = vmatpush.bf16.msra.mxu0 %v3790_v5  ;;  %2763 = vmatmul.bf16.vlgmr.msrb.gmra.mxu1 %v6898_v43  ;;  %v3867_v11 = vld [vmem:[%s8119_s5 + $0x150] sm:$0xf0]  ;;  %v4993_v40 = vld [vmem:[%s8119_s5 + $0x244] sm:$0xf]  ;;  %v3742_v13 = vor.u32 %v4929_v4, %v3739_v25 }
 0x261   :  { %2809 = vmatpush.bf16.msra.mxu1 %v3918_v31  ;;  %2776 = vmatmul.bf16.vlgmr.msrb.gmra.mxu2 %v6900_v9  ;;  %v3995_v3 = vld [vmem:[%s8119_s5 + $0x250] sm:$0xf0]  ;;  %v5025_v33 = vld [vmem:[%s8119_s5 + $0x344] sm:$0xf]  ;;  %v3870_v56 = vor.u32 %v4961_v28, %v3867_v11 }
 0x262   :  { %2822 = vmatpush.bf16.msra.mxu2 %v4046_v47  ;;  %2789 = vmatmul.bf16.vlgmr.msrb.gmra.mxu3 %v6923_v29  ;;  %v4123_v23 = vld [vmem:[%s8119_s5 + $0x350] sm:$0xf0]  ;;  %v3998_v53 = vor.u32 %v4993_v40, %v3995_v3  ;;  %v4925_v49 = vld [vmem:[%s8119_s5 + $0x24] sm:$0xf] }
 0x263   :  { %2835 = vmatpush.bf16.msra.mxu3 %v4174_v52  ;;  %v3723_v42 = vld [vmem:[%s8119_s5 + $0x30] sm:$0xf0]  ;;  %v4957_v18 = vld [vmem:[%s8119_s5 + $0x124] sm:$0xf]  ;;  %v4126_v32 = vor.u32 %v5025_v33, %v4123_v23 }
 0x264   :  { %2797 = vmatpush.bf16.msra.mxu0 %v3774_v8  ;;  %v3851_v46 = vld [vmem:[%s8119_s5 + $0x130] sm:$0xf0]  ;;  %v4989_v21 = vld [vmem:[%s8119_s5 + $0x224] sm:$0xf]  ;;  %v3726_v57 = vor.u32 %v4925_v49, %v3723_v42 }
 0x265   :  { %2810 = vmatpush.bf16.msra.mxu1 %v3902_v2  ;;  %v3979_v30 = vld [vmem:[%s8119_s5 + $0x230] sm:$0xf0]  ;;  %v5021_v39 = vld [vmem:[%s8119_s5 + $0x324] sm:$0xf]  ;;  %v3854_v24 = vor.u32 %v4957_v18, %v3851_v46 }
 0x266   :  { %2823 = vmatpush.bf16.msra.mxu2 %v4030_v63  ;;  %v4107_v41 = vld [vmem:[%s8119_s5 + $0x330] sm:$0xf0]  ;;  %v4921_v60 = vld [vmem:[%s8119_s5 + $0x4] sm:$0xf]  ;;  %v3982_v51 = vor.u32 %v4989_v21, %v3979_v30 }
 0x267   :  { %2836 = vmatpush.bf16.msra.mxu3 %v4158_v48  ;;  %v3707_v62 = vld [vmem:[%s8119_s5 + $0x10] sm:$0xf0]  ;;  %v4953_v37 = vld [vmem:[%s8119_s5 + $0x104] sm:$0xf]  ;;  %v4110_v0 = vor.u32 %v5021_v39, %v4107_v41 }
 0x268   :  { %2798 = vmatpush.bf16.msra.mxu0 %v3758_v16  ;;  %v3835_v5 = vld [vmem:[%s8119_s5 + $0x110] sm:$0xf0]  ;;  %v4985_v17 = vld [vmem:[%s8119_s5 + $0x204] sm:$0xf]  ;;  %v3710_v50 = vor.u32 %v4921_v60, %v3707_v62 }
 0x269   :  { %2811 = vmatpush.bf16.msra.mxu1 %v3886_v15  ;;  %v3963_v6 = vld [vmem:[%s8119_s5 + $0x210] sm:$0xf0]  ;;  %v5017_v31 = vld [vmem:[%s8119_s5 + $0x304] sm:$0xf]  ;;  %v3838_v8 = vor.u32 %v4953_v37, %v3835_v5 }
 0x26a   :  { %2824 = vmatpush.bf16.msra.mxu2 %v4014_v27  ;;  %v4091_v47 = vld [vmem:[%s8119_s5 + $0x310] sm:$0xf0]  ;;  %v5077_v12 = vld [vmem:[%s8119_s5 + $0x4e4] sm:$0xf]  ;;  %v3966_v2 = vor.u32 %v4985_v17, %v3963_v6 }
 0x26b   :  { %2837 = vmatpush.bf16.msra.mxu3 %v4142_v34  ;;  %v4331_v19 = vld [vmem:[%s8119_s5 + $0x4f0] sm:$0xf0]  ;;  %v5109_v52 = vld [vmem:[%s8119_s5 + $0x5e4] sm:$0xf]  ;;  %v4094_v63 = vor.u32 %v5017_v31, %v4091_v47 }
 0x26c   :  { %2799 = vmatpush.bf16.msra.mxu0 %v3742_v13  ;;  %v4459_v44 = vld [vmem:[%s8119_s5 + $0x5f0] sm:$0xf0]  ;;  %v5141_v36 = vld [vmem:[%s8119_s5 + $0x6e4] sm:$0xf]  ;;  %v4334_v14 = vor.u32 %v5077_v12, %v4331_v19 }
 0x26d   :  { %2812 = vmatpush.bf16.msra.mxu1 %v3870_v56  ;;  %v4587_v38 = vld [vmem:[%s8119_s5 + $0x6f0] sm:$0xf0]  ;;  %v5173_v55 = vld [vmem:[%s8119_s5 + $0x7e4] sm:$0xf]  ;;  %v4462_v58 = vor.u32 %v5109_v52, %v4459_v44 }
 0x26e   :  { %2825 = vmatpush.bf16.msra.mxu2 %v3998_v53  ;;  %v4715_v35 = vld [vmem:[%s8119_s5 + $0x7f0] sm:$0xf0]  ;;  %v4590_v10 = vor.u32 %v5141_v36, %v4587_v38  ;;  %v5073_v48 = vld [vmem:[%s8119_s5 + $0x4c4] sm:$0xf] }
 0x26f   :  { %2838 = vmatpush.bf16.msra.mxu3 %v4126_v32  ;;  %v4315_v26 = vld [vmem:[%s8119_s5 + $0x4d0] sm:$0xf0]  ;;  %v5105_v54 = vld [vmem:[%s8119_s5 + $0x5c4] sm:$0xf]  ;;  %v4718_v1 = vor.u32 %v5173_v55, %v4715_v35 }
 0x270   :  { %2800 = vmatpush.bf16.msra.mxu0 %v3726_v57  ;;  %v4443_v45 = vld [vmem:[%s8119_s5 + $0x5d0] sm:$0xf0]  ;;  %v5137_v16 = vld [vmem:[%s8119_s5 + $0x6c4] sm:$0xf]  ;;  %v4318_v25 = vor.u32 %v5073_v48, %v4315_v26 }
 0x271   :  { %2813 = vmatpush.bf16.msra.mxu1 %v3854_v24  ;;  %v4571_v15 = vld [vmem:[%s8119_s5 + $0x6d0] sm:$0xf0]  ;;  %v5169_v27 = vld [vmem:[%s8119_s5 + $0x7c4] sm:$0xf]  ;;  %v4446_v28 = vor.u32 %v5105_v54, %v4443_v45 }
 0x272   :  { %2826 = vmatpush.bf16.msra.mxu2 %v3982_v51  ;;  %v4699_v4 = vld [vmem:[%s8119_s5 + $0x7d0] sm:$0xf0]  ;;  %v4574_v34 = vor.u32 %v5137_v16, %v4571_v15  ;;  %v5069_v11 = vld [vmem:[%s8119_s5 + $0x4a4] sm:$0xf] }
 0x273   :  { %2839 = vmatpush.bf16.msra.mxu3 %v4110_v0  ;;  %v4299_v40 = vld [vmem:[%s8119_s5 + $0x4b0] sm:$0xf0]  ;;  %v5101_v3 = vld [vmem:[%s8119_s5 + $0x5a4] sm:$0xf]  ;;  %v4702_v33 = vor.u32 %v5169_v27, %v4699_v4 }
 0x274   :  { %2801 = vmatpush.bf16.msra.mxu0 %v3710_v50  ;;  %v4427_v23 = vld [vmem:[%s8119_s5 + $0x5b0] sm:$0xf0]  ;;  %v5133_v13 = vld [vmem:[%s8119_s5 + $0x6a4] sm:$0xf]  ;;  %v4302_v42 = vor.u32 %v5069_v11, %v4299_v40 }
 0x275   :  { %2814 = vmatpush.bf16.msra.mxu1 %v3838_v8  ;;  %v4555_v56 = vld [vmem:[%s8119_s5 + $0x6b0] sm:$0xf0]  ;;  %v5165_v53 = vld [vmem:[%s8119_s5 + $0x7a4] sm:$0xf]  ;;  %v4430_v18 = vor.u32 %v5101_v3, %v4427_v23 }
 0x276   :  { %2827 = vmatpush.bf16.msra.mxu2 %v3966_v2  ;;  %v4683_v49 = vld [vmem:[%s8119_s5 + $0x7b0] sm:$0xf0]  ;;  %v4558_v32 = vor.u32 %v5133_v13, %v4555_v56  ;;  %v5065_v46 = vld [vmem:[%s8119_s5 + $0x484] sm:$0xf] }
 0x277   :  { %2840 = vmatpush.bf16.msra.mxu3 %v4094_v63  ;;  %2802 = vmatmul.bf16.vlgmr.msra.gmra.mxu0 %v6773_v61  ;;  %v4283_v21 = vld [vmem:[%s8119_s5 + $0x490] sm:$0xf0]  ;;  %v5097_v30 = vld [vmem:[%s8119_s5 + $0x584] sm:$0xf]  ;;  %v4686_v39 = vor.u32 %v5165_v53, %v4683_v49 }
 0x278   :  { %2846 = vmatpush.bf16.msrb.mxu0 %v4334_v14  ;;  %2815 = vmatmul.bf16.vlgmr.msra.gmra.mxu1 %v6775_v7  ;;  %v4411_v41 = vld [vmem:[%s8119_s5 + $0x590] sm:$0xf0]  ;;  %v5129_v57 = vld [vmem:[%s8119_s5 + $0x684] sm:$0xf]  ;;  %v4286_v51 = vor.u32 %v5065_v46, %v4283_v21  ;;  %v3825_v21 = vld [vmem:[%s8119_s5 + $0xe8] sm:$0xf] }
 0x279   :  { %2859 = vmatpush.bf16.msrb.mxu1 %v4462_v58  ;;  %2828 = vmatmul.bf16.vlgmr.msra.gmra.mxu2 %v6786_v59  ;;  %v4539_v60 = vld [vmem:[%s8119_s5 + $0x690] sm:$0xf0]  ;;  %v5161_v62 = vld [vmem:[%s8119_s5 + $0x784] sm:$0xf]  ;;  %v4414_v37 = vor.u32 %v5097_v30, %v4411_v41  ;;  %v4952_v30 = vld [vmem:[%s8119_s5 + $0xf4] sm:$0xf0] }
 0x27a   :  { %2872 = vmatpush.bf16.msrb.mxu2 %v4590_v10  ;;  %2841 = vmatmul.bf16.vlgmr.msra.gmra.mxu3 %v6790_v20  ;;  %v4667_v24 = vld [vmem:[%s8119_s5 + $0x790] sm:$0xf0]  ;;  %v4542_v5 = vor.u32 %v5129_v57, %v4539_v60  ;;  %v5061_v17 = vld [vmem:[%s8119_s5 + $0x464] sm:$0xf]  ;;  %v4984_v57 = vld [vmem:[%s8119_s5 + $0x1f4] sm:$0xf0] }
 0x27b   :  { %2885 = vmatpush.bf16.msrb.mxu3 %v4718_v1  ;;  %v4267_v0 = vld [vmem:[%s8119_s5 + $0x470] sm:$0xf0]  ;;  %v5093_v6 = vld [vmem:[%s8119_s5 + $0x564] sm:$0xf]  ;;  %v4670_v31 = vor.u32 %v5161_v62, %v4667_v24  ;;  %v4081_v60 = vld [vmem:[%s8119_s5 + $0x2e8] sm:$0xf] }
 0x27c   :  { %2847 = vmatpush.bf16.msrb.mxu0 %v4318_v25  ;;  %v4395_v47 = vld [vmem:[%s8119_s5 + $0x570] sm:$0xf0]  ;;  %v5125_v12 = vld [vmem:[%s8119_s5 + $0x664] sm:$0xf]  ;;  %v4270_v44 = vor.u32 %v5061_v17, %v4267_v0  ;;  %v5016_v62 = vld [vmem:[%s8119_s5 + $0x2f4] sm:$0xf0]  ;;  %v3826_v0 = vor.u32 %v4952_v30, %v3825_v21 }
 0x27d   :  { %2860 = vmatpush.bf16.msrb.mxu1 %v4446_v28  ;;  %v4523_v19 = vld [vmem:[%s8119_s5 + $0x670] sm:$0xf0]  ;;  %v5157_v52 = vld [vmem:[%s8119_s5 + $0x764] sm:$0xf]  ;;  %v4398_v36 = vor.u32 %v5093_v6, %v4395_v47  ;;  %v3809_v47 = vld [vmem:[%s8119_s5 + $0xc8] sm:$0xf] }
 0x27e   :  { %2873 = vmatpush.bf16.msrb.mxu2 %v4574_v34  ;;  %v4651_v50 = vld [vmem:[%s8119_s5 + $0x770] sm:$0xf0]  ;;  %v4526_v38 = vor.u32 %v5125_v12, %v4523_v19  ;;  %v5057_v8 = vld [vmem:[%s8119_s5 + $0x444] sm:$0xf]  ;;  %v4948_v12 = vld [vmem:[%s8119_s5 + $0xd4] sm:$0xf0] }
 0x27f   :  { %2886 = vmatpush.bf16.msrb.mxu3 %v4702_v33  ;;  %v4251_v2 = vld [vmem:[%s8119_s5 + $0x450] sm:$0xf0]  ;;  %v5089_v55 = vld [vmem:[%s8119_s5 + $0x544] sm:$0xf]  ;;  %v4654_v35 = vor.u32 %v5157_v52, %v4651_v50  ;;  %v3937_v19 = vld [vmem:[%s8119_s5 + $0x1c8] sm:$0xf] }
 0x280   :  { %2848 = vmatpush.bf16.msrb.mxu0 %v4302_v42  ;;  %v4379_v63 = vld [vmem:[%s8119_s5 + $0x550] sm:$0xf0]  ;;  %v5121_v14 = vld [vmem:[%s8119_s5 + $0x644] sm:$0xf]  ;;  %v4254_v26 = vor.u32 %v5057_v8, %v4251_v2  ;;  %v4980_v50 = vld [vmem:[%s8119_s5 + $0x1d4] sm:$0xf0]  ;;  %v3810_v2 = vor.u32 %v4948_v12, %v3809_v47 }
 0x281   :  { %2861 = vmatpush.bf16.msrb.mxu1 %v4430_v18  ;;  %v4507_v58 = vld [vmem:[%s8119_s5 + $0x650] sm:$0xf0]  ;;  %v5153_v10 = vld [vmem:[%s8119_s5 + $0x744] sm:$0xf]  ;;  %v4382_v54 = vor.u32 %v5089_v55, %v4379_v63  ;;  %v5044_v8 = vld [vmem:[%s8119_s5 + $0x3d4] sm:$0xf0]  ;;  %v3938_v55 = vor.u32 %v4980_v50, %v3937_v19 }
 0x282   :  { %2874 = vmatpush.bf16.msrb.mxu2 %v4558_v32  ;;  %v4635_v48 = vld [vmem:[%s8119_s5 + $0x750] sm:$0xf0]  ;;  %v4510_v1 = vor.u32 %v5121_v14, %v4507_v58  ;;  %v5053_v45 = vld [vmem:[%s8119_s5 + $0x424] sm:$0xf]  ;;  %v3793_v63 = vld [vmem:[%s8119_s5 + $0xa8] sm:$0xf] }
 0x283   :  { %2887 = vmatpush.bf16.msrb.mxu3 %v4686_v39  ;;  %v4235_v16 = vld [vmem:[%s8119_s5 + $0x430] sm:$0xf0]  ;;  %v5085_v15 = vld [vmem:[%s8119_s5 + $0x524] sm:$0xf]  ;;  %v4638_v27 = vor.u32 %v5153_v10, %v4635_v48  ;;  %v3953_v39 = vld [vmem:[%s8119_s5 + $0x1e8] sm:$0xf] }
 0x284   :  { %2849 = vmatpush.bf16.msrb.mxu0 %v4286_v51  ;;  %v4363_v4 = vld [vmem:[%s8119_s5 + $0x530] sm:$0xf0]  ;;  %v5117_v25 = vld [vmem:[%s8119_s5 + $0x624] sm:$0xf]  ;;  %v4238_v40 = vor.u32 %v5053_v45, %v4235_v16  ;;  %v3954_v6 = vor.u32 %v4984_v57, %v3953_v39  ;;  %v4944_v14 = vld [vmem:[%s8119_s5 + $0xb4] sm:$0xf0] }
 0x285   :  { %2862 = vmatpush.bf16.msrb.mxu1 %v4414_v37  ;;  %v4491_v28 = vld [vmem:[%s8119_s5 + $0x630] sm:$0xf0]  ;;  %v5149_v34 = vld [vmem:[%s8119_s5 + $0x724] sm:$0xf]  ;;  %v4366_v23 = vor.u32 %v5085_v15, %v4363_v4  ;;  %v4209_v37 = vld [vmem:[%s8119_s5 + $0x3e8] sm:$0xf]  ;;  %v3794_v16 = vor.u32 %v4944_v14, %v3793_v63 }
 0x286   :  { %2875 = vmatpush.bf16.msrb.mxu2 %v4542_v5  ;;  %v4619_v11 = vld [vmem:[%s8119_s5 + $0x730] sm:$0xf0]  ;;  %v5049_v3 = vld [vmem:[%s8119_s5 + $0x404] sm:$0xf]  ;;  %v4494_v13 = vor.u32 %v5117_v25, %v4491_v28  ;;  %v5048_v5 = vld [vmem:[%s8119_s5 + $0x3f4] sm:$0xf0] }
 0x287   :  { %2888 = vmatpush.bf16.msrb.mxu3 %v4670_v31  ;;  %v4219_v33 = vld [vmem:[%s8119_s5 + $0x410] sm:$0xf0]  ;;  %v5081_v56 = vld [vmem:[%s8119_s5 + $0x504] sm:$0xf]  ;;  %v4622_v42 = vor.u32 %v5149_v34, %v4619_v11  ;;  %v4082_v31 = vor.u32 %v5016_v62, %v4081_v60  ;;  %v4210_v52 = vor.u32 %v5048_v5, %v4209_v37  ;;  %v3921_v58 = vld [vmem:[%s8119_s5 + $0x1a8] sm:$0xf] }
 0x288   :  { %2850 = vmatpush.bf16.msrb.mxu0 %v4270_v44  ;;  %v4347_v53 = vld [vmem:[%s8119_s5 + $0x510] sm:$0xf0]  ;;  %v5113_v49 = vld [vmem:[%s8119_s5 + $0x604] sm:$0xf]  ;;  %v4222_v41 = vor.u32 %v5049_v3, %v4219_v33  ;;  %v4065_v44 = vld [vmem:[%s8119_s5 + $0x2c8] sm:$0xf] }
 0x289   :  { %2863 = vmatpush.bf16.msrb.mxu1 %v4398_v36  ;;  %v4475_v18 = vld [vmem:[%s8119_s5 + $0x610] sm:$0xf0]  ;;  %v5145_v32 = vld [vmem:[%s8119_s5 + $0x704] sm:$0xf]  ;;  %v4350_v24 = vor.u32 %v5081_v56, %v4347_v53  ;;  %v5012_v36 = vld [vmem:[%s8119_s5 + $0x2d4] sm:$0xf0] }
 0x28a   :  { %2876 = vmatpush.bf16.msrb.mxu2 %v4526_v38  ;;  %v4603_v46 = vld [vmem:[%s8119_s5 + $0x710] sm:$0xf0]  ;;  %v4478_v51 = vor.u32 %v5113_v49, %v4475_v18  ;;  %v4193_v38 = vld [vmem:[%s8119_s5 + $0x3c8] sm:$0xf]  ;;  %v4976_v48 = vld [vmem:[%s8119_s5 + $0x1b4] sm:$0xf0] }
 0x28b   :  { %2889 = vmatpush.bf16.msrb.mxu3 %v4654_v35  ;;  %v4606_v17 = vor.u32 %v5145_v32, %v4603_v46  ;;  %v4066_v35 = vor.u32 %v5012_v36, %v4065_v44  ;;  %v4194_v10 = vor.u32 %v5044_v8, %v4193_v38  ;;  %v5040_v45 = vld [vmem:[%s8119_s5 + $0x3b4] sm:$0xf0]  ;;  %v3922_v15 = vor.u32 %v4976_v48, %v3921_v58  ;;  %v3777_v4 = vld [vmem:[%s8119_s5 + $0x88] sm:$0xf] }
 0x28c   :  { %2851 = vmatpush.bf16.msrb.mxu0 %v4254_v26  ;;  %v4049_v26 = vld [vmem:[%s8119_s5 + $0x2a8] sm:$0xf]  ;;  %v4940_v25 = vld [vmem:[%s8119_s5 + $0x94] sm:$0xf0] }
 0x28d   :  { %2864 = vmatpush.bf16.msrb.mxu1 %v4382_v54  ;;  %v5008_v54 = vld [vmem:[%s8119_s5 + $0x2b4] sm:$0xf0]  ;;  %v3905_v28 = vld [vmem:[%s8119_s5 + $0x188] sm:$0xf] }
 0x28e   :  { %2877 = vmatpush.bf16.msrb.mxu2 %v4510_v1  ;;  %v4177_v1 = vld [vmem:[%s8119_s5 + $0x3a8] sm:$0xf]  ;;  %v4972_v11 = vld [vmem:[%s8119_s5 + $0x194] sm:$0xf0] }
 0x28f   :  { %2890 = vmatpush.bf16.msrb.mxu3 %v4638_v27  ;;  %v4050_v27 = vor.u32 %v5008_v54, %v4049_v26  ;;  %v4178_v34 = vor.u32 %v5040_v45, %v4177_v1  ;;  %v5004_v3 = vld [vmem:[%s8119_s5 + $0x294] sm:$0xf0]  ;;  %v4161_v33 = vld [vmem:[%s8119_s5 + $0x388] sm:$0xf]  ;;  %v3906_v56 = vor.u32 %v4972_v11, %v3905_v28 }
 0x290   :  { %2852 = vmatpush.bf16.msrb.mxu0 %v4238_v40  ;;  %v4033_v40 = vld [vmem:[%s8119_s5 + $0x288] sm:$0xf]  ;;  %v4968_v46 = vld [vmem:[%s8119_s5 + $0x174] sm:$0xf0] }
 0x291   :  { %2865 = vmatpush.bf16.msrb.mxu1 %v4366_v23  ;;  %v5036_v23 = vld [vmem:[%s8119_s5 + $0x394] sm:$0xf0]  ;;  %v4034_v53 = vor.u32 %v5004_v3, %v4033_v40  ;;  %v3761_v49 = vld [vmem:[%s8119_s5 + $0x68] sm:$0xf] }
 0x292   :  { %2878 = vmatpush.bf16.msrb.mxu2 %v4494_v13  ;;  %v3778_v13 = vor.u32 %v4940_v25, %v3777_v4  ;;  %v3889_v18 = vld [vmem:[%s8119_s5 + $0x168] sm:$0xf]  ;;  %v4162_v32 = vor.u32 %v5036_v23, %v4161_v33  ;;  %v5000_v30 = vld [vmem:[%s8119_s5 + $0x274] sm:$0xf0] }
 0x293   :  { %2891 = vmatpush.bf16.msrb.mxu3 %v4622_v42  ;;  %v4936_v42 = vld [vmem:[%s8119_s5 + $0x74] sm:$0xf0]  ;;  %v4017_v21 = vld [vmem:[%s8119_s5 + $0x268] sm:$0xf]  ;;  %v3890_v60 = vor.u32 %v4968_v46, %v3889_v18 }
 0x294   :  { %2853 = vmatpush.bf16.msrb.mxu0 %v4222_v41  ;;  %v4145_v39 = vld [vmem:[%s8119_s5 + $0x368] sm:$0xf]  ;;  %v5032_v41 = vld [vmem:[%s8119_s5 + $0x374] sm:$0xf0]  ;;  %v3762_v57 = vor.u32 %v4936_v42, %v3761_v49  ;;  %v4018_v62 = vor.u32 %v5000_v30, %v4017_v21 }
 0x295   :  { %2866 = vmatpush.bf16.msrb.mxu1 %v4350_v24  ;;  %v3745_v24 = vld [vmem:[%s8119_s5 + $0x48] sm:$0xf]  ;;  %v4146_v5 = vor.u32 %v5032_v41, %v4145_v39  ;;  %v5028_v47 = vld [vmem:[%s8119_s5 + $0x354] sm:$0xf0] }
 0x296   :  { %2879 = vmatpush.bf16.msrb.mxu2 %v4478_v51  ;;  %v4932_v51 = vld [vmem:[%s8119_s5 + $0x54] sm:$0xf0]  ;;  %v3873_v37 = vld [vmem:[%s8119_s5 + $0x148] sm:$0xf] }
 0x297   :  { %2892 = vmatpush.bf16.msrb.mxu3 %v4606_v17  ;;  %2854 = vmatmul.bf16.vlgmr.msrb.gmra.mxu0 %v6890_v22  ;;  %v4964_v17 = vld [vmem:[%s8119_s5 + $0x154] sm:$0xf0]  ;;  %v3746_v12 = vor.u32 %v4932_v51, %v3745_v24  ;;  %v3729_v50 = vld [vmem:[%s8119_s5 + $0x28] sm:$0xf] }
 0x298   :  { %2898 = vmatpush.bf16.msra.mxu0 %v3826_v0  ;;  %2867 = vmatmul.bf16.vlgmr.msrb.gmra.mxu1 %v6898_v43  ;;  %v4001_v0 = vld [vmem:[%s8119_s5 + $0x248] sm:$0xf]  ;;  %v3874_v19 = vor.u32 %v4964_v17, %v3873_v37  ;;  %v4928_v44 = vld [vmem:[%s8119_s5 + $0x34] sm:$0xf0] }
 0x299   :  { %2911 = vmatpush.bf16.msra.mxu1 %v3954_v6  ;;  %2880 = vmatmul.bf16.vlgmr.msrb.gmra.mxu2 %v6900_v9  ;;  %v4996_v6 = vld [vmem:[%s8119_s5 + $0x254] sm:$0xf0]  ;;  %v3857_v36 = vld [vmem:[%s8119_s5 + $0x128] sm:$0xf]  ;;  %v3730_v14 = vor.u32 %v4928_v44, %v3729_v50 }
 0x29a   :  { %2924 = vmatpush.bf16.msra.mxu2 %v4082_v31  ;;  %2893 = vmatmul.bf16.vlgmr.msrb.gmra.mxu3 %v6923_v29  ;;  %v4129_v31 = vld [vmem:[%s8119_s5 + $0x348] sm:$0xf]  ;;  %v4960_v8 = vld [vmem:[%s8119_s5 + $0x134] sm:$0xf0] }
 0x29b   :  { %2937 = vmatpush.bf16.msra.mxu3 %v4210_v52  ;;  %v4002_v52 = vor.u32 %v4996_v6, %v4001_v0  ;;  %v4130_v38 = vor.u32 %v5028_v47, %v4129_v31  ;;  %v5024_v63 = vld [vmem:[%s8119_s5 + $0x334] sm:$0xf0]  ;;  %v3713_v58 = vld [vmem:[%s8119_s5 + $0x8] sm:$0xf]  ;;  %v3858_v48 = vor.u32 %v4960_v8, %v3857_v36 }
 0x29c   :  { %2899 = vmatpush.bf16.msra.mxu0 %v3810_v2  ;;  %v3985_v2 = vld [vmem:[%s8119_s5 + $0x228] sm:$0xf]  ;;  %v4956_v1 = vld [vmem:[%s8119_s5 + $0x114] sm:$0xf0] }
 0x29d   :  { %2912 = vmatpush.bf16.msra.mxu1 %v3938_v55  ;;  %v4992_v55 = vld [vmem:[%s8119_s5 + $0x234] sm:$0xf0]  ;;  %v3841_v54 = vld [vmem:[%s8119_s5 + $0x108] sm:$0xf] }
 0x29e   :  { %2925 = vmatpush.bf16.msra.mxu2 %v4066_v35  ;;  %v4113_v35 = vld [vmem:[%s8119_s5 + $0x328] sm:$0xf]  ;;  %v3986_v26 = vor.u32 %v4992_v55, %v3985_v2  ;;  %v5020_v4 = vld [vmem:[%s8119_s5 + $0x314] sm:$0xf0]  ;;  %v3842_v23 = vor.u32 %v4956_v1, %v3841_v54 }
 0x29f   :  { %2938 = vmatpush.bf16.msra.mxu3 %v4194_v10  ;;  %v4924_v10 = vld [vmem:[%s8119_s5 + $0x14] sm:$0xf0]  ;;  %v3969_v45 = vld [vmem:[%s8119_s5 + $0x208] sm:$0xf] }
 0x2a0   :  { %2900 = vmatpush.bf16.msra.mxu0 %v3794_v16  ;;  %v4114_v16 = vor.u32 %v5024_v63, %v4113_v35  ;;  %v4337_v25 = vld [vmem:[%s8119_s5 + $0x4e8] sm:$0xf]  ;;  %v5080_v28 = vld [vmem:[%s8119_s5 + $0x4f4] sm:$0xf0]  ;;  %v3714_v11 = vor.u32 %v4924_v10, %v3713_v58 }
 0x2a1   :  { %2913 = vmatpush.bf16.msra.mxu1 %v3922_v15  ;;  %v4988_v15 = vld [vmem:[%s8119_s5 + $0x214] sm:$0xf0]  ;;  %v4593_v3 = vld [vmem:[%s8119_s5 + $0x6e8] sm:$0xf]  ;;  %v4338_v42 = vor.u32 %v5080_v28, %v4337_v25 }
 0x2a2   :  { %2926 = vmatpush.bf16.msra.mxu2 %v4050_v27  ;;  %v4097_v27 = vld [vmem:[%s8119_s5 + $0x308] sm:$0xf]  ;;  %v5112_v40 = vld [vmem:[%s8119_s5 + $0x5f4] sm:$0xf0] }
 0x2a3   :  { %2939 = vmatpush.bf16.msra.mxu3 %v4178_v34  ;;  %v4465_v34 = vld [vmem:[%s8119_s5 + $0x5e8] sm:$0xf]  ;;  %v5144_v33 = vld [vmem:[%s8119_s5 + $0x6f4] sm:$0xf0]  ;;  %v4098_v49 = vor.u32 %v5020_v4, %v4097_v27 }
 0x2a4   :  { %2901 = vmatpush.bf16.msra.mxu0 %v3778_v13  ;;  %v3970_v13 = vor.u32 %v4988_v15, %v3969_v45  ;;  %v4466_v18 = vor.u32 %v5112_v40, %v4465_v34  ;;  %v4321_v46 = vld [vmem:[%s8119_s5 + $0x4c8] sm:$0xf]  ;;  %v5076_v21 = vld [vmem:[%s8119_s5 + $0x4d4] sm:$0xf0] }
 0x2a5   :  { %2914 = vmatpush.bf16.msra.mxu1 %v3906_v56  ;;  %v4721_v56 = vld [vmem:[%s8119_s5 + $0x7e8] sm:$0xf]  ;;  %v5108_v41 = vld [vmem:[%s8119_s5 + $0x5d4] sm:$0xf0]  ;;  %v4322_v51 = vor.u32 %v5076_v21, %v4321_v46 }
 0x2a6   :  { %2927 = vmatpush.bf16.msra.mxu2 %v4034_v53  ;;  %v5176_v53 = vld [vmem:[%s8119_s5 + $0x7f4] sm:$0xf0]  ;;  %v4449_v30 = vld [vmem:[%s8119_s5 + $0x5c8] sm:$0xf] }
 0x2a7   :  { %2940 = vmatpush.bf16.msra.mxu3 %v4162_v32  ;;  %v4594_v32 = vor.u32 %v5144_v33, %v4593_v3  ;;  %v4722_v39 = vor.u32 %v5176_v53, %v4721_v56  ;;  %v5172_v24 = vld [vmem:[%s8119_s5 + $0x7d4] sm:$0xf0]  ;;  %v4450_v37 = vor.u32 %v5108_v41, %v4449_v30  ;;  %v4305_v17 = vld [vmem:[%s8119_s5 + $0x4a8] sm:$0xf] }
 0x2a8   :  { %2902 = vmatpush.bf16.msra.mxu0 %v3762_v57  ;;  %v4577_v57 = vld [vmem:[%s8119_s5 + $0x6c8] sm:$0xf]  ;;  %v5072_v0 = vld [vmem:[%s8119_s5 + $0x4b4] sm:$0xf0] }
 0x2a9   :  { %2915 = vmatpush.bf16.msra.mxu1 %v3890_v60  ;;  %v5140_v60 = vld [vmem:[%s8119_s5 + $0x6d4] sm:$0xf0]  ;;  %v4433_v6 = vld [vmem:[%s8119_s5 + $0x5a8] sm:$0xf]  ;;  %v4306_v44 = vor.u32 %v5072_v0, %v4305_v17 }
 0x2aa   :  { %2928 = vmatpush.bf16.msra.mxu2 %v4018_v62  ;;  %v4705_v62 = vld [vmem:[%s8119_s5 + $0x7c8] sm:$0xf]  ;;  %v5104_v47 = vld [vmem:[%s8119_s5 + $0x5b4] sm:$0xf0] }
 0x2ab   :  { %2941 = vmatpush.bf16.msra.mxu3 %v4146_v5  ;;  %v4578_v5 = vor.u32 %v5140_v60, %v4577_v57  ;;  %v4706_v31 = vor.u32 %v5172_v24, %v4705_v62  ;;  %v5168_v50 = vld [vmem:[%s8119_s5 + $0x7b4] sm:$0xf0]  ;;  %v4434_v36 = vor.u32 %v5104_v47, %v4433_v6  ;;  %v4289_v8 = vld [vmem:[%s8119_s5 + $0x488] sm:$0xf] }
 0x2ac   :  { %2903 = vmatpush.bf16.msra.mxu0 %v3746_v12  ;;  %v4561_v12 = vld [vmem:[%s8119_s5 + $0x6a8] sm:$0xf]  ;;  %v5068_v2 = vld [vmem:[%s8119_s5 + $0x494] sm:$0xf0] }
 0x2ad   :  { %2916 = vmatpush.bf16.msra.mxu1 %v3874_v19  ;;  %v5136_v19 = vld [vmem:[%s8119_s5 + $0x6b4] sm:$0xf0]  ;;  %v4417_v55 = vld [vmem:[%s8119_s5 + $0x588] sm:$0xf] }
 0x2ae   :  { %2929 = vmatpush.bf16.msra.mxu2 %v4002_v52  ;;  %v4689_v52 = vld [vmem:[%s8119_s5 + $0x7a8] sm:$0xf]  ;;  %v5100_v63 = vld [vmem:[%s8119_s5 + $0x594] sm:$0xf0] }
 0x2af   :  { %2942 = vmatpush.bf16.msra.mxu3 %v4130_v38  ;;  %v4562_v38 = vor.u32 %v5136_v19, %v4561_v12  ;;  %v4690_v35 = vor.u32 %v5168_v50, %v4689_v52  ;;  %v5132_v58 = vld [vmem:[%s8119_s5 + $0x694] sm:$0xf0]  ;;  %v4673_v10 = vld [vmem:[%s8119_s5 + $0x788] sm:$0xf]  ;;  %v4418_v54 = vor.u32 %v5100_v63, %v4417_v55  ;;  %v4950_v55 = vld [vmem:[%s8119_s5 + $0xec] sm:$0xf] }
 0x2b0   :  { %2904 = vmatpush.bf16.msra.mxu0 %v3730_v14  ;;  %v4545_v14 = vld [vmem:[%s8119_s5 + $0x688] sm:$0xf]  ;;  %v5096_v4 = vld [vmem:[%s8119_s5 + $0x574] sm:$0xf0]  ;;  %v4982_v63 = vld [vmem:[%s8119_s5 + $0x1ec] sm:$0xf] }
 0x2b1   :  { %2917 = vmatpush.bf16.msra.mxu1 %v3858_v48  ;;  %v5164_v48 = vld [vmem:[%s8119_s5 + $0x794] sm:$0xf0]  ;;  %v4546_v1 = vor.u32 %v5132_v58, %v4545_v14  ;;  %v4273_v45 = vld [vmem:[%s8119_s5 + $0x468] sm:$0xf]  ;;  %v3955_v58 = vld [vmem:[%s8119_s5 + $0x1f8] sm:$0xf0] }
 0x2b2   :  { %2930 = vmatpush.bf16.msra.mxu2 %v3986_v26  ;;  %v4290_v26 = vor.u32 %v5068_v2, %v4289_v8  ;;  %v4401_v15 = vld [vmem:[%s8119_s5 + $0x568] sm:$0xf]  ;;  %v4674_v27 = vor.u32 %v5164_v48, %v4673_v10  ;;  %v5128_v28 = vld [vmem:[%s8119_s5 + $0x674] sm:$0xf0]  ;;  %v7589_v2 = vld [vmem:[%s8120_s6] sm:$0xf] }
 0x2b3   :  { %2943 = vmatpush.bf16.msra.mxu3 %v4114_v16  ;;  %v5064_v16 = vld [vmem:[%s8119_s5 + $0x474] sm:$0xf0]  ;;  %v4529_v25 = vld [vmem:[%s8119_s5 + $0x668] sm:$0xf]  ;;  %v4402_v3 = vor.u32 %v5096_v4, %v4401_v15  ;;  %v5014_v10 = vld [vmem:[%s8119_s5 + $0x2ec] sm:$0xf]  ;;  %v3958_v4 = vor.u32 %v4982_v63, %v3955_v58 }
 0x2b4   :  { %2905 = vmatpush.bf16.msra.mxu0 %v3714_v11  ;;  %v4657_v34 = vld [vmem:[%s8119_s5 + $0x768] sm:$0xf]  ;;  %v5160_v11 = vld [vmem:[%s8119_s5 + $0x774] sm:$0xf0]  ;;  %v4274_v40 = vor.u32 %v5064_v16, %v4273_v45  ;;  %v4530_v33 = vor.u32 %v5128_v28, %v4529_v25  ;;  %v4083_v48 = vld [vmem:[%s8119_s5 + $0x2f8] sm:$0xf0] }
 0x2b5   :  { %2918 = vmatpush.bf16.msra.mxu1 %v3842_v23  ;;  %v4257_v23 = vld [vmem:[%s8119_s5 + $0x448] sm:$0xf]  ;;  %v4658_v53 = vor.u32 %v5160_v11, %v4657_v34  ;;  %v5156_v46 = vld [vmem:[%s8119_s5 + $0x754] sm:$0xf0]  ;;  %v4211_v45 = vld [vmem:[%s8119_s5 + $0x3f8] sm:$0xf0]  ;;  %v4086_v25 = vor.u32 %v5014_v10, %v4083_v48 }
 0x2b6   :  { %2931 = vmatpush.bf16.msra.mxu2 %v3970_v13  ;;  %v5060_v13 = vld [vmem:[%s8119_s5 + $0x454] sm:$0xf0]  ;;  %v4385_v56 = vld [vmem:[%s8119_s5 + $0x548] sm:$0xf]  ;;  %v1402_v16 = vperm.slane %v7589_v2, 0 }
 0x2b7   :  { %2944 = vmatpush.bf16.msra.mxu3 %v4098_v49  ;;  %2906 = vmatmul.bf16.vlgmr.msra.gmra.mxu0 %v6773_v61  ;;  %v5092_v49 = vld [vmem:[%s8119_s5 + $0x554] sm:$0xf0]  ;;  %v4258_v21 = vor.u32 %v5060_v13, %v4257_v23  ;;  %v4241_v41 = vld [vmem:[%s8119_s5 + $0x428] sm:$0xf]  ;;  %v4946_v28 = vld [vmem:[%s8119_s5 + $0xcc] sm:$0xf] }
 0x2b8   :  { %2950 = vmatpush.bf16.msrb.mxu0 %v4338_v42  ;;  %2919 = vmatmul.bf16.vlgmr.msra.gmra.mxu1 %v6775_v7  ;;  %v4513_v42 = vld [vmem:[%s8119_s5 + $0x648] sm:$0xf]  ;;  %v4386_v30 = vor.u32 %v5092_v49, %v4385_v56  ;;  %v5056_v57 = vld [vmem:[%s8119_s5 + $0x434] sm:$0xf0]  ;;  %v3811_v34 = vld [vmem:[%s8119_s5 + $0xd8] sm:$0xf0] }
 0x2b9   :  { %2963 = vmatpush.bf16.msrb.mxu1 %v4466_v18  ;;  %2932 = vmatmul.bf16.vlgmr.msra.gmra.mxu2 %v6786_v59  ;;  %v5124_v18 = vld [vmem:[%s8119_s5 + $0x654] sm:$0xf0]  ;;  %v4369_v60 = vld [vmem:[%s8119_s5 + $0x528] sm:$0xf]  ;;  %v4242_v0 = vor.u32 %v5056_v57, %v4241_v41  ;;  %v4978_v11 = vld [vmem:[%s8119_s5 + $0x1cc] sm:$0xf] }
 0x2ba   :  { %2976 = vmatpush.bf16.msrb.mxu2 %v4594_v32  ;;  %2945 = vmatmul.bf16.vlgmr.msra.gmra.mxu3 %v6790_v20  ;;  %v4641_v32 = vld [vmem:[%s8119_s5 + $0x748] sm:$0xf]  ;;  %v5088_v24 = vld [vmem:[%s8119_s5 + $0x534] sm:$0xf0]  ;;  %v4067_v23 = vld [vmem:[%s8119_s5 + $0x2d8] sm:$0xf0] }
 0x2bb   :  { %2989 = vmatpush.bf16.msrb.mxu3 %v4722_v39  ;;  %v4514_v39 = vor.u32 %v5124_v18, %v4513_v42  ;;  %v4642_v62 = vor.u32 %v5156_v46, %v4641_v32  ;;  %v5152_v17 = vld [vmem:[%s8119_s5 + $0x734] sm:$0xf0]  ;;  %v4225_v6 = vld [vmem:[%s8119_s5 + $0x408] sm:$0xf]  ;;  %v4370_v12 = vor.u32 %v5088_v24, %v4369_v60  ;;  %v4195_v49 = vld [vmem:[%s8119_s5 + $0x3d8] sm:$0xf0]  ;;  %v3814_v18 = vor.u32 %v4946_v28, %v3811_v34 }
 0x2bc   :  { %2951 = vmatpush.bf16.msrb.mxu0 %v4322_v51  ;;  %v4497_v51 = vld [vmem:[%s8119_s5 + $0x628] sm:$0xf]  ;;  %v5084_v52 = vld [vmem:[%s8119_s5 + $0x514] sm:$0xf0]  ;;  %v3923_v60 = vld [vmem:[%s8119_s5 + $0x1b8] sm:$0xf0] }
 0x2bd   :  { %2964 = vmatpush.bf16.msrb.mxu1 %v4450_v37  ;;  %v5120_v37 = vld [vmem:[%s8119_s5 + $0x634] sm:$0xf0]  ;;  %v4353_v47 = vld [vmem:[%s8119_s5 + $0x508] sm:$0xf]  ;;  %v4051_v24 = vld [vmem:[%s8119_s5 + $0x2b8] sm:$0xf0] }
 0x2be   :  { %2977 = vmatpush.bf16.msrb.mxu2 %v4578_v5  ;;  %v4625_v5 = vld [vmem:[%s8119_s5 + $0x728] sm:$0xf]  ;;  %v4498_v19 = vor.u32 %v5120_v37, %v4497_v51  ;;  %v5148_v8 = vld [vmem:[%s8119_s5 + $0x714] sm:$0xf0]  ;;  %v5038_v51 = vld [vmem:[%s8119_s5 + $0x3ac] sm:$0xf] }
 0x2bf   :  { %2990 = vmatpush.bf16.msrb.mxu3 %v4706_v31  ;;  %v5052_v31 = vld [vmem:[%s8119_s5 + $0x414] sm:$0xf0]  ;;  %v4481_v50 = vld [vmem:[%s8119_s5 + $0x608] sm:$0xf]  ;;  %v4179_v37 = vld [vmem:[%s8119_s5 + $0x3b8] sm:$0xf0] }
 0x2c0   :  { %2952 = vmatpush.bf16.msrb.mxu0 %v4306_v44  ;;  %v5116_v44 = vld [vmem:[%s8119_s5 + $0x614] sm:$0xf0]  ;;  %v4226_v14 = vor.u32 %v5052_v31, %v4225_v6  ;;  %v4938_v6 = vld [vmem:[%s8119_s5 + $0x8c] sm:$0xf]  ;;  %v3779_v31 = vld [vmem:[%s8119_s5 + $0x98] sm:$0xf0] }
 0x2c1   :  { %2965 = vmatpush.bf16.msrb.mxu1 %v4434_v36  ;;  %v4626_v36 = vor.u32 %v5152_v17, %v4625_v5  ;;  %v3782_v63 = vor.u32 %v4938_v6, %v3779_v31  ;;  %v5022_v6 = vld [vmem:[%s8119_s5 + $0x32c] sm:$0xf]  ;;  %v4115_v31 = vld [vmem:[%s8119_s5 + $0x338] sm:$0xf0] }
 0x2c2   :  { %2978 = vmatpush.bf16.msrb.mxu2 %v4562_v38  ;;  %v4609_v38 = vld [vmem:[%s8119_s5 + $0x708] sm:$0xf] }
 0x2c3   :  { %2991 = vmatpush.bf16.msrb.mxu3 %v4690_v35  ;;  %v3827_v35 = vld [vmem:[%s8119_s5 + $0xf8] sm:$0xf0]  ;;  %v4610_v15 = vor.u32 %v5148_v8, %v4609_v38 }
 0x2c4   :  { %2953 = vmatpush.bf16.msrb.mxu0 %v4290_v26  ;;  %v4354_v26 = vor.u32 %v5084_v52, %v4353_v47  ;;  %v4970_v47 = vld [vmem:[%s8119_s5 + $0x18c] sm:$0xf]  ;;  %v3907_v52 = vld [vmem:[%s8119_s5 + $0x198] sm:$0xf0] }
 0x2c5   :  { %2966 = vmatpush.bf16.msrb.mxu1 %v4418_v54  ;;  %v4482_v54 = vor.u32 %v5116_v44, %v4481_v50  ;;  %v5002_v50 = vld [vmem:[%s8119_s5 + $0x28c] sm:$0xf]  ;;  %v4035_v44 = vld [vmem:[%s8119_s5 + $0x298] sm:$0xf0]  ;;  %v3910_v58 = vor.u32 %v4970_v47, %v3907_v52 }
 0x2c6   :  { %2979 = vmatpush.bf16.msrb.mxu2 %v4546_v1  ;;  %v5046_v1 = vld [vmem:[%s8119_s5 + $0x3ec] sm:$0xf]  ;;  %v4038_v10 = vor.u32 %v5002_v50, %v4035_v44 }
 0x2c7   :  { %2992 = vmatpush.bf16.msrb.mxu3 %v4674_v27  ;;  %v3830_v27 = vor.u32 %v4950_v55, %v3827_v35  ;;  %v5034_v55 = vld [vmem:[%s8119_s5 + $0x38c] sm:$0xf]  ;;  %v4163_v35 = vld [vmem:[%s8119_s5 + $0x398] sm:$0xf0] }
 0x2c8   :  { %2954 = vmatpush.bf16.msrb.mxu0 %v4274_v40  ;;  %v4214_v40 = vor.u32 %v5046_v1, %v4211_v45  ;;  %v4966_v1 = vld [vmem:[%s8119_s5 + $0x16c] sm:$0xf]  ;;  %v4166_v45 = vor.u32 %v5034_v55, %v4163_v35  ;;  %v3971_v55 = vld [vmem:[%s8119_s5 + $0x218] sm:$0xf0] }
 0x2c9   :  { %2967 = vmatpush.bf16.msrb.mxu1 %v4402_v3  ;;  %v3939_v3 = vld [vmem:[%s8119_s5 + $0x1d8] sm:$0xf0]  ;;  %v4954_v44 = vld [vmem:[%s8119_s5 + $0x10c] sm:$0xf] }
 0x2ca   :  { %2980 = vmatpush.bf16.msrb.mxu2 %v4530_v33  ;;  %v5010_v33 = vld [vmem:[%s8119_s5 + $0x2cc] sm:$0xf]  ;;  %v3942_v32 = vor.u32 %v4978_v11, %v3939_v3  ;;  %v3747_v3 = vld [vmem:[%s8119_s5 + $0x58] sm:$0xf0] }
 0x2cb   :  { %2993 = vmatpush.bf16.msrb.mxu3 %v4658_v53  ;;  %v5042_v53 = vld [vmem:[%s8119_s5 + $0x3cc] sm:$0xf]  ;;  %v4070_v46 = vor.u32 %v5010_v33, %v4067_v23 }
 0x2cc   :  { %2955 = vmatpush.bf16.msrb.mxu0 %v4258_v21  ;;  %v2699_v13 = vpop.f32.mrf.mxu0  ;;  %v4942_v21 = vld [vmem:[%s8119_s5 + $0xac] sm:$0xf]  ;;  %v4198_v57 = vor.u32 %v5042_v53, %v4195_v49  ;;  %v4003_v49 = vld [vmem:[%s8119_s5 + $0x258] sm:$0xf0] }
 0x2cd   :  { %2968 = vmatpush.bf16.msrb.mxu1 %v4386_v30  ;;  %v2712_v56 = vpop.f32.mrf.mxu1  ;;  %v2700_v42 = vadd.f32 %v2699_v13, %v1402_v16  ;;  %v3795_v30 = vld [vmem:[%s8119_s5 + $0xb8] sm:$0xf0]  ;;  %v4962_v33 = vld [vmem:[%s8119_s5 + $0x14c] sm:$0xf] }
 0x2ce   :  { %2981 = vmatpush.bf16.msrb.mxu2 %v4514_v39  ;;  %v4974_v39 = vld [vmem:[%s8119_s5 + $0x1ac] sm:$0xf]  ;;  %v3798_v5 = vor.u32 %v4942_v21, %v3795_v30  ;;  %v3891_v16 = vld [vmem:[%s8119_s5 + $0x178] sm:$0xf0] }
 0x2cf   :  { %2994 = vmatpush.bf16.msrb.mxu3 %v4642_v62  ;;  %v2713_v41 = vadd.f32 %v2712_v56, %v2700_v42  ;;  %v5006_v62 = vld [vmem:[%s8119_s5 + $0x2ac] sm:$0xf]  ;;  %v3926_v17 = vor.u32 %v4974_v39, %v3923_v60  ;;  %v3894_v34 = vor.u32 %v4966_v1, %v3891_v16  ;;  %v3875_v56 = vld [vmem:[%s8119_s5 + $0x158] sm:$0xf0] }
 0x2d0   :  { %2956 = vmatpush.bf16.msrb.mxu0 %v4242_v0  ;;  %v4054_v0 = vor.u32 %v5006_v62, %v4051_v24  ;;  %v4994_v53 = vld [vmem:[%s8119_s5 + $0x24c] sm:$0xf]  ;;  %v3731_v62 = vld [vmem:[%s8119_s5 + $0x38] sm:$0xf0] }
 0x2d1   :  { %2969 = vmatpush.bf16.msrb.mxu1 %v4370_v12  ;;  %v5026_v42 = vld [vmem:[%s8119_s5 + $0x34c] sm:$0xf]  ;;  %v4467_v1 = vld [vmem:[%s8119_s5 + $0x5f8] sm:$0xf0] }
 0x2d2   :  { %2982 = vmatpush.bf16.msrb.mxu2 %v4498_v19  ;;  %v4182_v19 = vor.u32 %v5038_v51, %v4179_v37  ;;  %v4926_v60 = vld [vmem:[%s8119_s5 + $0x2c] sm:$0xf]  ;;  %v3859_v37 = vld [vmem:[%s8119_s5 + $0x138] sm:$0xf0] }
 0x2d3   :  { %2995 = vmatpush.bf16.msrb.mxu3 %v4626_v36  ;;  %v4958_v24 = vld [vmem:[%s8119_s5 + $0x12c] sm:$0xf]  ;;  %v3734_v47 = vor.u32 %v4926_v60, %v3731_v62  ;;  %v4595_v16 = vld [vmem:[%s8119_s5 + $0x6f8] sm:$0xf0] }
 0x2d4   :  { %2957 = vmatpush.bf16.msrb.mxu0 %v4226_v14  ;;  %v2725_v12 = vpop.f32.mrf.mxu2  ;;  %v2701_v38 = vpop.f32.mrf.mxu0  ;;  %v3862_v52 = vor.u32 %v4958_v24, %v3859_v37  ;;  %v5018_v35 = vld [vmem:[%s8119_s5 + $0x30c] sm:$0xf]  ;;  %v4307_v60 = vld [vmem:[%s8119_s5 + $0x4b8] sm:$0xf0] }
 0x2d5   :  { %2970 = vmatpush.bf16.msrb.mxu1 %v4354_v26  ;;  %v2726_v36 = vadd.f32 %v2725_v12, %v2713_v41  ;;  %v2714_v8 = vpop.f32.mrf.mxu1  ;;  %v2738_v14 = vpop.f32.mrf.mxu3  ;;  %v4934_v26 = vld [vmem:[%s8119_s5 + $0x6c] sm:$0xf]  ;;  %v3878_v41 = vor.u32 %v4962_v33, %v3875_v56 }
 0x2d6   :  { %2983 = vmatpush.bf16.msrb.mxu2 %v4482_v54  ;;  %v3763_v54 = vld [vmem:[%s8119_s5 + $0x78] sm:$0xf0]  ;;  %v4922_v12 = vld [vmem:[%s8119_s5 + $0xc] sm:$0xf]  ;;  %v4118_v8 = vor.u32 %v5022_v6, %v4115_v31 }
 0x2d7   :  { %2996 = vmatpush.bf16.msrb.mxu3 %v4610_v15  ;;  %2958 = vmatmul.bf16.vlgmr.msrb.gmra.mxu0 %v6890_v22  ;;  %v2739_v48 = vadd.f32 %v2738_v14, %v2726_v36  ;;  %v4998_v15 = vld [vmem:[%s8119_s5 + $0x26c] sm:$0xf]  ;;  %v3766_v28 = vor.u32 %v4934_v26, %v3763_v54  ;;  %v3843_v36 = vld [vmem:[%s8119_s5 + $0x118] sm:$0xf0] }
 0x2d8   :  { %3002 = vmatpush.bf16.msra.mxu0 %v3830_v27  ;;  %2971 = vmatmul.bf16.vlgmr.msrb.gmra.mxu1 %v6898_v43  ;;  %v4019_v27 = vld [vmem:[%s8119_s5 + $0x278] sm:$0xf0]  ;;  %v4986_v38 = vld [vmem:[%s8119_s5 + $0x20c] sm:$0xf] }
 0x2d9   :  { %3015 = vmatpush.bf16.msra.mxu1 %v3958_v4  ;;  %2984 = vmatmul.bf16.vlgmr.msrb.gmra.mxu2 %v6900_v9  ;;  %v5030_v4 = vld [vmem:[%s8119_s5 + $0x36c] sm:$0xf]  ;;  %v4022_v11 = vor.u32 %v4998_v15, %v4019_v27  ;;  %v3846_v27 = vor.u32 %v4954_v44, %v3843_v36  ;;  %v4547_v44 = vld [vmem:[%s8119_s5 + $0x698] sm:$0xf0] }
 0x2da   :  { %3028 = vmatpush.bf16.msra.mxu2 %v4086_v25  ;;  %2997 = vmatmul.bf16.vlgmr.msrb.gmra.mxu3 %v6923_v29  ;;  %v4147_v25 = vld [vmem:[%s8119_s5 + $0x378] sm:$0xf0]  ;;  %v5106_v56 = vld [vmem:[%s8119_s5 + $0x5cc] sm:$0xf] }
 0x2db   :  { %3041 = vmatpush.bf16.msra.mxu3 %v4214_v40  ;;  %v4930_v40 = vld [vmem:[%s8119_s5 + $0x4c] sm:$0xf]  ;;  %v4150_v13 = vor.u32 %v5030_v4, %v4147_v25  ;;  %v3974_v4 = vor.u32 %v4986_v38, %v3971_v55 }
 0x2dc   :  { %3003 = vmatpush.bf16.msra.mxu0 %v3814_v18  ;;  %v2727_v23 = vpop.f32.mrf.mxu2  ;;  %v4131_v18 = vld [vmem:[%s8119_s5 + $0x358] sm:$0xf0]  ;;  %v5174_v25 = vld [vmem:[%s8119_s5 + $0x7ec] sm:$0xf] }
 0x2dd   :  { %3016 = vmatpush.bf16.msra.mxu1 %v3942_v32  ;;  %v2751_v32 = vpop.f32.mrf.mxu0  ;;  %v2740_v21 = vpop.f32.mrf.mxu3  ;;  %v4134_v51 = vor.u32 %v5026_v42, %v4131_v18  ;;  %v5074_v23 = vld [vmem:[%s8119_s5 + $0x4cc] sm:$0xf]  ;;  %v4579_v18 = vld [vmem:[%s8119_s5 + $0x6d8] sm:$0xf0] }
 0x2de   :  { %3029 = vmatpush.bf16.msra.mxu2 %v4070_v46  ;;  %v3750_v46 = vor.u32 %v4930_v40, %v3747_v3  ;;  %v2752_v30 = vadd.f32 %v2751_v32, %v2739_v48  ;;  %v2764_v39 = vpop.f32.mrf.mxu1  ;;  %v5110_v48 = vld [vmem:[%s8119_s5 + $0x5ec] sm:$0xf] }
 0x2df   :  { %3042 = vmatpush.bf16.msra.mxu3 %v4198_v57  ;;  %v4006_v57 = vor.u32 %v4994_v53, %v4003_v49  ;;  %v4470_v3 = vor.u32 %v5110_v48, %v4467_v1  ;;  %v4451_v49 = vld [vmem:[%s8119_s5 + $0x5d8] sm:$0xf0]  ;;  %v5138_v42 = vld [vmem:[%s8119_s5 + $0x6cc] sm:$0xf] }
 0x2e0   :  { %3004 = vmatpush.bf16.msra.mxu0 %v3798_v5  ;;  %v4990_v5 = vld [vmem:[%s8119_s5 + $0x22c] sm:$0xf]  ;;  %v4275_v48 = vld [vmem:[%s8119_s5 + $0x478] sm:$0xf0] }
 0x2e1   :  { %3017 = vmatpush.bf16.msra.mxu1 %v3926_v17  ;;  %v3987_v17 = vld [vmem:[%s8119_s5 + $0x238] sm:$0xf0]  ;;  %v5170_v32 = vld [vmem:[%s8119_s5 + $0x7cc] sm:$0xf] }
 0x2e2   :  { %3030 = vmatpush.bf16.msra.mxu2 %v4054_v0  ;;  %v7758_v0 = vadd.f32 %v2764_v39, %v2752_v30  ;;  %v3990_v50 = vor.u32 %v4990_v5, %v3987_v17  ;;  %v4454_v39 = vor.u32 %v5106_v56, %v4451_v49  ;;  %v5102_v62 = vld [vmem:[%s8119_s5 + $0x5ac] sm:$0xf]  ;;  %v4563_v5 = vld [vmem:[%s8119_s5 + $0x6b8] sm:$0xf0] }
 0x2e3   :  { %3043 = vmatpush.bf16.msra.mxu3 %v4182_v19  ;;  %v3715_v19 = vld [vmem:[%s8119_s5 + $0x18] sm:$0xf0]  ;;  %v5134_v37 = vld [vmem:[%s8119_s5 + $0x6ac] sm:$0xf] }
 0x2e4   :  { %3005 = vmatpush.bf16.msra.mxu0 %v3782_v63  ;;  %v4099_v63 = vld [vmem:[%s8119_s5 + $0x318] sm:$0xf0]  ;;  %v7790_v14 = vpop.f32.mrf.mxu2  ;;  %v3718_v54 = vor.u32 %v4922_v12, %v3715_v19  ;;  %v4566_v12 = vor.u32 %v5134_v37, %v4563_v5  ;;  %v5098_v19 = vld [vmem:[%s8119_s5 + $0x58c] sm:$0xf] }
 0x2e5   :  { %3018 = vmatpush.bf16.msra.mxu1 %v3910_v58  ;;  %v5078_v58 = vld [vmem:[%s8119_s5 + $0x4ec] sm:$0xf]  ;;  %v2753_v26 = vpop.f32.mrf.mxu0  ;;  %v7816_v40 = vpop.f32.mrf.mxu3  ;;  %v4691_v17 = vld [vmem:[%s8119_s5 + $0x7b8] sm:$0xf0] }
 0x2e6   :  { %3031 = vmatpush.bf16.msra.mxu2 %v4038_v10  ;;  %v4339_v10 = vld [vmem:[%s8119_s5 + $0x4f8] sm:$0xf0]  ;;  %v2766_v15 = vpop.f32.mrf.mxu1  ;;  %v5162_v38 = vld [vmem:[%s8119_s5 + $0x78c] sm:$0xf] }
 0x2e7   :  { %3044 = vmatpush.bf16.msra.mxu3 %v4166_v45  ;;  %v5142_v45 = vld [vmem:[%s8119_s5 + $0x6ec] sm:$0xf]  ;;  %v4403_v1 = vld [vmem:[%s8119_s5 + $0x578] sm:$0xf0] }
 0x2e8   :  { %3006 = vmatpush.bf16.msra.mxu0 %v3766_v28  ;;  %v4723_v28 = vld [vmem:[%s8119_s5 + $0x7f8] sm:$0xf0]  ;;  %v4598_v33 = vor.u32 %v5142_v45, %v4595_v16  ;;  %v5094_v26 = vld [vmem:[%s8119_s5 + $0x56c] sm:$0xf] }
 0x2e9   :  { %3019 = vmatpush.bf16.msra.mxu1 %v3894_v34  ;;  %v4102_v34 = vor.u32 %v5018_v35, %v4099_v63  ;;  %v4726_v53 = vor.u32 %v5174_v25, %v4723_v28  ;;  %v5126_v45 = vld [vmem:[%s8119_s5 + $0x66c] sm:$0xf]  ;;  %v4531_v16 = vld [vmem:[%s8119_s5 + $0x678] sm:$0xf0]  ;;  %v4406_v25 = vor.u32 %v5094_v26, %v4403_v1  ;;  %v5183_v1 = vld [vmem:[%s8121_s7 + $0x30] sm:$0xff] }
 0x2ea   :  { %3032 = vmatpush.bf16.msra.mxu2 %v4022_v11  ;;  %v4342_v11 = vor.u32 %v5078_v58, %v4339_v10  ;;  %v5062_v10 = vld [vmem:[%s8119_s5 + $0x46c] sm:$0xf]  ;;  %v4534_v28 = vor.u32 %v5126_v45, %v4531_v16  ;;  %v4499_v37 = vld [vmem:[%s8119_s5 + $0x638] sm:$0xf0]  ;;  %v5191_v45 = vld [vmem:[%s8121_s7 + $0x70] sm:$0xff] }
 0x2eb   :  { %3045 = vmatpush.bf16.msra.mxu3 %v4150_v13  ;;  %v4323_v13 = vld [vmem:[%s8119_s5 + $0x4d8] sm:$0xf0]  ;;  %v5158_v15 = vld [vmem:[%s8119_s5 + $0x76c] sm:$0xf] }
 0x2ec   :  { %3007 = vmatpush.bf16.msra.mxu0 %v3750_v46  ;;  %v4707_v46 = vld [vmem:[%s8119_s5 + $0x7d8] sm:$0xf0]  ;;  %v4326_v21 = vor.u32 %v5074_v23, %v4323_v13  ;;  %v2779_v30 = vpop.f32.mrf.mxu2  ;;  %v5122_v56 = vld [vmem:[%s8119_s5 + $0x64c] sm:$0xf] }
 0x2ed   :  { %3020 = vmatpush.bf16.msra.mxu1 %v3878_v41  ;;  %v4582_v41 = vor.u32 %v5138_v42, %v4579_v18  ;;  %v4710_v24 = vor.u32 %v5170_v32, %v4707_v46  ;;  %v2792_v31 = vpop.f32.mrf.mxu3  ;;  %v4387_v13 = vld [vmem:[%s8119_s5 + $0x558] sm:$0xf0]  ;;  %v5154_v18 = vld [vmem:[%s8119_s5 + $0x74c] sm:$0xf] }
 0x2ee   :  { %3033 = vmatpush.bf16.msra.mxu2 %v4006_v57  ;;  %v5070_v57 = vld [vmem:[%s8119_s5 + $0x4ac] sm:$0xf]  ;;  %v4643_v32 = vld [vmem:[%s8119_s5 + $0x758] sm:$0xf0] }
 0x2ef   :  { %3046 = vmatpush.bf16.msra.mxu3 %v4134_v51  ;;  %v4435_v51 = vld [vmem:[%s8119_s5 + $0x5b8] sm:$0xf0]  ;;  %v4310_v6 = vor.u32 %v5070_v57, %v4307_v60  ;;  %v5086_v60 = vld [vmem:[%s8119_s5 + $0x52c] sm:$0xf] }
 0x2f0   :  { %3008 = vmatpush.bf16.msra.mxu0 %v3734_v47  ;;  %v4438_v47 = vor.u32 %v5102_v62, %v4435_v51  ;;  %v4243_v57 = vld [vmem:[%s8119_s5 + $0x438] sm:$0xf0]  ;;  %v4646_v62 = vor.u32 %v5154_v18, %v4643_v32  ;;  %v5118_v51 = vld [vmem:[%s8119_s5 + $0x62c] sm:$0xf]  ;;  %v2778_v18 = vadd.f32 %v7790_v14, %v7758_v0  ;;  %v5177_v0 = vld [vmem:[%s8121_s7] sm:$0xff] }
 0x2f1   :  { %3021 = vmatpush.bf16.msra.mxu1 %v3862_v52  ;;  %v4419_v52 = vld [vmem:[%s8119_s5 + $0x598] sm:$0xf0]  ;;  %v5150_v5 = vld [vmem:[%s8119_s5 + $0x72c] sm:$0xf]  ;;  %v4502_v31 = vor.u32 %v5118_v51, %v4499_v37 }
 0x2f2   :  { %3034 = vmatpush.bf16.msra.mxu2 %v3990_v50  ;;  %v5130_v50 = vld [vmem:[%s8119_s5 + $0x68c] sm:$0xf]  ;;  %v4422_v63 = vor.u32 %v5098_v19, %v4419_v52  ;;  %v5192_v26 = vld [vmem:[%s8121_s7 + $0x78] sm:$0xff]  ;;  %v2791_v14 = vadd.f32 %v7816_v40, %v2778_v18 }
 0x2f3   :  { %3047 = vmatpush.bf16.msra.mxu3 %v4118_v8  ;;  %v4675_v8 = vld [vmem:[%s8119_s5 + $0x798] sm:$0xf0]  ;;  %v4550_v58 = vor.u32 %v5130_v50, %v4547_v44  ;;  %v5114_v52 = vld [vmem:[%s8119_s5 + $0x60c] sm:$0xf] }
 0x2f4   :  { %3009 = vmatpush.bf16.msra.mxu0 %v3718_v54  ;;  %v7888_v36 = vpop.f32.mrf.mxu0  ;;  %v4678_v54 = vor.u32 %v5162_v38, %v4675_v8  ;;  %v4483_v50 = vld [vmem:[%s8119_s5 + $0x618] sm:$0xf0]  ;;  %v5146_v38 = vld [vmem:[%s8119_s5 + $0x70c] sm:$0xf] }
 0x2f5   :  { %3022 = vmatpush.bf16.msra.mxu1 %v3846_v27  ;;  %v7896_v55 = vpop.f32.mrf.mxu1  ;;  %v4659_v27 = vld [vmem:[%s8119_s5 + $0x778] sm:$0xf0]  ;;  %v5186_v32 = vld [vmem:[%s8121_s7 + $0x48] sm:$0xff] }
 0x2f6   :  { %3035 = vmatpush.bf16.msra.mxu2 %v3974_v4  ;;  %v4278_v4 = vor.u32 %v5062_v10, %v4275_v48  ;;  %v4611_v8 = vld [vmem:[%s8119_s5 + $0x718] sm:$0xf0] }
 0x2f7   :  { %3048 = vmatpush.bf16.msra.mxu3 %v4102_v34  ;;  %3010 = vmatmul.bf16.vlgmr.msra.gmra.mxu0 %v6773_v61  ;;  %v5166_v61 = vld [vmem:[%s8119_s5 + $0x7ac] sm:$0xf]  ;;  %v4614_v10 = vor.u32 %v5146_v38, %v4611_v8  ;;  %v5184_v48 = vld [vmem:[%s8121_s7 + $0x38] sm:$0xff] }
 0x2f8   :  { %3054 = vmatpush.bf16.msrb.mxu0 %v4342_v11  ;;  %3023 = vmatmul.bf16.vlgmr.msra.gmra.mxu1 %v6775_v7  ;;  %v5066_v7 = vld [vmem:[%s8119_s5 + $0x48c] sm:$0xf]  ;;  %v4259_v11 = vld [vmem:[%s8119_s5 + $0x458] sm:$0xf0] }
 0x2f9   :  { %3067 = vmatpush.bf16.msrb.mxu1 %v4470_v3  ;;  %3036 = vmatmul.bf16.vlgmr.msra.gmra.mxu2 %v6786_v59  ;;  %v4291_v59 = vld [vmem:[%s8119_s5 + $0x498] sm:$0xf0]  ;;  %v5058_v34 = vld [vmem:[%s8119_s5 + $0x44c] sm:$0xf] }
 0x2fa   :  { %3080 = vmatpush.bf16.msrb.mxu2 %v4598_v33  ;;  %3049 = vmatmul.bf16.vlgmr.msra.gmra.mxu3 %v6790_v20  ;;  %v4694_v20 = vor.u32 %v5166_v61, %v4691_v17  ;;  %v4294_v35 = vor.u32 %v5066_v7, %v4291_v59  ;;  %v5090_v3 = vld [vmem:[%s8119_s5 + $0x54c] sm:$0xf]  ;;  %v4662_v33 = vor.u32 %v5158_v15, %v4659_v27  ;;  %v4627_v61 = vld [vmem:[%s8119_s5 + $0x738] sm:$0xf0] }
 0x2fb   :  { %3093 = vmatpush.bf16.msrb.mxu3 %v4726_v53  ;;  %v4515_v53 = vld [vmem:[%s8119_s5 + $0x658] sm:$0xf0]  ;;  %v4390_v30 = vor.u32 %v5090_v3, %v4387_v13  ;;  %v5082_v7 = vld [vmem:[%s8119_s5 + $0x50c] sm:$0xf]  ;;  %v4630_v59 = vor.u32 %v5150_v5, %v4627_v61  ;;  %v5195_v61 = vld [vmem:[%s8121_s7 + $0x90] sm:$0xff] }
 0x2fc   :  { %3055 = vmatpush.bf16.msrb.mxu0 %v4326_v21  ;;  %v7931_v23 = vpop.f32.mrf.mxu2  ;;  %v2805_v42 = vpop.f32.mrf.mxu0  ;;  %v4262_v21 = vor.u32 %v5058_v34, %v4259_v11  ;;  %v5182_v15 = vld [vmem:[%s8121_s7 + $0x28] sm:$0xff]  ;;  %v5196_v40 = vld [vmem:[%s8121_s7 + $0x98] sm:$0xff] }
 0x2fd   :  { %3068 = vmatpush.bf16.msrb.mxu1 %v4454_v39  ;;  %v7942_v49 = vpop.f32.mrf.mxu3  ;;  %v2818_v46 = vpop.f32.mrf.mxu1  ;;  %v4518_v39 = vor.u32 %v5122_v56, %v4515_v53  ;;  %v5179_v56 = vld [vmem:[%s8121_s7 + $0x10] sm:$0xff]  ;;  %v5178_v42 = vld [vmem:[%s8121_s7 + $0x8] sm:$0xff] }
 0x2fe   :  { %3081 = vmatpush.bf16.msrb.mxu2 %v4582_v41  ;;  %v5054_v41 = vld [vmem:[%s8119_s5 + $0x42c] sm:$0xf]  ;;  %v5187_v53 = vld [vmem:[%s8121_s7 + $0x50] sm:$0xff] }
 0x2ff   :  { %3094 = vmatpush.bf16.msrb.mxu3 %v4710_v24  ;;  %v4371_v24 = vld [vmem:[%s8119_s5 + $0x538] sm:$0xf0]  ;;  %v4246_v17 = vor.u32 %v5054_v41, %v4243_v57  ;;  %v5199_v46 = vld [vmem:[%s8121_s7 + $0xb0] sm:$0xff]  ;;  %v5198_v41 = vld [vmem:[%s8121_s7 + $0xa8] sm:$0xff] }
 0x300   :  { %3056 = vmatpush.bf16.msrb.mxu0 %v4310_v6  ;;  %v4374_v6 = vor.u32 %v5086_v60, %v4371_v24  ;;  %v5185_v57 = vld [vmem:[%s8121_s7 + $0x40] sm:$0xff]  ;;  %v3106_v24 = vpack.c.bf16 %v2791_v14, %v2791_v14 }
 0x301   :  { %3069 = vmatpush.bf16.msrb.mxu1 %v4438_v47  ;;  %v5050_v47 = vld [vmem:[%s8119_s5 + $0x40c] sm:$0xf] }
 0x302   :  { %3082 = vmatpush.bf16.msrb.mxu2 %v4566_v12  ;;  %v4227_v12 = vld [vmem:[%s8119_s5 + $0x418] sm:$0xf0] }
 0x303   :  { %3095 = vmatpush.bf16.msrb.mxu3 %v4694_v20  ;;  %v4355_v20 = vld [vmem:[%s8119_s5 + $0x518] sm:$0xf0] }
 0x304   :  { %3057 = vmatpush.bf16.msrb.mxu0 %v4294_v35  ;;  %v2831_v19 = vpop.f32.mrf.mxu2  ;;  %v4230_v35 = vor.u32 %v5050_v47, %v4227_v12 }
 0x305   :  { %3070 = vmatpush.bf16.msrb.mxu1 %v4422_v63  ;;  %v2844_v44 = vpop.f32.mrf.mxu3  ;;  %v4358_v63 = vor.u32 %v5082_v7, %v4355_v20  ;;  %v5193_v7 = vld [vmem:[%s8121_s7 + $0x80] sm:$0xff]  ;;  %v1404_v19 = vperm.slane %v7589_v2, 2 }
 0x306   :  { %3083 = vmatpush.bf16.msrb.mxu2 %v4550_v58  ;;  %v4486_v58 = vor.u32 %v5114_v52, %v4483_v50 }
 0x307   :  { %3096 = vmatpush.bf16.msrb.mxu3 %v4678_v54  ;;  %v1403_v54 = vperm.slane %v7589_v2, 1 }
 0x308   :  { %3058 = vmatpush.bf16.msrb.mxu0 %v4278_v4 }
 0x309   :  { %3071 = vmatpush.bf16.msrb.mxu1 %v4406_v25  ;;  %v2804_v16 = vadd.f32 %v7888_v36, %v1403_v54  ;;  %v5180_v25 = vld [vmem:[%s8121_s7 + $0x18] sm:$0xff] }
 0x30a   :  { %3084 = vmatpush.bf16.msrb.mxu2 %v4534_v28 }
 0x30b   :  { %3097 = vmatpush.bf16.msrb.mxu3 %v4662_v33  ;;  %v2817_v4 = vadd.f32 %v7896_v55, %v2804_v16  ;;  %v5188_v55 = vld [vmem:[%s8121_s7 + $0x58] sm:$0xff] }
 0x30c   :  { %3059 = vmatpush.bf16.msrb.mxu0 %v4262_v21  ;;  %v5200_v33 = vld [vmem:[%s8121_s7 + $0xb8] sm:$0xff] }
 0x30d   :  { %3072 = vmatpush.bf16.msrb.mxu1 %v4390_v30  ;;  %v2830_v36 = vadd.f32 %v7931_v23, %v2817_v4  ;;  %v5206_v4 = vld [vmem:[%s8121_s7 + $0xe8] sm:$0xff] }
 0x30e   :  { %3085 = vmatpush.bf16.msrb.mxu2 %v4518_v39 }
 0x30f   :  { %3098 = vmatpush.bf16.msrb.mxu3 %v4646_v62  ;;  %v2843_v28 = vadd.f32 %v7942_v49, %v2830_v36  ;;  %v5197_v62 = vld [vmem:[%s8121_s7 + $0xa0] sm:$0xff]  ;;  %v5203_v36 = vld [vmem:[%s8121_s7 + $0xd0] sm:$0xff] }
 0x310   :  { %3060 = vmatpush.bf16.msrb.mxu0 %v4246_v17  ;;  %v5194_v17 = vld [vmem:[%s8121_s7 + $0x88] sm:$0xff] }
 0x311   :  { %3073 = vmatpush.bf16.msrb.mxu1 %v4374_v6 }
 0x312   :  { %3086 = vmatpush.bf16.msrb.mxu2 %v4502_v31 }
 0x313   :  { %3099 = vmatpush.bf16.msrb.mxu3 %v4630_v59 }
 0x314   :  { %3061 = vmatpush.bf16.msrb.mxu0 %v4230_v35  ;;  %v2855_v27 = vpop.f32.mrf.mxu0 }
 0x315   :  { %3074 = vmatpush.bf16.msrb.mxu1 %v4358_v63  ;;  %v2856_v23 = vadd.f32 %v2855_v27, %v2843_v28  ;;  %v5202_v28 = vld [vmem:[%s8121_s7 + $0xc8] sm:$0xff] }
 0x316   :  { %3087 = vmatpush.bf16.msrb.mxu2 %v4486_v58 }
 0x317   :  { %3100 = vmatpush.bf16.msrb.mxu3 %v4614_v10  ;;  %3062 = vmatmul.bf16.vlgmr.msrb.gmra.mxu0 %v6890_v22  ;;  %v5190_v22 = vld [vmem:[%s8121_s7 + $0x68] sm:$0xff] }
 0x318   :  { %3370 = vmatpush.bf16.msra.mxu0 %v5184_v48  ;;  %3075 = vmatmul.bf16.vlgmr.msrb.gmra.mxu1 %v6898_v43  ;;  %v2868_v43 = vpop.f32.mrf.mxu1 }
 0x319   :  { %3383 = vmatpush.bf16.msra.mxu1 %v5192_v26  ;;  %3088 = vmatmul.bf16.vlgmr.msrb.gmra.mxu2 %v6900_v9  ;;  %v5181_v9 = vld [vmem:[%s8121_s7 + $0x20] sm:$0xff]  ;;  %v2869_v49 = vadd.f32 %v2868_v43, %v2856_v23 }
 0x31a   :  { %3101 = vmatmul.bf16.vlgmr.msrb.gmra.mxu3 %v6923_v29  ;;  %v5189_v29 = vld [vmem:[%s8121_s7 + $0x60] sm:$0xff]  ;;  %3396 = vmatpush.bf16.msra.mxu2 %v5200_v33 }
 0x31c   :  { %3371 = vmatpush.bf16.msra.mxu0 %v5183_v1  ;;  %v2881_v34 = vpop.f32.mrf.mxu2  ;;  %v2857_v3 = vpop.f32.mrf.mxu0  ;;  %v5208_v1 = vld [vmem:[%s8121_s7 + $0xf8] sm:$0xff] }
 0x31d   :  { %3384 = vmatpush.bf16.msra.mxu1 %v5191_v45  ;;  %v2894_v11 = vpop.f32.mrf.mxu3  ;;  %v2882_v21 = vadd.f32 %v2881_v34, %v2869_v49  ;;  %3409 = vmatpush.bf16.msra.mxu3 %v5208_v1 }
 0x31e   :  { %3397 = vmatpush.bf16.msra.mxu2 %v5199_v46 }
 0x31f   :  { %v2895_v60 = vadd.f32 %v2894_v11, %v2882_v21  ;;  %v5201_v11 = vld [vmem:[%s8121_s7 + $0xc0] sm:$0xff] }
 0x320   :  { %3372 = vmatpush.bf16.msra.mxu0 %v5182_v15  ;;  %v2870_v13 = vpop.f32.mrf.mxu1 }
 0x321   :  { %3385 = vmatpush.bf16.msra.mxu1 %v5190_v22  ;;  %v3107_v51 = vpack.c.bf16 %v2895_v60, %v2895_v60  ;;  %v5207_v22 = vld [vmem:[%s8121_s7 + $0xf0] sm:$0xff]  ;;  %v1405_v13 = vperm.slane %v7589_v2, 3 }
 0x322   :  { %3398 = vmatpush.bf16.msra.mxu2 %v5198_v41  ;;  %3410 = vmatpush.bf16.msra.mxu3 %v5207_v22 }
 0x324   :  { %3373 = vmatpush.bf16.msra.mxu0 %v5181_v9  ;;  %v2883_v30 = vpop.f32.mrf.mxu2  ;;  %v5205_v9 = vld [vmem:[%s8121_s7 + $0xe0] sm:$0xff] }
 0x325   :  { %3386 = vmatpush.bf16.msra.mxu1 %v5189_v29  ;;  %v2896_v39 = vpop.f32.mrf.mxu3  ;;  %v5204_v29 = vld [vmem:[%s8121_s7 + $0xd8] sm:$0xff] }
 0x326   :  { %3399 = vmatpush.bf16.msra.mxu2 %v5197_v62  ;;  %3411 = vmatpush.bf16.msra.mxu3 %v5206_v4 }
 0x328   :  { %3374 = vmatpush.bf16.msra.mxu0 %v5180_v25 }
 0x329   :  { %3387 = vmatpush.bf16.msra.mxu1 %v5188_v55 }
 0x32a   :  { %3400 = vmatpush.bf16.msra.mxu2 %v5196_v40  ;;  %3412 = vmatpush.bf16.msra.mxu3 %v5205_v9  ;;  %v5212_v40 = vld [vmem:[%s8122_s8] ss:$0 sm:$0xff] }
 0x32c   :  { %3375 = vmatpush.bf16.msra.mxu0 %v5179_v56 }
 0x32d   :  { %3388 = vmatpush.bf16.msra.mxu1 %v5187_v53 }
 0x32e   :  { %3401 = vmatpush.bf16.msra.mxu2 %v5195_v61  ;;  %3413 = vmatpush.bf16.msra.mxu3 %v5204_v29 }
 0x330   :  { %3376 = vmatpush.bf16.msra.mxu0 %v5178_v42 }
 0x331   :  { %3389 = vmatpush.bf16.msra.mxu1 %v5186_v32 }
 0x332   :  { %3402 = vmatpush.bf16.msra.mxu2 %v5194_v17  ;;  %3414 = vmatpush.bf16.msra.mxu3 %v5203_v36 }
 0x334   :  { %3377 = vmatpush.bf16.msra.mxu0 %v5177_v0  ;;  %v2907_v37 = vpop.f32.mrf.mxu0 }
 0x335   :  { %3390 = vmatpush.bf16.msra.mxu1 %v5185_v57  ;;  %v2920_v5 = vpop.f32.mrf.mxu1  ;;  %v2908_v52 = vadd.f32 %v2907_v37, %v1404_v19 }
 0x336   :  { %3403 = vmatpush.bf16.msra.mxu2 %v5193_v7  ;;  %3415 = vmatpush.bf16.msra.mxu3 %v5202_v28 }
 0x337   :  { %3378 = vmatmul.bf16.vlgmr.msra.gmra.mxu0 %v3106_v24  ;;  %v2921_v50 = vadd.f32 %v2920_v5, %v2908_v52 }
 0x338   :  { %3391 = vmatmul.bf16.vlgmr.msra.gmra.mxu1 %v3107_v51 }
 0x33a   :  { %3416 = vmatpush.bf16.msra.mxu3 %v5201_v11 }
 0x33c   :  { %v2933_v6 = vpop.f32.mrf.mxu2  ;;  %v2909_v47 = vpop.f32.mrf.mxu0 }
 0x33d   :  { %v2946_v31 = vpop.f32.mrf.mxu3  ;;  %v2922_v12 = vpop.f32.mrf.mxu1  ;;  %v2934_v44 = vadd.f32 %v2933_v6, %v2921_v50 }
 0x33f   :  { %v2947_v38 = vadd.f32 %v2946_v31, %v2934_v44 }
 0x344   :  { %v2935_v59 = vpop.f32.mrf.mxu2 }
 0x345   :  { %v2948_v20 = vpop.f32.mrf.mxu3 }
 0x354   :  { %v2959_v8 = vpop.f32.mrf.mxu0 }
 0x355   :  { %v2972_v35 = vpop.f32.mrf.mxu1  ;;  %v2960_v63 = vadd.f32 %v2959_v8, %v2947_v38 }
 0x357   :  { %v2973_v58 = vadd.f32 %v2972_v35, %v2960_v63 }
 0x35c   :  { %v2985_v10 = vpop.f32.mrf.mxu2  ;;  %v2961_v54 = vpop.f32.mrf.mxu0 }
 0x35d   :  { %v2986_v48 = vadd.f32 %v2985_v10, %v2973_v58  ;;  %v2998_v26 = vpop.f32.mrf.mxu3  ;;  %v2974_v45 = vpop.f32.mrf.mxu1 }
 0x35f   :  { %v2999_v16 = vadd.f32 %v2998_v26, %v2986_v48 }
 0x361   :  { %v3108_v15 = vpack.c.bf16 %v2999_v16, %v2999_v16 }
 0x363   :  { %3404 = vmatmul.bf16.vlgmr.msra.gmra.mxu2 %v3108_v15 }
 0x364   :  { %v2987_v27 = vpop.f32.mrf.mxu2 }
 0x365   :  { %v3000_v43 = vpop.f32.mrf.mxu3 }
 0x374   :  { %v3011_v25 = vpop.f32.mrf.mxu0 }
 0x375   :  { %v3024_v55 = vpop.f32.mrf.mxu1  ;;  %v3012_v49 = vadd.f32 %v3011_v25, %v1405_v13 }
 0x377   :  { %v3025_v42 = vadd.f32 %v3024_v55, %v3012_v49 }
 0x37c   :  { %v3037_v34 = vpop.f32.mrf.mxu2  ;;  %v3013_v33 = vpop.f32.mrf.mxu0 }
 0x37d   :  { %v3050_v3 = vpop.f32.mrf.mxu3  ;;  %v3026_v23 = vpop.f32.mrf.mxu1  ;;  %v3038_v18 = vadd.f32 %v3037_v34, %v3025_v42 }
 0x37f   :  { %v3051_v32 = vadd.f32 %v3050_v3, %v3038_v18 }
 0x384   :  { %v3039_v56 = vpop.f32.mrf.mxu2 }
 0x385   :  { %v3052_v53 = vpop.f32.mrf.mxu3 }
 0x394   :  { %v3063_v46 = vpop.f32.mrf.mxu0 }
 0x395   :  { %v3076_v21 = vpop.f32.mrf.mxu1  ;;  %v3064_v30 = vadd.f32 %v3063_v46, %v3051_v32 }
 0x397   :  { %v3077_v39 = vadd.f32 %v3076_v21, %v3064_v30 }
 0x39c   :  { %v3089_v41 = vpop.f32.mrf.mxu2  ;;  %v3065_v57 = vpop.f32.mrf.mxu0 }
 0x39d   :  { %v3090_v0 = vadd.f32 %v3089_v41, %v3077_v39  ;;  %v3102_v14 = vpop.f32.mrf.mxu3  ;;  %v3078_v60 = vpop.f32.mrf.mxu1 }
 0x39f   :  { %v3103_v62 = vadd.f32 %v3102_v14, %v3090_v0 }
 0x3a1   :  { %v3109_v24 = vpack.c.bf16 %v3103_v62, %v3103_v62 }
 0x3a3   :  { %3417 = vmatmul.bf16.vlgmr.msra.gmra.mxu3 %v3109_v24 }
 0x3a4   :  { %v3091_v51 = vpop.f32.mrf.mxu2 }
 0x3a5   :  { %v3104_v2 = vpop.f32.mrf.mxu3 }
 0x3b4   :  { %v3379_v37 = vpop.f32.mrf.mxu0 }
 0x3b5   :  { %v3380_v5 = vadd.f32 %v5212_v40, %v3379_v37  ;;  %v3392_v61 = vpop.f32.mrf.mxu1 }
 0x3b7   :  { %v3393_v17 = vadd.f32 %v3392_v61, %v3380_v5 }
 0x3bc   :  { %v3381_v6 = vpop.f32.mrf.mxu0 }
 0x3bd   :  { %v3394_v31 = vpop.f32.mrf.mxu1 }
 0x3e6   :  { %v3405_v47 = vpop.f32.mrf.mxu2 }
 0x3e7   :  { %v3406_v7 = vadd.f32 %v3405_v47, %v3393_v17 }
 0x3ee   :  { %v3407_v12 = vpop.f32.mrf.mxu2 }
 0x426   :  { %v3418_v59 = vpop.f32.mrf.mxu3 }
 0x427   :  { %v3419_v19 = vadd.f32 %v3418_v59, %v3406_v7 }
 0x429   :  { %3422 = vst [vmem:[#allocation3] sm:$0x3] %v3419_v19 }
 0x42a   :  { %3433 = dma.vmem_to_hbm [thread:$0]  %s3429_s27, 32, %s3431_s0, [#allocation4]  }
 0x42e   :  { %v3420_v20 = vpop.f32.mrf.mxu3 }
 0x42f   :  { %5247 = dma.done.wait [#allocation4], 32  }
 0x430   :  { %5248 = vsyncadd [#allocation4], 4294967264 }
 0x431   :  { %3438 = vsyncpa [#allocation4], 1 }

</bundles_post_ra>
